<compile_context>
chip_gen: v7x
topology: tpu7x:2x2x1
jax: 0.10.0
libtpu: 0.0.40
codegen_flags: <defaults>
</compile_context>

<pallas_src>
import jax
import jax.numpy as jnp
from jax.experimental import pallas as pl
from jax.experimental.pallas import tpu as pltpu

# ----------------------------------------------------------------------------
# Model / packing constants
# ----------------------------------------------------------------------------
F_IN = 16              # num_features (natural, un-padded contraction dim)
NHID = 32              # nhid
HID = 64               # nhid * 2  -> working feature width of the conv stack
NLAYER = 5
NUM_CLASSES = 4
LANE = 128             # lane-dense width for the final output slab only

N_BLK = 256            # nodes per grid block (graph mini-batch)
G_BLK = 8              # graphs per grid block (pooled rows per block)
NUM_BLOCKS = 2         # grid size (graph mini-batches per call)

VEC_ROWS = 16          # consolidated bias/scale slab rows
ROW_PRE_B = 0
ROW_CONV_B0 = 1        # rows 1..5: per-layer folded conv biases
ROW_POST_B = 6
ROW_POST_S = 7
ROW_POST_T = 8
ROW_RO_B = 9


# ----------------------------------------------------------------------------
# Fused forward kernel (one grid step == one graph mini-batch block)
# ----------------------------------------------------------------------------
def _fused_forward_kernel(x_ref, a_ref, p_ref,
                          pre_w_ref, wl_ref, wr_ref, post_w_ref, ro_w_ref,
                          vec_ref, o_ref):
    f32 = jnp.float32
    bf16 = jnp.bfloat16
    relu = lambda v: jnp.maximum(v, 0.0)

    vecs = vec_ref[...]                                       # [16, 128] f32
    pre_b = vecs[ROW_PRE_B:ROW_PRE_B + 1, :HID]
    post_b = vecs[ROW_POST_B:ROW_POST_B + 1, :HID]
    post_s = vecs[ROW_POST_S:ROW_POST_S + 1, :HID]
    post_t = vecs[ROW_POST_T:ROW_POST_T + 1, :HID]
    ro_b = vecs[ROW_RO_B:ROW_RO_B + 1, :]

    a = a_ref[...]                                            # bf16 [N_BLK, N_BLK]

    # pre Linear (+ folded bn_pre) + ReLU  (f32 activations, natural 64-lane width)
    h = relu(jnp.dot(x_ref[...], pre_w_ref[...],
                     preferred_element_type=f32) + pre_b)

    # SAGEConv stack: mean aggregation, split Wl/Wr matmuls (BN folded), ReLU.
    for l in range(NLAYER):                                   # static unroll (5 layers)
        hb = h.astype(bf16)
        agg = jnp.dot(a, hb, preferred_element_type=f32)      # [N_BLK, HID]
        y = (jnp.dot(agg.astype(bf16), wl_ref[l], preferred_element_type=f32)
             + jnp.dot(hb, wr_ref[l], preferred_element_type=f32)
             + vecs[ROW_CONV_B0 + l:ROW_CONV_B0 + l + 1, :HID])
        h = relu(y)
        # TODO(synk): F.dropout(p=0.3) skipped -- identity in eval mode.

    # global_add_pool: pooled[g] = sum_{i in graph g} h[i]
    pool = p_ref[...].astype(bf16)                            # [G_BLK, N_BLK]
    pooled = jnp.dot(pool, h.astype(bf16), preferred_element_type=f32)

    # post Linear + ReLU, then bn_post (not foldable through the ReLU) + ReLU
    z = relu(jnp.dot(pooled.astype(bf16), post_w_ref[...],
                     preferred_element_type=f32) + post_b)
    z = relu(z * post_s + post_t)

    # readout Linear, stored as one lane-dense [G_BLK, 128] slab
    o_ref[...] = jnp.dot(z.astype(bf16), ro_w_ref[...],
                         preferred_element_type=f32) + ro_b


@jax.jit
def graphsage_small_forward(packed, x_bf16, a_blocks, pool_blocks):
    num_blocks = x_bf16.shape[0] // N_BLK
    args = (x_bf16, a_blocks, pool_blocks,
            packed["pre_w"], packed["conv_wl"], packed["conv_wr"],
            packed["post_w"], packed["ro_w"], packed["vecs"])
    return pl.pallas_call(
        _fused_forward_kernel,
        out_shape=jax.ShapeDtypeStruct((num_blocks * G_BLK, LANE), jnp.float32),
        grid=(num_blocks,),
        in_specs=[
            pl.BlockSpec((N_BLK, F_IN), lambda i: (i, 0)),            # x  (bf16)
            pl.BlockSpec((N_BLK, N_BLK), lambda i: (i, 0)),           # adjacency block (bf16)
            pl.BlockSpec((G_BLK, N_BLK), lambda i: (i, 0)),           # pool block (f32)
            pl.BlockSpec((F_IN, HID), lambda i: (0, 0)),              # pre_w (bf16)
            pl.BlockSpec((NLAYER, HID, HID), lambda i: (0, 0, 0)),    # conv Wl stack (bf16)
            pl.BlockSpec((NLAYER, HID, HID), lambda i: (0, 0, 0)),    # conv Wr stack (bf16)
            pl.BlockSpec((HID, HID), lambda i: (0, 0)),               # post_w (bf16)
            pl.BlockSpec((HID, LANE), lambda i: (0, 0)),              # ro_w (bf16)
            pl.BlockSpec((VEC_ROWS, LANE), lambda i: (0, 0)),         # bias/scale slab (f32)
        ],
        out_specs=pl.BlockSpec((G_BLK, LANE), lambda i: (i, 0)),
        compiler_params=pltpu.CompilerParams(
            dimension_semantics=("parallel",)),
    )(*args)


# ----------------------------------------------------------------------------
# Parameter construction (deterministic, synthetic -- matches module shapes)
# ----------------------------------------------------------------------------
def _bn_scale_shift(gamma, beta, running_mean, running_var, eps=1e-5):
    scale = gamma / jnp.sqrt(running_var + eps)
    shift = beta - running_mean * scale
    return scale[None, :], shift[None, :]


def init_params(key, num_features=F_IN, num_classes=NUM_CLASSES, nhid=NHID, nlayer=NLAYER):
    keys = iter(jax.random.split(key, 64))

    def lin(in_f, out_f, bias=True):
        # stored as W^T [in, out] so forward computes x @ W^T (== torch x @ weight.T)
        w = 0.1 * jax.random.normal(next(keys), (in_f, out_f), jnp.float32)
        b = (0.1 * jax.random.normal(next(keys), (1, out_f), jnp.float32)
             if bias else jnp.zeros((1, out_f), jnp.float32))
        return w, b

    def bn(feat):
        gamma = 1.0 + 0.1 * jax.random.normal(next(keys), (feat,), jnp.float32)
        beta = 0.1 * jax.random.normal(next(keys), (feat,), jnp.float32)
        running_mean = jnp.zeros((feat,), jnp.float32)   # PyTorch defaults (eval mode)
        running_var = jnp.ones((feat,), jnp.float32)
        return _bn_scale_shift(gamma, beta, running_mean, running_var)

    p = {}
    p["pre_w"], p["pre_b"] = lin(num_features, nhid)
    p["bn_pre"] = bn(nhid)

    convs = []
    in_dim = nhid
    for _ in range(nlayer):
        wl, bl = lin(in_dim, nhid * 2, bias=True)        # lin_l (aggregated neighbors)
        wr, _ = lin(in_dim, nhid * 2, bias=False)        # lin_r (root, no bias)
        convs.append({"wl": wl, "bl": bl, "wr": wr, "bn": bn(nhid * 2)})
        in_dim = nhid * 2
    p["convs"] = convs

    p["post_w"], p["post_b"] = lin(nhid * 2, nhid * 2)
    p["bn_post"] = bn(nhid * 2)
    p["ro_w"], p["ro_b"] = lin(nhid * 2, num_classes)
    return p


def _pad2(w, rows, cols):
    out = jnp.zeros((rows, cols), jnp.float32)
    return out.at[: w.shape[0], : w.shape[1]].set(w)


def prepare_packed_params(params):
    """Fold eval-mode BN into the preceding linears, cast matmul weights to bf16,
    stack the per-layer SAGE weights, and consolidate all bias/scale vectors into
    one [16,128] f32 slab.  Padded rows/columns are exactly zero so padded lanes
    stay zero through ReLU / pooling."""
    s, t = params["bn_pre"]
    # pre output padded 32 -> 64 so the conv-0 weights stack uniformly at [64,64]
    pre_w = _pad2(params["pre_w"] * s, F_IN, HID).astype(jnp.bfloat16)

    vecs = jnp.zeros((VEC_ROWS, LANE), jnp.float32)
    vecs = vecs.at[ROW_PRE_B, :NHID].set((params["pre_b"] * s + t)[0])

    wl_stack, wr_stack = [], []
    for l, c in enumerate(params["convs"]):
        s, t = c["bn"]
        wl_stack.append(_pad2(c["wl"] * s, HID, HID))      # BN scale folded column-wise
        wr_stack.append(_pad2(c["wr"] * s, HID, HID))
        vecs = vecs.at[ROW_CONV_B0 + l, :HID].set((c["bl"] * s + t)[0])
    conv_wl = jnp.stack(wl_stack).astype(jnp.bfloat16)     # [NLAYER, 64, 64]
    conv_wr = jnp.stack(wr_stack).astype(jnp.bfloat16)     # [NLAYER, 64, 64]

    s, t = params["bn_post"]                               # ReLU before bn_post -> no fold
    vecs = vecs.at[ROW_POST_B, :HID].set(params["post_b"][0])
    vecs = vecs.at[ROW_POST_S, :HID].set(s[0])
    vecs = vecs.at[ROW_POST_T, :HID].set(t[0])
    vecs = vecs.at[ROW_RO_B, :NUM_CLASSES].set(params["ro_b"][0])

    return {
        "pre_w": pre_w,
        "conv_wl": conv_wl,
        "conv_wr": conv_wr,
        "post_w": params["post_w"].astype(jnp.bfloat16),
        "ro_w": _pad2(params["ro_w"], HID, LANE).astype(jnp.bfloat16),
        "vecs": vecs,
    }


# ----------------------------------------------------------------------------
# Graph construction helpers
# ----------------------------------------------------------------------------
def build_mean_adjacency(edge_index, num_nodes):
    # A_mean[i, j] = (#edges j->i) / in_degree(i); 0-degree rows -> 0.
    # Matches PyG SAGEConv mean aggregation (duplicate edges counted with multiplicity).
    src, dst = edge_index[0], edge_index[1]
    a = jnp.zeros((num_nodes, num_nodes), jnp.float32)
    a = a.at[dst, src].add(1.0)
    deg = jnp.sum(a, axis=1, keepdims=True)
    return a / jnp.clip(deg, 1.0)


def build_pool_matrix(batch, num_graphs):
    return (batch[None, :] == jnp.arange(num_graphs)[:, None]).astype(jnp.float32)


# ----------------------------------------------------------------------------
# Pure-JAX f32 reference (unfolded, unpadded) for a correctness sanity check
# ----------------------------------------------------------------------------
def reference_forward(params, x, a_mean, pool_mat):
    relu = lambda v: jnp.maximum(v, 0.0)
    s, sh = params["bn_pre"]
    h = relu((x @ params["pre_w"] + params["pre_b"]) * s + sh)
    for c in params["convs"]:
        s, sh = c["bn"]
        y = (a_mean @ h) @ c["wl"] + c["bl"] + h @ c["wr"]
        h = relu(y * s + sh)
    h = pool_mat @ h
    s, sh = params["bn_post"]
    h = relu(relu(h @ params["post_w"] + params["post_b"]) * s + sh)
    return h @ params["ro_w"] + params["ro_b"]


# ----------------------------------------------------------------------------
# Main
# ----------------------------------------------------------------------------
if __name__ == "__main__":
    key = jax.random.PRNGKey(0)
    k_p, k_data = jax.random.split(key)

    params = init_params(k_p)
    packed = prepare_packed_params(params)

    nodes_per_graph = N_BLK // G_BLK          # 32
    edges_per_graph = 128
    batch_vec = jnp.repeat(jnp.arange(G_BLK, dtype=jnp.int32), nodes_per_graph)

    # Build NUM_BLOCKS independent graph mini-batches (block-diagonal overall graph;
    # edges stay within each graph, like a PyG batch).
    x_blocks, a_blocks, p_blocks = [], [], []
    data_keys = jax.random.split(k_data, NUM_BLOCKS * 2)
    for b in range(NUM_BLOCKS):
        kx, ke = data_keys[2 * b], data_keys[2 * b + 1]
        xb = jax.random.normal(kx, (N_BLK, F_IN), jnp.float32)
        gkeys = jax.random.split(ke, G_BLK)
        e_cols = []
        for g in range(G_BLK):
            e = jax.random.randint(gkeys[g], (2, edges_per_graph),
                                   0, nodes_per_graph, jnp.int32)
            e_cols.append(e + g * nodes_per_graph)
        eb = jnp.concatenate(e_cols, axis=1)
        x_blocks.append(xb)
        a_blocks.append(build_mean_adjacency(eb, N_BLK))
        p_blocks.append(build_pool_matrix(batch_vec, G_BLK))

    x_all = jnp.concatenate(x_blocks, axis=0)       # [NUM_BLOCKS*N_BLK, F_IN]
    a_all = jnp.concatenate(a_blocks, axis=0)       # [NUM_BLOCKS*N_BLK, N_BLK]
    p_all = jnp.concatenate(p_blocks, axis=0)       # [NUM_BLOCKS*G_BLK, N_BLK]

    out_pad = graphsage_small_forward(
        packed, x_all.astype(jnp.bfloat16), a_all.astype(jnp.bfloat16), p_all)
    out_pad = jax.block_until_ready(out_pad)
    out = out_pad[:, :NUM_CLASSES]                  # [NUM_BLOCKS*G_BLK, num_classes]

    refs = [reference_forward(params, x_blocks[b], a_blocks[b], p_blocks[b])
            for b in range(NUM_BLOCKS)]
    ref = jnp.concatenate(refs, axis=0)

    assert out.shape == (NUM_BLOCKS * G_BLK, NUM_CLASSES)
    rel_err = jnp.max(jnp.abs(out - ref)) / (jnp.max(jnp.abs(ref)) + 1e-6)
    assert rel_err < 3e-2, f"Pallas output mismatch vs reference (rel-to-max err {rel_err})"

    print("KERNEL_OK")
</pallas_src>

<mosaic_0001>
module attributes {stable_mosaic.version = 11 : i64} {
  func.func @_fused_forward_kernel(%arg0: i32, %arg1: memref<256x16xbf16, #tpu.memory_space<vmem>>, %arg2: memref<256x256xbf16, #tpu.memory_space<vmem>>, %arg3: memref<8x256xf32, #tpu.memory_space<vmem>>, %arg4: memref<16x64xbf16, #tpu.memory_space<vmem>>, %arg5: memref<5x64x64xbf16, #tpu.memory_space<vmem>>, %arg6: memref<5x64x64xbf16, #tpu.memory_space<vmem>>, %arg7: memref<64x64xbf16, #tpu.memory_space<vmem>>, %arg8: memref<64x128xbf16, #tpu.memory_space<vmem>>, %arg9: memref<16x128xf32, #tpu.memory_space<vmem>>, %arg10: memref<8x128xf32, #tpu.memory_space<vmem>>) attributes {dimension_semantics = [#tpu.dimension_semantics<parallel>], iteration_bounds = array<i64: 2>, scalar_prefetch = 0 : i64, scratch_operands = 0 : i64, tpu.core_type = #tpu.core_type<tc>, window_params = [{transform_indices = @transform_0, window_bounds = array<i64: 256, 16>}, {transform_indices = @transform_1, window_bounds = array<i64: 256, 256>}, {transform_indices = @transform_2, window_bounds = array<i64: 8, 256>}, {pipeline_mode = #tpu.pipeline_mode<synchronous>, transform_indices = @transform_3, window_bounds = array<i64: 16, 64>}, {pipeline_mode = #tpu.pipeline_mode<synchronous>, transform_indices = @transform_4, window_bounds = array<i64: 5, 64, 64>}, {pipeline_mode = #tpu.pipeline_mode<synchronous>, transform_indices = @transform_5, window_bounds = array<i64: 5, 64, 64>}, {pipeline_mode = #tpu.pipeline_mode<synchronous>, transform_indices = @transform_6, window_bounds = array<i64: 64, 64>}, {pipeline_mode = #tpu.pipeline_mode<synchronous>, transform_indices = @transform_7, window_bounds = array<i64: 64, 128>}, {pipeline_mode = #tpu.pipeline_mode<synchronous>, transform_indices = @transform_8, window_bounds = array<i64: 16, 128>}, {transform_indices = @transform_9, window_bounds = array<i64: 8, 128>}]} {
    %c0 = arith.constant 0 : index
    %c0_0 = arith.constant 0 : index
    %0 = vector.load %arg9[%c0, %c0_0] : memref<16x128xf32, #tpu.memory_space<vmem>>, vector<16x128xf32>
    %1 = vector.extract_strided_slice %0 {offsets = [0, 0], sizes = [1, 64], strides = [1, 1]} : vector<16x128xf32> to vector<1x64xf32>
    %2 = vector.extract_strided_slice %0 {offsets = [6, 0], sizes = [1, 64], strides = [1, 1]} : vector<16x128xf32> to vector<1x64xf32>
    %3 = vector.extract_strided_slice %0 {offsets = [7, 0], sizes = [1, 64], strides = [1, 1]} : vector<16x128xf32> to vector<1x64xf32>
    %4 = vector.extract_strided_slice %0 {offsets = [8, 0], sizes = [1, 64], strides = [1, 1]} : vector<16x128xf32> to vector<1x64xf32>
    %5 = vector.extract_strided_slice %0 {offsets = [9, 0], sizes = [1, 128], strides = [1, 1]} : vector<16x128xf32> to vector<1x128xf32>
    %c0_1 = arith.constant 0 : index
    %c0_2 = arith.constant 0 : index
    %6 = vector.load %arg2[%c0_1, %c0_2] : memref<256x256xbf16, #tpu.memory_space<vmem>>, vector<256x256xbf16>
    %c0_3 = arith.constant 0 : index
    %c0_4 = arith.constant 0 : index
    %7 = vector.load %arg1[%c0_3, %c0_4] : memref<256x16xbf16, #tpu.memory_space<vmem>>, vector<256x16xbf16>
    %c0_5 = arith.constant 0 : index
    %c0_6 = arith.constant 0 : index
    %8 = vector.load %arg4[%c0_5, %c0_6] : memref<16x64xbf16, #tpu.memory_space<vmem>>, vector<16x64xbf16>
    %cst = arith.constant dense<0.000000e+00> : vector<256x64xf32>
    %9 = tpu.matmul %7, %8, %cst {dimension_numbers = #tpu.dot_dimension_numbers<[1], [0], [0], [1], [0, 0, 1, 1], [], []>} : vector<256x16xbf16>, vector<16x64xbf16>, vector<256x64xf32> -> vector<256x64xf32>
    %10 = vector.broadcast %1 : vector<1x64xf32> to vector<256x64xf32>
    %11 = arith.addf %9, %10 : vector<256x64xf32>
    %cst_7 = arith.constant 0.000000e+00 : f32
    %12 = vector.broadcast %cst_7 : f32 to vector<256x64xf32>
    %13 = arith.maximumf %11, %12 : vector<256x64xf32>
    %14 = arith.truncf %13 : vector<256x64xf32> to vector<256x64xbf16>
    %cst_8 = arith.constant dense<0.000000e+00> : vector<256x64xf32>
    %15 = tpu.matmul %6, %14, %cst_8 {dimension_numbers = #tpu.dot_dimension_numbers<[1], [0], [0], [1], [0, 0, 1, 1], [], []>} : vector<256x256xbf16>, vector<256x64xbf16>, vector<256x64xf32> -> vector<256x64xf32>
    %16 = arith.truncf %15 : vector<256x64xf32> to vector<256x64xbf16>
    %c0_9 = arith.constant 0 : index
    %c0_10 = arith.constant 0 : index
    %c0_11 = arith.constant 0 : index
    %17 = vector.load %arg5[%c0_9, %c0_10, %c0_11] : memref<5x64x64xbf16, #tpu.memory_space<vmem>>, vector<1x64x64xbf16>
    %18 = vector.shape_cast %17 : vector<1x64x64xbf16> to vector<64x64xbf16>
    %cst_12 = arith.constant dense<0.000000e+00> : vector<256x64xf32>
    %19 = tpu.matmul %16, %18, %cst_12 {dimension_numbers = #tpu.dot_dimension_numbers<[1], [0], [0], [1], [0, 0, 1, 1], [], []>} : vector<256x64xbf16>, vector<64x64xbf16>, vector<256x64xf32> -> vector<256x64xf32>
    %c0_13 = arith.constant 0 : index
    %c0_14 = arith.constant 0 : index
    %c0_15 = arith.constant 0 : index
    %20 = vector.load %arg6[%c0_13, %c0_14, %c0_15] : memref<5x64x64xbf16, #tpu.memory_space<vmem>>, vector<1x64x64xbf16>
    %21 = vector.shape_cast %20 : vector<1x64x64xbf16> to vector<64x64xbf16>
    %cst_16 = arith.constant dense<0.000000e+00> : vector<256x64xf32>
    %22 = tpu.matmul %14, %21, %cst_16 {dimension_numbers = #tpu.dot_dimension_numbers<[1], [0], [0], [1], [0, 0, 1, 1], [], []>} : vector<256x64xbf16>, vector<64x64xbf16>, vector<256x64xf32> -> vector<256x64xf32>
    %23 = arith.addf %19, %22 : vector<256x64xf32>
    %24 = vector.extract_strided_slice %0 {offsets = [1, 0], sizes = [1, 64], strides = [1, 1]} : vector<16x128xf32> to vector<1x64xf32>
    %25 = vector.broadcast %24 : vector<1x64xf32> to vector<256x64xf32>
    %26 = arith.addf %23, %25 : vector<256x64xf32>
    %cst_17 = arith.constant 0.000000e+00 : f32
    %27 = vector.broadcast %cst_17 : f32 to vector<256x64xf32>
    %28 = arith.maximumf %26, %27 : vector<256x64xf32>
    %29 = arith.truncf %28 : vector<256x64xf32> to vector<256x64xbf16>
    %cst_18 = arith.constant dense<0.000000e+00> : vector<256x64xf32>
    %30 = tpu.matmul %6, %29, %cst_18 {dimension_numbers = #tpu.dot_dimension_numbers<[1], [0], [0], [1], [0, 0, 1, 1], [], []>} : vector<256x256xbf16>, vector<256x64xbf16>, vector<256x64xf32> -> vector<256x64xf32>
    %31 = arith.truncf %30 : vector<256x64xf32> to vector<256x64xbf16>
    %c1 = arith.constant 1 : index
    %c0_19 = arith.constant 0 : index
    %c0_20 = arith.constant 0 : index
    %32 = vector.load %arg5[%c1, %c0_19, %c0_20] : memref<5x64x64xbf16, #tpu.memory_space<vmem>>, vector<1x64x64xbf16>
    %33 = vector.shape_cast %32 : vector<1x64x64xbf16> to vector<64x64xbf16>
    %cst_21 = arith.constant dense<0.000000e+00> : vector<256x64xf32>
    %34 = tpu.matmul %31, %33, %cst_21 {dimension_numbers = #tpu.dot_dimension_numbers<[1], [0], [0], [1], [0, 0, 1, 1], [], []>} : vector<256x64xbf16>, vector<64x64xbf16>, vector<256x64xf32> -> vector<256x64xf32>
    %c1_22 = arith.constant 1 : index
    %c0_23 = arith.constant 0 : index
    %c0_24 = arith.constant 0 : index
    %35 = vector.load %arg6[%c1_22, %c0_23, %c0_24] : memref<5x64x64xbf16, #tpu.memory_space<vmem>>, vector<1x64x64xbf16>
    %36 = vector.shape_cast %35 : vector<1x64x64xbf16> to vector<64x64xbf16>
    %cst_25 = arith.constant dense<0.000000e+00> : vector<256x64xf32>
    %37 = tpu.matmul %29, %36, %cst_25 {dimension_numbers = #tpu.dot_dimension_numbers<[1], [0], [0], [1], [0, 0, 1, 1], [], []>} : vector<256x64xbf16>, vector<64x64xbf16>, vector<256x64xf32> -> vector<256x64xf32>
    %38 = arith.addf %34, %37 : vector<256x64xf32>
    %39 = vector.extract_strided_slice %0 {offsets = [2, 0], sizes = [1, 64], strides = [1, 1]} : vector<16x128xf32> to vector<1x64xf32>
    %40 = vector.broadcast %39 : vector<1x64xf32> to vector<256x64xf32>
    %41 = arith.addf %38, %40 : vector<256x64xf32>
    %cst_26 = arith.constant 0.000000e+00 : f32
    %42 = vector.broadcast %cst_26 : f32 to vector<256x64xf32>
    %43 = arith.maximumf %41, %42 : vector<256x64xf32>
    %44 = arith.truncf %43 : vector<256x64xf32> to vector<256x64xbf16>
    %cst_27 = arith.constant dense<0.000000e+00> : vector<256x64xf32>
    %45 = tpu.matmul %6, %44, %cst_27 {dimension_numbers = #tpu.dot_dimension_numbers<[1], [0], [0], [1], [0, 0, 1, 1], [], []>} : vector<256x256xbf16>, vector<256x64xbf16>, vector<256x64xf32> -> vector<256x64xf32>
    %46 = arith.truncf %45 : vector<256x64xf32> to vector<256x64xbf16>
    %c2 = arith.constant 2 : index
    %c0_28 = arith.constant 0 : index
    %c0_29 = arith.constant 0 : index
    %47 = vector.load %arg5[%c2, %c0_28, %c0_29] : memref<5x64x64xbf16, #tpu.memory_space<vmem>>, vector<1x64x64xbf16>
    %48 = vector.shape_cast %47 : vector<1x64x64xbf16> to vector<64x64xbf16>
    %cst_30 = arith.constant dense<0.000000e+00> : vector<256x64xf32>
    %49 = tpu.matmul %46, %48, %cst_30 {dimension_numbers = #tpu.dot_dimension_numbers<[1], [0], [0], [1], [0, 0, 1, 1], [], []>} : vector<256x64xbf16>, vector<64x64xbf16>, vector<256x64xf32> -> vector<256x64xf32>
    %c2_31 = arith.constant 2 : index
    %c0_32 = arith.constant 0 : index
    %c0_33 = arith.constant 0 : index
    %50 = vector.load %arg6[%c2_31, %c0_32, %c0_33] : memref<5x64x64xbf16, #tpu.memory_space<vmem>>, vector<1x64x64xbf16>
    %51 = vector.shape_cast %50 : vector<1x64x64xbf16> to vector<64x64xbf16>
    %cst_34 = arith.constant dense<0.000000e+00> : vector<256x64xf32>
    %52 = tpu.matmul %44, %51, %cst_34 {dimension_numbers = #tpu.dot_dimension_numbers<[1], [0], [0], [1], [0, 0, 1, 1], [], []>} : vector<256x64xbf16>, vector<64x64xbf16>, vector<256x64xf32> -> vector<256x64xf32>
    %53 = arith.addf %49, %52 : vector<256x64xf32>
    %54 = vector.extract_strided_slice %0 {offsets = [3, 0], sizes = [1, 64], strides = [1, 1]} : vector<16x128xf32> to vector<1x64xf32>
    %55 = vector.broadcast %54 : vector<1x64xf32> to vector<256x64xf32>
    %56 = arith.addf %53, %55 : vector<256x64xf32>
    %cst_35 = arith.constant 0.000000e+00 : f32
    %57 = vector.broadcast %cst_35 : f32 to vector<256x64xf32>
    %58 = arith.maximumf %56, %57 : vector<256x64xf32>
    %59 = arith.truncf %58 : vector<256x64xf32> to vector<256x64xbf16>
    %cst_36 = arith.constant dense<0.000000e+00> : vector<256x64xf32>
    %60 = tpu.matmul %6, %59, %cst_36 {dimension_numbers = #tpu.dot_dimension_numbers<[1], [0], [0], [1], [0, 0, 1, 1], [], []>} : vector<256x256xbf16>, vector<256x64xbf16>, vector<256x64xf32> -> vector<256x64xf32>
    %61 = arith.truncf %60 : vector<256x64xf32> to vector<256x64xbf16>
    %c3 = arith.constant 3 : index
    %c0_37 = arith.constant 0 : index
    %c0_38 = arith.constant 0 : index
    %62 = vector.load %arg5[%c3, %c0_37, %c0_38] : memref<5x64x64xbf16, #tpu.memory_space<vmem>>, vector<1x64x64xbf16>
    %63 = vector.shape_cast %62 : vector<1x64x64xbf16> to vector<64x64xbf16>
    %cst_39 = arith.constant dense<0.000000e+00> : vector<256x64xf32>
    %64 = tpu.matmul %61, %63, %cst_39 {dimension_numbers = #tpu.dot_dimension_numbers<[1], [0], [0], [1], [0, 0, 1, 1], [], []>} : vector<256x64xbf16>, vector<64x64xbf16>, vector<256x64xf32> -> vector<256x64xf32>
    %c3_40 = arith.constant 3 : index
    %c0_41 = arith.constant 0 : index
    %c0_42 = arith.constant 0 : index
    %65 = vector.load %arg6[%c3_40, %c0_41, %c0_42] : memref<5x64x64xbf16, #tpu.memory_space<vmem>>, vector<1x64x64xbf16>
    %66 = vector.shape_cast %65 : vector<1x64x64xbf16> to vector<64x64xbf16>
    %cst_43 = arith.constant dense<0.000000e+00> : vector<256x64xf32>
    %67 = tpu.matmul %59, %66, %cst_43 {dimension_numbers = #tpu.dot_dimension_numbers<[1], [0], [0], [1], [0, 0, 1, 1], [], []>} : vector<256x64xbf16>, vector<64x64xbf16>, vector<256x64xf32> -> vector<256x64xf32>
    %68 = arith.addf %64, %67 : vector<256x64xf32>
    %69 = vector.extract_strided_slice %0 {offsets = [4, 0], sizes = [1, 64], strides = [1, 1]} : vector<16x128xf32> to vector<1x64xf32>
    %70 = vector.broadcast %69 : vector<1x64xf32> to vector<256x64xf32>
    %71 = arith.addf %68, %70 : vector<256x64xf32>
    %cst_44 = arith.constant 0.000000e+00 : f32
    %72 = vector.broadcast %cst_44 : f32 to vector<256x64xf32>
    %73 = arith.maximumf %71, %72 : vector<256x64xf32>
    %74 = arith.truncf %73 : vector<256x64xf32> to vector<256x64xbf16>
    %cst_45 = arith.constant dense<0.000000e+00> : vector<256x64xf32>
    %75 = tpu.matmul %6, %74, %cst_45 {dimension_numbers = #tpu.dot_dimension_numbers<[1], [0], [0], [1], [0, 0, 1, 1], [], []>} : vector<256x256xbf16>, vector<256x64xbf16>, vector<256x64xf32> -> vector<256x64xf32>
    %76 = arith.truncf %75 : vector<256x64xf32> to vector<256x64xbf16>
    %c4 = arith.constant 4 : index
    %c0_46 = arith.constant 0 : index
    %c0_47 = arith.constant 0 : index
    %77 = vector.load %arg5[%c4, %c0_46, %c0_47] : memref<5x64x64xbf16, #tpu.memory_space<vmem>>, vector<1x64x64xbf16>
    %78 = vector.shape_cast %77 : vector<1x64x64xbf16> to vector<64x64xbf16>
    %cst_48 = arith.constant dense<0.000000e+00> : vector<256x64xf32>
    %79 = tpu.matmul %76, %78, %cst_48 {dimension_numbers = #tpu.dot_dimension_numbers<[1], [0], [0], [1], [0, 0, 1, 1], [], []>} : vector<256x64xbf16>, vector<64x64xbf16>, vector<256x64xf32> -> vector<256x64xf32>
    %c4_49 = arith.constant 4 : index
    %c0_50 = arith.constant 0 : index
    %c0_51 = arith.constant 0 : index
    %80 = vector.load %arg6[%c4_49, %c0_50, %c0_51] : memref<5x64x64xbf16, #tpu.memory_space<vmem>>, vector<1x64x64xbf16>
    %81 = vector.shape_cast %80 : vector<1x64x64xbf16> to vector<64x64xbf16>
    %cst_52 = arith.constant dense<0.000000e+00> : vector<256x64xf32>
    %82 = tpu.matmul %74, %81, %cst_52 {dimension_numbers = #tpu.dot_dimension_numbers<[1], [0], [0], [1], [0, 0, 1, 1], [], []>} : vector<256x64xbf16>, vector<64x64xbf16>, vector<256x64xf32> -> vector<256x64xf32>
    %83 = arith.addf %79, %82 : vector<256x64xf32>
    %84 = vector.extract_strided_slice %0 {offsets = [5, 0], sizes = [1, 64], strides = [1, 1]} : vector<16x128xf32> to vector<1x64xf32>
    %85 = vector.broadcast %84 : vector<1x64xf32> to vector<256x64xf32>
    %86 = arith.addf %83, %85 : vector<256x64xf32>
    %cst_53 = arith.constant 0.000000e+00 : f32
    %87 = vector.broadcast %cst_53 : f32 to vector<256x64xf32>
    %88 = arith.maximumf %86, %87 : vector<256x64xf32>
    %c0_54 = arith.constant 0 : index
    %c0_55 = arith.constant 0 : index
    %89 = vector.load %arg3[%c0_54, %c0_55] : memref<8x256xf32, #tpu.memory_space<vmem>>, vector<8x256xf32>
    %90 = arith.truncf %89 : vector<8x256xf32> to vector<8x256xbf16>
    %91 = arith.truncf %88 : vector<256x64xf32> to vector<256x64xbf16>
    %cst_56 = arith.constant dense<0.000000e+00> : vector<8x64xf32>
    %92 = tpu.matmul %90, %91, %cst_56 {dimension_numbers = #tpu.dot_dimension_numbers<[1], [0], [0], [1], [0, 0, 1, 1], [], []>} : vector<8x256xbf16>, vector<256x64xbf16>, vector<8x64xf32> -> vector<8x64xf32>
    %93 = arith.truncf %92 : vector<8x64xf32> to vector<8x64xbf16>
    %c0_57 = arith.constant 0 : index
    %c0_58 = arith.constant 0 : index
    %94 = vector.load %arg7[%c0_57, %c0_58] : memref<64x64xbf16, #tpu.memory_space<vmem>>, vector<64x64xbf16>
    %cst_59 = arith.constant dense<0.000000e+00> : vector<8x64xf32>
    %95 = tpu.matmul %93, %94, %cst_59 {dimension_numbers = #tpu.dot_dimension_numbers<[1], [0], [0], [1], [0, 0, 1, 1], [], []>} : vector<8x64xbf16>, vector<64x64xbf16>, vector<8x64xf32> -> vector<8x64xf32>
    %96 = vector.broadcast %2 : vector<1x64xf32> to vector<8x64xf32>
    %97 = arith.addf %95, %96 : vector<8x64xf32>
    %cst_60 = arith.constant 0.000000e+00 : f32
    %98 = vector.broadcast %cst_60 : f32 to vector<8x64xf32>
    %99 = arith.maximumf %97, %98 : vector<8x64xf32>
    %100 = vector.broadcast %3 : vector<1x64xf32> to vector<8x64xf32>
    %101 = arith.mulf %99, %100 : vector<8x64xf32>
    %102 = vector.broadcast %4 : vector<1x64xf32> to vector<8x64xf32>
    %103 = arith.addf %101, %102 : vector<8x64xf32>
    %cst_61 = arith.constant 0.000000e+00 : f32
    %104 = vector.broadcast %cst_61 : f32 to vector<8x64xf32>
    %105 = arith.maximumf %103, %104 : vector<8x64xf32>
    %106 = arith.truncf %105 : vector<8x64xf32> to vector<8x64xbf16>
    %c0_62 = arith.constant 0 : index
    %c0_63 = arith.constant 0 : index
    %107 = vector.load %arg8[%c0_62, %c0_63] : memref<64x128xbf16, #tpu.memory_space<vmem>>, vector<64x128xbf16>
    %cst_64 = arith.constant dense<0.000000e+00> : vector<8x128xf32>
    %108 = tpu.matmul %106, %107, %cst_64 {dimension_numbers = #tpu.dot_dimension_numbers<[1], [0], [0], [1], [0, 0, 1, 1], [], []>} : vector<8x64xbf16>, vector<64x128xbf16>, vector<8x128xf32> -> vector<8x128xf32>
    %109 = vector.broadcast %5 : vector<1x128xf32> to vector<8x128xf32>
    %110 = arith.addf %108, %109 : vector<8x128xf32>
    %c0_65 = arith.constant 0 : index
    %c0_66 = arith.constant 0 : index
    %111 = vector.load %arg10[%c0_65, %c0_66] : memref<8x128xf32, #tpu.memory_space<vmem>>, vector<8x128xf32>
    tpu.vector_store %arg10[%c0_65, %c0_66], %110 {strides = array<i32>} : memref<8x128xf32, #tpu.memory_space<vmem>>, vector<8x128xf32>,
    return
  }
  func.func @transform_0(%arg0: i32) -> (i32, i32) {
    %c0_i32 = arith.constant 0 : i32
    %c0_i32_0 = arith.constant 0 : i32
    return %arg0, %c0_i32 : i32, i32
  }
  func.func @transform_1(%arg0: i32) -> (i32, i32) {
    %c0_i32 = arith.constant 0 : i32
    %c0_i32_0 = arith.constant 0 : i32
    return %arg0, %c0_i32 : i32, i32
  }
  func.func @transform_2(%arg0: i32) -> (i32, i32) {
    %c0_i32 = arith.constant 0 : i32
    %c0_i32_0 = arith.constant 0 : i32
    return %arg0, %c0_i32 : i32, i32
  }
  func.func @transform_3(%arg0: i32) -> (i32, i32) {
    %c0_i32 = arith.constant 0 : i32
    %c0_i32_0 = arith.constant 0 : i32
    %c0_i32_1 = arith.constant 0 : i32
    return %c0_i32, %c0_i32_0 : i32, i32
  }
  func.func @transform_4(%arg0: i32) -> (i32, i32, i32) {
    %c0_i32 = arith.constant 0 : i32
    %c0_i32_0 = arith.constant 0 : i32
    %c0_i32_1 = arith.constant 0 : i32
    %c0_i32_2 = arith.constant 0 : i32
    return %c0_i32, %c0_i32_0, %c0_i32_1 : i32, i32, i32
  }
  func.func @transform_5(%arg0: i32) -> (i32, i32, i32) {
    %c0_i32 = arith.constant 0 : i32
    %c0_i32_0 = arith.constant 0 : i32
    %c0_i32_1 = arith.constant 0 : i32
    %c0_i32_2 = arith.constant 0 : i32
    return %c0_i32, %c0_i32_0, %c0_i32_1 : i32, i32, i32
  }
  func.func @transform_6(%arg0: i32) -> (i32, i32) {
    %c0_i32 = arith.constant 0 : i32
    %c0_i32_0 = arith.constant 0 : i32
    %c0_i32_1 = arith.constant 0 : i32
    return %c0_i32, %c0_i32_0 : i32, i32
  }
  func.func @transform_7(%arg0: i32) -> (i32, i32) {
    %c0_i32 = arith.constant 0 : i32
    %c0_i32_0 = arith.constant 0 : i32
    %c0_i32_1 = arith.constant 0 : i32
    return %c0_i32, %c0_i32_0 : i32, i32
  }
  func.func @transform_8(%arg0: i32) -> (i32, i32) {
    %c0_i32 = arith.constant 0 : i32
    %c0_i32_0 = arith.constant 0 : i32
    %c0_i32_1 = arith.constant 0 : i32
    return %c0_i32, %c0_i32_0 : i32, i32
  }
  func.func @transform_9(%arg0: i32) -> (i32, i32) {
    %c0_i32 = arith.constant 0 : i32
    %c0_i32_0 = arith.constant 0 : i32
    return %arg0, %c0_i32 : i32, i32
  }
}

</mosaic_0001>

<bundles_post_ra>
// kernel: graphsage_small_forward.1
= control target key start
LH: loop header
LB: loop body
LE: loop exit
PB: predicated region body
PF: predicated region fallthrough
CT: control target
= control target key end

     0   :  { %14 = vsyncpa [#allocation3], 0  ;;  %s8507_s0 = inlined_call_operand.vmem [shape: bf16[512,16], index: 0, kind: input, shape index: {}]   ;;  %s8508_s1 = inlined_call_operand.hbm [shape: bf16[512,256], index: 1, kind: input, shape index: {}]   ;;  %s8509_s2 = inlined_call_operand.vmem [shape: f32[16,256], index: 2, kind: input, shape index: {}]   ;;  %s8510_s3 = inlined_call_operand.vmem [shape: bf16[16,64], index: 3, kind: input, shape index: {}]   ;;  %s8511_s4 = inlined_call_operand.vmem [shape: bf16[5,64,64], index: 4, kind: input, shape index: {}]   ;;  %s8512_s5 = inlined_call_operand.hbm [shape: bf16[5,64,64], index: 5, kind: input, shape index: {}]   ;;  %s8513_s6 = inlined_call_operand.vmem [shape: bf16[64,64], index: 6, kind: input, shape index: {}]   ;;  %s8514_s7 = inlined_call_operand.vmem [shape: bf16[64,128], index: 7, kind: input, shape index: {}]   ;;  %s8515_s8 = inlined_call_operand.vmem [shape: f32[16,128], index: 8, kind: input, shape index: {}]   ;;  %s8516_s9 = inlined_call_operand.hbm [shape: f32[16,128], index: 9, kind: output, shape index: {}]  }
   0x1   :  { %16 = vsyncpa [#allocation3 + $0x1], 0 }
   0x2   :  { %17 = vsyncpa [#allocation6], 0 }
   0x3   :  { %18 = vsyncpa [#allocation4], 0 }
   0x4   :  { %20 = vsyncpa [#allocation4 + $0x1], 0  ;;  %s7234_s30 = smov 0   ;;  %s7236_s10 = smov 0  }
   0x5   :  { %s7238_s11 = smov 0   ;;  %s7240_s12 = smov 0  }
   0x6 LB: > { %s7255_s13 = sadd.s32 4294967295, %s7173_s12   ;;  %s5046_s14 = sadd.s32 4294967294, %s7173_s12   ;;  %s7173_s12 = sphi %s7240_s12, %s8539_s12   ;;  %s7169_s11 = sphi %s7238_s11, %s8542_s11   ;;  %s7165_s10 = sphi %s7236_s10, %s8541_s10   ;;  %s7161_s30 = sphi %s7234_s30, %s8540_s30  }
   0x7   : > { %p72_p0 = scmp.ne.s32.totalorder %s7165_s10, %s7161_s30  ;;  %p8517_p1 = scmp.eq.s32.totalorder %s7255_s13, 0 }
   0x8   : > { %p254_p3 = scmp.eq.s32.totalorder %s5046_s14, 1  ;;  %p5047_p5 = scmp.ge.s32.totalorder %s7173_s12, 1 }
   0x9   : > { %p7264_p4 = por %p8517_p1, %p72_p0  ;;  %p261_p7 = scmp.lt.s32.totalorder %s7173_s12, 3 }
   0xa   : > { %p7269_p6 = por %p254_p3, %p72_p0  ;;  %s7175_s18 = smov [#allocation5]  }
   0xb   : > { %s8523_s15 = scalar_select %p7264_p4, 1, 0 }
   0xc   : > { %s8524_s16 = scalar_select %p7269_p6, 1, 0 }
   0xd   : > { %p7274_p8 = pnand %p5047_p5, %p261_p7  ;;  %s279_s19 = sshll.u32 %s7175_s18, 4  ;;  %s7278_s19 = int_to_ptr.vmem [resolvable:$true] %s279_s19 }
   0xe   : > { %8525 = sst [smem:[#allocation11_spill]] %s8524_s16  ;;  %s7290_s21 = sadd.s32 1, %s7173_s12  }
   0xf   : > { %s8526_s17 = scalar_select %p7274_p8, 1, 0 }
  0x10   : > { %p6811_p9 = pneg %p7274_p8  ;;  %8528 = sst [smem:[#allocation12_spill]] %s7290_s21 }
  0x11   : > { %s59_s22 = sadd.s32 1, %s7169_s11  ;;  %s56_s23 = ssub.s32 %s7173_s12, %s7290_s21 }
  0x12   : > { %p7285_p11 = pnand %p6811_p9, %p8517_p1  ;;  %s7045_s26 = scalar_lea.hbm %s8512_s5, 2560 }
  0x13   : > { %p7046_p12 = scmp.ne.s32.totalorder %s8512_s5, %s7045_s26  ;;  %p7052_p5 = scmp.lt.u32.totalorder %s7045_s26, %s8512_s5 }
  0x14   : > { %p7047_p13 = pneg %p7285_p11 }
  0x16   : > { %p7048_p0 = pnand %p7047_p13, %p7046_p12 }
  0x18   : > { %p7049_p3 = pneg %p7048_p0 }
  0x1a   : > { %p7054_p7 = pnand %p7052_p5, %p7049_p3 }
  0x1c   : > { %7057 = shalt.err (!%p7054_p7)
}
  0x1d   : > { %s7058_s18 = scalar_lea.vmem %s7278_s19, 2560  ;;  %p7066_p2 = scmp.lt.s32.totalorder %s7278_s19, %s7278_s19 }
  0x1e   : > { %p7059_p9 = scmp.ne.s32.totalorder %s7278_s19, %s7058_s18  ;;  %p7067_p6 = scmp.lt.s32.totalorder %s7058_s18, %s7058_s18 }
  0x20   : > { %p7061_p10 = pnand %p7059_p9, %p7047_p13  ;;  %p7068_p4 = por %p7067_p6, %p7066_p2 }
  0x22   : > { %p7062_p1 = pneg %p7061_p10 }
  0x24   : > { %p7069_p8 = pnand %p7068_p4, %p7062_p1 }
  0x26   : > { %7072 = shalt.err (!%p7069_p8)
}
  0x27   : > { %s7176_s24 = smov 64   ;;  %s7177_s25 = smov 4  }
  0x28   : > { %6814 = dma.hbm_to_vmem [thread:$0]  (!%p7285_p11), %s8512_s5, 2560, %s7278_s19, [#allocation6], %s7176_s24, %s7176_s24, %s7177_s25  }
  0x29   : > { %p57_p2 = scmp.eq.s32.totalorder %s56_s23, 0  ;;  %p66_p1 = scmp.ne.s32.totalorder %s7169_s11, %s7165_s10 }
  0x2a   : > { %p67_p4 = scmp.eq.s32.totalorder %s7173_s12, 0  ;;  %p6824_p6 = scmp.lt.s32.totalorder %s7173_s12, 2 }
  0x2b   : > { %s7321_s28 = scalar_select %p57_p2, %s7169_s11, %s59_s22  }
  0x2c   : > { %p68_p8 = por %p67_p4, %p66_p1  ;;  %p8529_p10 = scmp.eq.s32.totalorder %s7255_s13, 1 }
  0x2d   : > { %s311_s14 = sand.u32 1, %s7169_s11   ;;  %s5374_s18 = sshll.u32 %s7173_s12, 12 }
  0x2e   : > { %p7325_p12 = por %p8529_p10, %p66_p1  ;;  %s5050_s21 = sshll.u32 %s311_s14, 8 }
  0x2f   : > { %s7334_s26 = scalar_lea.hbm %s8508_s1, %s5374_s18  ;;  %s315_s19 = scalar_lea.vmem [#allocation2], %s5050_s21 }
  0x30   : > { %s323_s22 = sshll.u32 %s315_s19, 4  ;;  %p7336_p11 = pnand %p6824_p6, %p68_p8  ;;  %s7340_s22 = int_to_ptr.vmem [resolvable:$true] %s323_s22 }
  0x31   : > { %s7342_s24 = scalar_lea.sflag [#allocation3], %s311_s14  ;;  %s7073_s25 = scalar_lea.hbm %s7334_s26, 4096 }
  0x32   : > { %p7074_p13 = scmp.ne.s32.totalorder %s7334_s26, %s7073_s25  ;;  %p7075_p0 = pneg %p7336_p11 }
  0x33   : > { %s7078_s27 = scalar_lea.hbm %s8508_s1, 8192  ;;  %p7079_p7 = scmp.lt.u32.totalorder %s7334_s26, %s8508_s1 }
  0x34   : > { %p7076_p3 = pnand %p7075_p0, %p7074_p13  ;;  %p7080_p9 = scmp.lt.u32.totalorder %s7078_s27, %s7073_s25 }
  0x35   : > { %p7082_p1 = scmp.lt.u32.totalorder %s7073_s25, %s7334_s26 }
  0x36   : > { %p7077_p5 = pneg %p7076_p3  ;;  %p7081_p2 = por %p7080_p9, %p7079_p7 }
  0x38   : > { %p7083_p4 = por %p7082_p1, %p7081_p2 }
  0x3a   : > { %p7084_p6 = pnand %p7083_p4, %p7077_p5 }
  0x3c   : > { %7087 = shalt.err (!%p7084_p6)
}
  0x3d   : > { %s7088_s14 = scalar_lea.vmem %s7340_s22, 4096  ;;  %s7178_s19 = smov [#allocation2]  }
  0x3e   : > { %p7089_p8 = scmp.ne.s32.totalorder %s7340_s22, %s7088_s14  ;;  %s7093_s16 = sshll.u32 %s7178_s19, 4  ;;  %s7094_s16 = int_to_ptr.vmem [resolvable:$false] %s7093_s16 }
  0x3f   : > { %s7095_s21 = scalar_lea.vmem %s7094_s16, 8192  ;;  %p7096_p3 = scmp.lt.s32.totalorder %s7340_s22, %s7094_s16 }
  0x40   : > { %p7091_p10 = pnand %p7089_p8, %p7075_p0  ;;  %p7097_p7 = scmp.lt.s32.totalorder %s7095_s21, %s7088_s14 }
  0x42   : > { %p7092_p13 = pneg %p7091_p10  ;;  %p7098_p9 = por %p7097_p7, %p7096_p3 }
  0x44   : > { %p7099_p2 = pnand %p7098_p9, %p7092_p13 }
  0x46   : > { %7102 = shalt.err (!%p7099_p2)
}
  0x47   : > { %s7179_s25 = smov 128   ;;  %s7180_s27 = smov 8  }
  0x48   : > { %6818 = dma.hbm_to_vmem [thread:$0]  (!%p7336_p11), %s7334_s26, 4096, %s7340_s22, %s7342_s24, %s7179_s25, %s7179_s25, %s7180_s27  }
  0x49   : > { %p8532_p0 = scmp.ne.s32.totalorder %s8526_s17, 0 }
  0x4a   : > { %s7373_s18 = sand.u32 (!%p8532_p0), 1, %s7165_s10   ;;  %p8533_p5 = scmp.ne.s32.totalorder (!%p8532_p0), %s8523_s15, 0 }
  0x4b   : > { %343 = sbr.rel (%p8532_p0) target bundleno = 3888 (0xf30), region = 56  ;;  %s5055_s20 = sshll.u32 (!%p8532_p0), %s7373_s18, 8 }
  0x4c   : > { %s346_s14 = scalar_lea.sflag (!%p8532_p0), [#allocation3], %s7373_s18  ;;  %s7377_s19 = scalar_lea.vmem (!%p8532_p0), [#allocation2], %s5055_s20 }
  0x52   : > { %7148 = dma.done.wait (%p8533_p5), %s346_s14, 4096  }
  0x53   : > { %7150 = vsyncadd (%p8533_p5), %s346_s14, 4294963200  ;;  %p8534_p11 = scmp.eq.s32.totalorder %s7255_s13, 0 }
  0x55   : > { %7152 = dma.done.wait (%p8534_p11), [#allocation6], 2560   ;;  %p8535_p1 = pmov %p8534_p11 }
  0x56   : > { %s5058_s17 = sshll.u32 %s7255_s13, 5  ;;  %v6866_v0 = vld [vmem:[%s8510_s3] sm:$0xff]   ;;  %vm569_vm0 = vcmask 130048   ;;  %v6884_v8 = vld [vmem:[#allocation5 + $0x8] sm:$0xff]   ;;  %v6885_v19 = vld [vmem:[#allocation5 + $0x10] sm:$0xff]   ;;  %v479_v22 = vlaneseq  ;;  %vm1204_vm1 = vcmask 523264  }
  0x57   : > { %7154 = vsyncadd (%p8535_p1), [#allocation6], 4294964736  ;;  %p399_p4 = scmp.lt.s32.totalorder %s5058_s17, 63  ;;  %6185 = vmatprep.subr.bf16.mxu0 %v6866_v0  ;;  %v6883_v7 = vld [vmem:[#allocation5] sm:$0xff]   ;;  %v6886_v20 = vld [vmem:[#allocation5 + $0x18] sm:$0xff]   ;;  %p405_p6 = scmp.lt.s32.totalorder %s7255_s13, 1 }
  0x58   : > { %6186 = vmatpush3.bf16.msra.mxu0 %v6866_v0  ;;  %v7429_v21 = vld [vmem:[%s7377_s19 + $0x4] ss:$8 sps:$4 sm:$0xff]   ;;  %v7432_v23 = vshrl.u32 %v479_v22, 7  ;;  %vm7182_vm2 = vmmov 0   ;;  %s5057_s22 = sshll.u32 %s7373_s18, 3  ;;  %s5370_s23 = sshll.u32 %s7255_s13, 7 }
  0x59   : > { %s8544_s17 = smov (!%p399_p4, %s5058_s17), 63  ;;  %6219 = vmatprep.subr.bf16.mxu0 %v6883_v7  ;;  %1019 = vmatprep.mubr.bf16.mxu1 %v7429_v21  ;;  %v7438_v25 = vld [vmem:[%s8515_s8] sm:$0xff]  ;;  %s8463_s15 = scalar_lea.hbm %s8516_s9, %s5370_s23 }
  0x5a   : > { %s5059_s26 = sshll.u32 %s8544_s17, 2  ;;  %v481_v24 = vsub.s32 0, %v7432_v23  ;;  %s7183_s27 = smov [#allocation7]  }
  0x5b   : > { %s7391_s24 = scalar_lea.vmem %s8507_s0, %s5059_s26  ;;  %s7107_s20 = sshll.u32 %s7183_s27, 4  ;;  %s7108_s20 = int_to_ptr.vmem [resolvable:$false] %s7107_s20 }
  0x5c   : > { %v6867_v1 = vld [vmem:[%s7391_s24] sm:$0xff]   ;;  %v6868_v2 = vld [vmem:[%s7391_s24 + $0x8] sm:$0xff]   ;;  %v6869_v3 = vld [vmem:[%s7391_s24 + $0x10] sm:$0xff]   ;;  %v7443_v26 = vrot.slane %v7438_v25, %v481_v24  ;;  %s7109_s14 = scalar_lea.vmem %s7108_s20, 256 }
  0x5d   : > { %6187 = vmatprep.mubr.msk.bf16.mxu0 %vm569_vm0, %v6867_v1  ;;  %v6870_v4 = vld [vmem:[%s7391_s24 + $0x18] sm:$0xff]   ;;  %v6871_v5 = vld [vmem:[%s7391_s24 + $0x20] sm:$0xff]   ;;  %v6872_v6 = vld [vmem:[%s7391_s24 + $0x28] sm:$0xff]  }
  0x5e   : > { %6188 = vmatmul.mubr.msk.bf16.vlgmr.msra.gmra.mrb[0].mxu0 %vm569_vm0, %v6868_v2  ;;  %v6873_v9 = vld [vmem:[%s7391_s24 + $0x30] sm:$0xff]   ;;  %v6874_v10 = vld [vmem:[%s7391_s24 + $0x38] sm:$0xff]   ;;  %v6875_v11 = vld [vmem:[%s7391_s24 + $0x40] sm:$0xff]  }
  0x5f   : > { %6191 = vmatprep.mubr.msk.bf16.mxu0 %vm569_vm0, %v6869_v3  ;;  %6220 = vmatpush3.bf16.msra.mxu0 %v6883_v7  ;;  %v6876_v12 = vld [vmem:[%s7391_s24 + $0x48] sm:$0xff]   ;;  %v6877_v13 = vld [vmem:[%s7391_s24 + $0x50] sm:$0xff]   ;;  %v6878_v14 = vld [vmem:[%s7391_s24 + $0x58] sm:$0xff]  }
  0x60   : > { %6221 = vmatprep.subr.bf16.mxu0 %v6884_v8  ;;  %v6879_v15 = vld [vmem:[%s7391_s24 + $0x60] sm:$0xff]   ;;  %v6880_v16 = vld [vmem:[%s7391_s24 + $0x68] sm:$0xff]   ;;  %v6881_v17 = vld [vmem:[%s7391_s24 + $0x70] sm:$0xff]  }
  0x61   : > { %v6882_v18 = vld [vmem:[%s7391_s24 + $0x78] sm:$0xff]   ;;  %s397_s24 = scalar_lea.vmem [#allocation7], %s5057_s22 }
  0x63   : > { %6222 = vmatpush3.bf16.msra.mxu0 %v6884_v8 }
  0x64   : > { %6223 = vmatprep.subr.bf16.mxu0 %v6885_v19 }
  0x66   : > { %6192 = vmatmul.mubr.msk.bf16.gmra.mrb[4].mxu0 %vm569_vm0, %v6870_v4 }
  0x67   : > { %6195 = vmatprep.mubr.msk.bf16.mxu0 %vm569_vm0, %v6871_v5  ;;  %6224 = vmatpush3.bf16.msra.mxu0 %v6885_v19 }
  0x68   : > { %6225 = vmatprep.subr.bf16.mxu0 %v6886_v20 }
  0x6b   : > { %6226 = vmatpush3.bf16.msra.mxu0 %v6886_v20 }
  0x6e   : > { %6196 = vmatmul.mubr.msk.bf16.gmra.mrb[8].mxu0 %vm569_vm0, %v6872_v6 }
  0x6f   : > { %6199 = vmatprep.mubr.msk.bf16.mxu0 %vm569_vm0, %v6873_v9 }
  0x76   : > { %6200 = vmatmul.mubr.msk.bf16.gmra.mrb[12].mxu0 %vm569_vm0, %v6874_v10 }
  0x77   : > { %6203 = vmatprep.mubr.msk.bf16.mxu0 %vm569_vm0, %v6875_v11 }
  0x7e   : > { %6204 = vmatmul.mubr.msk.bf16.gmra.mrb[16].mxu0 %vm569_vm0, %v6876_v12 }
  0x7f   : > { %6207 = vmatprep.mubr.msk.bf16.mxu0 %vm569_vm0, %v6877_v13 }
  0x86   : > { %6208 = vmatmul.mubr.msk.bf16.gmra.mrb[20].mxu0 %vm569_vm0, %v6878_v14 }
  0x87   : > { %6211 = vmatprep.mubr.msk.bf16.mxu0 %vm569_vm0, %v6879_v15 }
  0x8e   : > { %6212 = vmatmul.mubr.msk.bf16.gmra.mrb[24].mxu0 %vm569_vm0, %v6880_v16 }
  0x8f   : > { %6215 = vmatprep.mubr.msk.bf16.mxu0 %vm569_vm0, %v6881_v17 }
  0x96   : > { %6216 = vmatmul.mubr.msk.bf16.gmra.mrb[28].mxu0 %vm569_vm0, %v6882_v18 }
 0x131   : > { %v6189_v27 = vpop.f32.mrb[0].mxu0 }
 0x132   : > { %v661_v28 = vadd.f32 %v6189_v27, %v7443_v26  ;;  %v652_v29 = vpop.f32.mrb[1].mxu0 }
 0x133   : > { %v653_v30 = vadd.f32 %v652_v29, %v7443_v26  ;;  %v6190_v31 = vpop.f32.mrb[2].mxu0 }
 0x134   : > { %v664_v32 = vadd.f32 %v6190_v31, %v7443_v26  ;;  %v655_v33 = vpop.f32.mrb[3].mxu0  ;;  %v781_v35 = vmax.f32 %v661_v28, 0.0 }
 0x135   : > { %v656_v34 = vadd.f32 %v655_v33, %v7443_v26  ;;  %v779_v37 = vmax.f32 %v653_v30, 0.0 }
 0x136   : > { %v782_v36 = vmax.f32 %v664_v32, 0.0 }
 0x137   : > { %v780_v38 = vmax.f32 %v656_v34, 0.0 }
 0x138   : > { %v7449_v39 = vpack.c.bf16 %v782_v36, %v781_v35 }
 0x139   : > { %v7451_v40 = vpack.c.bf16 %v780_v38, %v779_v37  ;;  %v6193_v41 = vpop.f32.mrb[4].mxu0 }
 0x13a   : > { %v677_v42 = vadd.f32 %v6193_v41, %v7443_v26  ;;  %v668_v43 = vpop.f32.mrb[5].mxu0 }
 0x13b   : > { %v669_v44 = vadd.f32 %v668_v43, %v7443_v26  ;;  %v6194_v45 = vpop.f32.mrb[6].mxu0  ;;  %6227 = vmatprep.mubr.msk.bf16.mxu0 %vm1204_vm1, %v7451_v40 }
 0x13c   : > { %v680_v46 = vadd.f32 %v6194_v45, %v7443_v26  ;;  %v671_v47 = vpop.f32.mrb[7].mxu0  ;;  %6228 = vmatmul.mubr.msk.bf16.vlgmr.msra.gmra.mrb[32].mxu0 %vm1204_vm1, %v7449_v39  ;;  %v785_v49 = vmax.f32 %v677_v42, 0.0 }
 0x13d   : > { %v672_v48 = vadd.f32 %v671_v47, %v7443_v26  ;;  %v783_v51 = vmax.f32 %v669_v44, 0.0 }
 0x13e   : > { %v786_v50 = vmax.f32 %v680_v46, 0.0 }
 0x13f   : > { %v784_v52 = vmax.f32 %v672_v48, 0.0 }
 0x140   : > { %v7461_v53 = vpack.c.bf16 %v786_v50, %v785_v49 }
 0x141   : > { %v7463_v54 = vpack.c.bf16 %v784_v52, %v783_v51  ;;  %v6197_v55 = vpop.f32.mrb[8].mxu0 }
 0x142   : > { %v693_v56 = vadd.f32 %v6197_v55, %v7443_v26  ;;  %v684_v57 = vpop.f32.mrb[9].mxu0 }
 0x143   : > { %v685_v58 = vadd.f32 %v684_v57, %v7443_v26  ;;  %v6198_v59 = vpop.f32.mrb[10].mxu0  ;;  %6231 = vmatprep.mubr.msk.bf16.mxu0 %vm1204_vm1, %v7463_v54 }
 0x144   : > { %v696_v60 = vadd.f32 %v6198_v59, %v7443_v26  ;;  %v687_v61 = vpop.f32.mrb[11].mxu0  ;;  %6232 = vmatmul.mubr.msk.bf16.gmra.mrb[36].mxu0 %vm1204_vm1, %v7461_v53  ;;  %v789_v63 = vmax.f32 %v693_v56, 0.0 }
 0x145   : > { %v688_v62 = vadd.f32 %v687_v61, %v7443_v26  ;;  %v787_v1 = vmax.f32 %v685_v58, 0.0 }
 0x146   : > { %v790_v0 = vmax.f32 %v696_v60, 0.0 }
 0x147   : > { %v788_v2 = vmax.f32 %v688_v62, 0.0 }
 0x148   : > { %v7473_v3 = vpack.c.bf16 %v790_v0, %v789_v63 }
 0x149   : > { %v7475_v4 = vpack.c.bf16 %v788_v2, %v787_v1  ;;  %v6201_v5 = vpop.f32.mrb[12].mxu0 }
 0x14a   : > { %v709_v6 = vadd.f32 %v6201_v5, %v7443_v26  ;;  %v700_v7 = vpop.f32.mrb[13].mxu0 }
 0x14b   : > { %v701_v8 = vadd.f32 %v700_v7, %v7443_v26  ;;  %v6202_v9 = vpop.f32.mrb[14].mxu0  ;;  %6235 = vmatprep.mubr.msk.bf16.mxu0 %vm1204_vm1, %v7475_v4 }
 0x14c   : > { %v712_v10 = vadd.f32 %v6202_v9, %v7443_v26  ;;  %v703_v11 = vpop.f32.mrb[15].mxu0  ;;  %6236 = vmatmul.mubr.msk.bf16.gmra.mrb[40].mxu0 %vm1204_vm1, %v7473_v3  ;;  %v793_v13 = vmax.f32 %v709_v6, 0.0 }
 0x14d   : > { %v704_v12 = vadd.f32 %v703_v11, %v7443_v26  ;;  %v791_v15 = vmax.f32 %v701_v8, 0.0 }
 0x14e   : > { %v794_v14 = vmax.f32 %v712_v10, 0.0 }
 0x14f   : > { %v792_v16 = vmax.f32 %v704_v12, 0.0 }
 0x150   : > { %v7485_v17 = vpack.c.bf16 %v794_v14, %v793_v13 }
 0x151   : > { %v7487_v18 = vpack.c.bf16 %v792_v16, %v791_v15  ;;  %v6205_v19 = vpop.f32.mrb[16].mxu0 }
 0x152   : > { %v725_v20 = vadd.f32 %v6205_v19, %v7443_v26  ;;  %v716_v22 = vpop.f32.mrb[17].mxu0 }
 0x153   : > { %v717_v27 = vadd.f32 %v716_v22, %v7443_v26  ;;  %v6206_v28 = vpop.f32.mrb[18].mxu0  ;;  %6239 = vmatprep.mubr.msk.bf16.mxu0 %vm1204_vm1, %v7487_v18  ;;  %v7550_v22 = vld [vmem:[%s7377_s19 + $0x30] ss:$8 sps:$4 sm:$0xff]  }
 0x154   : > { %v728_v29 = vadd.f32 %v6206_v28, %v7443_v26  ;;  %v719_v30 = vpop.f32.mrb[19].mxu0  ;;  %6240 = vmatmul.mubr.msk.bf16.gmra.mrb[44].mxu0 %vm1204_vm1, %v7485_v17  ;;  %v797_v32 = vmax.f32 %v725_v20, 0.0  ;;  %v7542_v20 = vld [vmem:[%s7377_s19 + $0x20] ss:$8 sps:$4 sm:$0xff]  }
 0x155   : > { %v720_v31 = vadd.f32 %v719_v30, %v7443_v26  ;;  %v795_v34 = vmax.f32 %v717_v27, 0.0  ;;  %v7553_v27 = vld [vmem:[%s7377_s19 + $0x44] ss:$8 sps:$4 sm:$0xff]   ;;  %v7558_v28 = vld [vmem:[%s7377_s19 + $0x40] ss:$8 sps:$4 sm:$0xff]  }
 0x156   : > { %v798_v33 = vmax.f32 %v728_v29, 0.0  ;;  %v7561_v29 = vld [vmem:[%s7377_s19 + $0x54] ss:$8 sps:$4 sm:$0xff]   ;;  %v7566_v30 = vld [vmem:[%s7377_s19 + $0x50] ss:$8 sps:$4 sm:$0xff]  }
 0x157   : > { %v796_v35 = vmax.f32 %v720_v31, 0.0  ;;  %v7569_v31 = vld [vmem:[%s7377_s19 + $0x64] ss:$8 sps:$4 sm:$0xff]  }
 0x158   : > { %v820_v36 = vpack.c.bf16 %v798_v33, %v797_v32  ;;  %v7574_v32 = vld [vmem:[%s7377_s19 + $0x60] ss:$8 sps:$4 sm:$0xff]   ;;  %v7577_v33 = vld [vmem:[%s7377_s19 + $0x74] ss:$8 sps:$4 sm:$0xff]  }
 0x159   : > { %v6209_v37 = vpop.f32.mrb[20].mxu0  ;;  %v819_v38 = vpack.c.bf16 %v796_v35, %v795_v34  ;;  %v7582_v34 = vld [vmem:[%s7377_s19 + $0x70] ss:$8 sps:$4 sm:$0xff]   ;;  %v7585_v35 = vld [vmem:[%s7377_s19 + $0x84] ss:$8 sps:$4 sm:$0xff]  }
 0x15a   : > { %v741_v41 = vadd.f32 %v6209_v37, %v7443_v26  ;;  %v732_v42 = vpop.f32.mrb[21].mxu0  ;;  %v7593_v37 = vld [vmem:[%s7377_s19 + $0x94] ss:$8 sps:$4 sm:$0xff]  }
 0x15b   : > { %v733_v43 = vadd.f32 %v732_v42, %v7443_v26  ;;  %v6210_v44 = vpop.f32.mrb[22].mxu0  ;;  %5393 = vmatprep.subr.bf16.mxu1 %v819_v38  ;;  %6243 = vmatprep.mubr.msk.bf16.mxu0 %vm1204_vm1, %v819_v38  ;;  %v7598_v38 = vld [vmem:[%s7377_s19 + $0x90] ss:$8 sps:$4 sm:$0xff]   ;;  %v7606_v42 = vld [vmem:[%s7377_s19 + $0xa0] ss:$8 sps:$4 sm:$0xff]  }
 0x15c   : > { %v744_v45 = vadd.f32 %v6210_v44, %v7443_v26  ;;  %v735_v46 = vpop.f32.mrb[23].mxu0  ;;  %5394 = vmatpush3.bf16.msra.mxu1 %v7451_v40  ;;  %6244 = vmatmul.mubr.msk.bf16.gmra.mrb[48].mxu0 %vm1204_vm1, %v820_v36  ;;  %v801_v48 = vmax.f32 %v741_v41, 0.0  ;;  %v7601_v41 = vld [vmem:[%s7377_s19 + $0xa4] ss:$8 sps:$4 sm:$0xff]  }
 0x15d   : > { %v736_v47 = vadd.f32 %v735_v46, %v7443_v26  ;;  %5395 = vmatprep.subr.bf16.mxu1 %v820_v36  ;;  %v799_v50 = vmax.f32 %v733_v43, 0.0  ;;  %v7590_v36 = vld [vmem:[%s7377_s19 + $0x80] ss:$8 sps:$4 sm:$0xff]   ;;  %v7609_v43 = vld [vmem:[%s7377_s19 + $0xb4] ss:$8 sps:$4 sm:$0xff]  }
 0x15e   : > { %v802_v49 = vmax.f32 %v744_v45, 0.0  ;;  %v6935_v44 = vld [vmem:[%s8511_s4] sm:$0xff]   ;;  %v7617_v45 = vld [vmem:[%s7377_s19 + $0xb0] ss:$8 sps:$4 sm:$0xff]  }
 0x15f   : > { %v800_v51 = vmax.f32 %v736_v47, 0.0  ;;  %6259 = vmatprep.subr.bf16.mxu0 %v6935_v44  ;;  %v7620_v46 = vld [vmem:[%s7377_s19 + $0xc4] ss:$8 sps:$4 sm:$0xff]  }
 0x160   : > { %v822_v52 = vpack.c.bf16 %v802_v49, %v801_v48  ;;  %5396 = vmatpush3.bf16.msra.mxu1 %v7449_v39  ;;  %6260 = vmatpush3.bf16.msra.mxu0 %v6935_v44  ;;  %v6936_v47 = vld [vmem:[%s8511_s4 + $0x8] sm:$0xff]   ;;  %v6937_v48 = vld [vmem:[%s8511_s4 + $0x10] sm:$0xff]  }
 0x161   : > { %v821_v55 = vpack.c.bf16 %v800_v51, %v799_v50  ;;  %v6213_v56 = vpop.f32.mrb[24].mxu0  ;;  %6261 = vmatprep.subr.bf16.mxu0 %v6936_v47  ;;  %v7631_v49 = vld [vmem:[%s7377_s19 + $0xc0] ss:$8 sps:$4 sm:$0xff]   ;;  %v7634_v50 = vld [vmem:[%s7377_s19 + $0xd4] ss:$8 sps:$4 sm:$0xff]  }
 0x162   : > { %v757_v57 = vadd.f32 %v6213_v56, %v7443_v26  ;;  %v748_v58 = vpop.f32.mrb[25].mxu0  ;;  %v6938_v51 = vld [vmem:[%s8511_s4 + $0x18] sm:$0xff]   ;;  %v7650_v56 = vld [vmem:[%s7377_s19 + $0xe0] ss:$8 sps:$4 sm:$0xff]  }
 0x163   : > { %v749_v59 = vadd.f32 %v748_v58, %v7443_v26  ;;  %v6214_v40 = vpop.f32.mrb[26].mxu0  ;;  %5397 = vmatprep.subr.bf16.mxu1 %v821_v55  ;;  %6247 = vmatprep.mubr.msk.bf16.mxu0 %vm1204_vm1, %v821_v55  ;;  %v7645_v55 = vld [vmem:[%s7377_s19 + $0xe4] ss:$8 sps:$4 sm:$0xff]   ;;  %v7658_v58 = vld [vmem:[%s7377_s19 + $0xf0] ss:$8 sps:$4 sm:$0xff]  }
 0x164   : > { %v760_v60 = vadd.f32 %v6214_v40, %v7443_v26  ;;  %v751_v61 = vpop.f32.mrb[27].mxu0  ;;  %5398 = vmatpush3.bf16.msra.mxu1 %v7463_v54  ;;  %6248 = vmatmul.mubr.msk.bf16.gmra.mrb[52].mxu0 %vm1204_vm1, %v822_v52  ;;  %v805_v62 = vmax.f32 %v757_v57, 0.0  ;;  %v7653_v57 = vld [vmem:[%s7377_s19 + $0xf4] ss:$8 sps:$4 sm:$0xff]   ;;  %v6939_v40 = vld [vmem:[#allocation5 + $0x20] sm:$0xff]  }
 0x165   : > { %v752_v39 = vadd.f32 %v751_v61, %v7443_v26  ;;  %5399 = vmatprep.subr.bf16.mxu1 %v822_v52  ;;  %v803_v0 = vmax.f32 %v749_v59, 0.0  ;;  %6262 = vmatpush3.bf16.msra.mxu0 %v6936_v47  ;;  %v7642_v52 = vld [vmem:[%s7377_s19 + $0xd0] ss:$8 sps:$4 sm:$0xff]  }
 0x166   : > { %v806_v63 = vmax.f32 %v760_v60, 0.0  ;;  %6263 = vmatprep.subr.bf16.mxu0 %v6937_v48 }
 0x167   : > { %v804_v1 = vmax.f32 %v752_v39, 0.0 }
 0x168   : > { %v824_v2 = vpack.c.bf16 %v806_v63, %v805_v62  ;;  %5400 = vmatpush3.bf16.msra.mxu1 %v7461_v53 }
 0x169   : > { %v823_v5 = vpack.c.bf16 %v804_v1, %v803_v0  ;;  %v6217_v6 = vpop.f32.mrb[28].mxu0  ;;  %6264 = vmatpush3.bf16.msra.mxu0 %v6937_v48 }
 0x16a   : > { %v773_v7 = vadd.f32 %v6217_v6, %v7443_v26  ;;  %v764_v8 = vpop.f32.mrb[29].mxu0  ;;  %6265 = vmatprep.subr.bf16.mxu0 %v6938_v51 }
 0x16b   : > { %v765_v9 = vadd.f32 %v764_v8, %v7443_v26  ;;  %v6218_v54 = vpop.f32.mrb[30].mxu0  ;;  %5401 = vmatprep.subr.bf16.mxu1 %v823_v5  ;;  %6251 = vmatprep.mubr.msk.bf16.mxu0 %vm1204_vm1, %v823_v5 }
 0x16c   : > { %v776_v10 = vadd.f32 %v6218_v54, %v7443_v26  ;;  %v767_v11 = vpop.f32.mrb[31].mxu0  ;;  %5402 = vmatpush3.bf16.msra.mxu1 %v7475_v4  ;;  %6252 = vmatmul.mubr.msk.bf16.gmra.mrb[56].mxu0 %vm1204_vm1, %v824_v2  ;;  %v809_v12 = vmax.f32 %v773_v7, 0.0  ;;  %v7529_v4 = vld [vmem:[%s7377_s19 + $0x14] ss:$8 sps:$4 sm:$0xff]   ;;  %v6940_v54 = vld [vmem:[#allocation5 + $0x28] sm:$0xff]  }
 0x16d   : > { %v768_v53 = vadd.f32 %v767_v11, %v7443_v26  ;;  %5403 = vmatprep.subr.bf16.mxu1 %v824_v2  ;;  %v807_v14 = vmax.f32 %v765_v9, 0.0  ;;  %v7525_v26 = vld [vmem:[%s7377_s19] ss:$8 sps:$4 sm:$0xff]   ;;  %6266 = vmatpush3.bf16.msra.mxu0 %v6938_v51 }
 0x16e   : > { %v810_v13 = vmax.f32 %v776_v10, 0.0  ;;  %6299 = vmatprep.subr.bf16.mxu0 %v6939_v40 }
 0x16f   : > { %v808_v15 = vmax.f32 %v768_v53, 0.0 }
 0x170   : > { %v826_v16 = vpack.c.bf16 %v810_v13, %v809_v12  ;;  %5404 = vmatpush3.bf16.msra.mxu1 %v7473_v3  ;;  %v7534_v3 = vld [vmem:[%s7377_s19 + $0x10] ss:$8 sps:$4 sm:$0xff]  }
 0x171   : > { %v825_v19 = vpack.c.bf16 %v808_v15, %v807_v14 }
 0x173   : > { %5405 = vmatprep.subr.bf16.mxu1 %v825_v19  ;;  %6255 = vmatprep.mubr.msk.bf16.mxu0 %vm1204_vm1, %v825_v19 }
 0x174   : > { %5406 = vmatpush3.bf16.msra.mxu1 %v7487_v18  ;;  %6256 = vmatmul.mubr.msk.bf16.gmra.mrb[60].mxu0 %vm1204_vm1, %v826_v16  ;;  %v7537_v18 = vld [vmem:[%s7377_s19 + $0x24] ss:$8 sps:$4 sm:$0xff]  }
 0x175   : > { %5407 = vmatprep.subr.bf16.mxu1 %v826_v16 }
 0x178   : > { %5408 = vmatpush3.bf16.msra.mxu1 %v7485_v17  ;;  %v7545_v17 = vld [vmem:[%s7377_s19 + $0x34] ss:$8 sps:$4 sm:$0xff]  }
 0x17b   : > { %1020 = vmatmul.mubr.bf16.vlgmr.msra.gmra.mrb[0].mxu1 %v7525_v26 }
 0x17c   : > { %1027 = vmatprep.mubr.bf16.mxu1 %v7529_v4 }
 0x183   : > { %1028 = vmatmul.mubr.bf16.gmra.mrb[4].mxu1 %v7534_v3 }
 0x184   : > { %1035 = vmatprep.mubr.bf16.mxu1 %v7537_v18 }
 0x18b   : > { %1036 = vmatmul.mubr.bf16.gmra.mrb[8].mxu1 %v7542_v20 }
 0x18c   : > { %1043 = vmatprep.mubr.bf16.mxu1 %v7545_v17 }
 0x193   : > { %1044 = vmatmul.mubr.bf16.gmra.mrb[12].mxu1 %v7550_v22 }
 0x194   : > { %1051 = vmatprep.mubr.bf16.mxu1 %v7553_v27 }
 0x19b   : > { %1052 = vmatmul.mubr.bf16.gmra.mrb[16].mxu1 %v7558_v28 }
 0x19c   : > { %1059 = vmatprep.mubr.bf16.mxu1 %v7561_v29 }
 0x1a3   : > { %1060 = vmatmul.mubr.bf16.gmra.mrb[20].mxu1 %v7566_v30 }
 0x1a4   : > { %1067 = vmatprep.mubr.bf16.mxu1 %v7569_v31 }
 0x1ab   : > { %1068 = vmatmul.mubr.bf16.gmra.mrb[24].mxu1 %v7574_v32 }
 0x1ac   : > { %1075 = vmatprep.mubr.bf16.mxu1 %v7577_v33 }
 0x1b3   : > { %1076 = vmatmul.mubr.bf16.gmra.mrb[28].mxu1 %v7582_v34 }
 0x1b4   : > { %1083 = vmatprep.mubr.bf16.mxu1 %v7585_v35 }
 0x1bb   : > { %1084 = vmatmul.mubr.bf16.gmra.mrb[32].mxu1 %v7590_v36 }
 0x1bc   : > { %1091 = vmatprep.mubr.bf16.mxu1 %v7593_v37 }
 0x1c3   : > { %1092 = vmatmul.mubr.bf16.gmra.mrb[36].mxu1 %v7598_v38 }
 0x1c4   : > { %1099 = vmatprep.mubr.bf16.mxu1 %v7601_v41 }
 0x1cb   : > { %1100 = vmatmul.mubr.bf16.gmra.mrb[40].mxu1 %v7606_v42 }
 0x1cc   : > { %1107 = vmatprep.mubr.bf16.mxu1 %v7609_v43 }
 0x1d3   : > { %1108 = vmatmul.mubr.bf16.gmra.mrb[44].mxu1 %v7617_v45 }
 0x1d4   : > { %1115 = vmatprep.mubr.bf16.mxu1 %v7620_v46 }
 0x1db   : > { %1116 = vmatmul.mubr.bf16.gmra.mrb[48].mxu1 %v7631_v49 }
 0x1dc   : > { %1123 = vmatprep.mubr.bf16.mxu1 %v7634_v50 }
 0x1e3   : > { %1124 = vmatmul.mubr.bf16.gmra.mrb[52].mxu1 %v7642_v52 }
 0x1e4   : > { %1131 = vmatprep.mubr.bf16.mxu1 %v7645_v55 }
 0x1eb   : > { %1132 = vmatmul.mubr.bf16.gmra.mrb[56].mxu1 %v7650_v56 }
 0x1ec   : > { %1139 = vmatprep.mubr.bf16.mxu1 %v7653_v57 }
 0x1f3   : > { %1140 = vmatmul.mubr.bf16.gmra.mrb[60].mxu1 %v7658_v58 }
 0x1f4   : > { %1763 = vmatprep.mubr.bf16.mxu1 %v7429_v21 }
 0x24e   : > { %v5409_v59 = vpop.f32.mrb[0].mxu1 }
 0x24f   : > { %v5410_v60 = vpop.f32.mrb[1].mxu1 }
 0x250   : > { %v5411_v61 = vadd.f32 %v5410_v60, %v5409_v59  ;;  %v5412_v39 = vpop.f32.mrb[2].mxu1 }
 0x251   : > { %v5413_v62 = vpop.f32.mrb[3].mxu1 }
 0x252   : > { %v5414_v63 = vadd.f32 %v5413_v62, %v5412_v39 }
 0x254   : > { %v1148_v0 = vpack.c.bf16 %v5414_v63, %v5411_v61 }
 0x256   : > { %v5415_v1 = vpop.f32.mrb[4].mxu1  ;;  %6267 = vmatprep.mubr.msk.bf16.mxu0 %vm1204_vm1, %v1148_v0 }
 0x257   : > { %v5416_v2 = vpop.f32.mrb[5].mxu1 }
 0x258   : > { %v5417_v5 = vadd.f32 %v5416_v2, %v5415_v1  ;;  %v5418_v6 = vpop.f32.mrb[6].mxu1 }
 0x259   : > { %v5419_v7 = vpop.f32.mrb[7].mxu1 }
 0x25a   : > { %v5420_v8 = vadd.f32 %v5419_v7, %v5418_v6 }
 0x25c   : > { %v1149_v9 = vpack.c.bf16 %v5420_v8, %v5417_v5 }
 0x25e   : > { %v5421_v21 = vpop.f32.mrb[8].mxu1  ;;  %6268 = vmatmul.mubr.msk.bf16.vlgmr.msra.gmra.mrb[32].mxu0 %vm1204_vm1, %v1149_v9 }
 0x25f   : > { %v5422_v10 = vpop.f32.mrb[9].mxu1  ;;  %6300 = vmatpush3.bf16.msra.mxu0 %v6939_v40 }
 0x260   : > { %v5423_v11 = vadd.f32 %v5422_v10, %v5421_v21  ;;  %v5424_v53 = vpop.f32.mrb[10].mxu1  ;;  %6301 = vmatprep.subr.bf16.mxu0 %v6940_v54 }
 0x261   : > { %v5425_v12 = vpop.f32.mrb[11].mxu1 }
 0x262   : > { %v5426_v13 = vadd.f32 %v5425_v12, %v5424_v53 }
 0x263   : > { %6302 = vmatpush3.bf16.msra.mxu0 %v6940_v54 }
 0x264   : > { %v1150_v14 = vpack.c.bf16 %v5426_v13, %v5423_v11 }
 0x266   : > { %v5427_v15 = vpop.f32.mrb[12].mxu1  ;;  %6271 = vmatprep.mubr.msk.bf16.mxu0 %vm1204_vm1, %v1150_v14 }
 0x267   : > { %v5428_v16 = vpop.f32.mrb[13].mxu1 }
 0x268   : > { %v5429_v19 = vadd.f32 %v5428_v16, %v5427_v15  ;;  %v5430_v44 = vpop.f32.mrb[14].mxu1 }
 0x269   : > { %v5431_v47 = vpop.f32.mrb[15].mxu1 }
 0x26a   : > { %v5432_v48 = vadd.f32 %v5431_v47, %v5430_v44 }
 0x26c   : > { %v1151_v51 = vpack.c.bf16 %v5432_v48, %v5429_v19 }
 0x26e   : > { %v5433_v59 = vpop.f32.mrb[16].mxu1  ;;  %6272 = vmatmul.mubr.msk.bf16.gmra.mrb[36].mxu0 %vm1204_vm1, %v1151_v51 }
 0x26f   : > { %v5434_v40 = vpop.f32.mrb[17].mxu1 }
 0x270   : > { %v5435_v60 = vadd.f32 %v5434_v40, %v5433_v59  ;;  %v5436_v61 = vpop.f32.mrb[18].mxu1 }
 0x271   : > { %v5437_v39 = vpop.f32.mrb[19].mxu1 }
 0x272   : > { %v5438_v62 = vadd.f32 %v5437_v39, %v5436_v61 }
 0x274   : > { %v1152_v63 = vpack.c.bf16 %v5438_v62, %v5435_v60 }
 0x276   : > { %v5439_v0 = vpop.f32.mrb[20].mxu1  ;;  %6275 = vmatprep.mubr.msk.bf16.mxu0 %vm1204_vm1, %v1152_v63 }
 0x277   : > { %v5440_v1 = vpop.f32.mrb[21].mxu1 }
 0x278   : > { %v5441_v2 = vadd.f32 %v5440_v1, %v5439_v0  ;;  %v5442_v5 = vpop.f32.mrb[22].mxu1 }
 0x279   : > { %v5443_v6 = vpop.f32.mrb[23].mxu1 }
 0x27a   : > { %v5444_v7 = vadd.f32 %v5443_v6, %v5442_v5 }
 0x27c   : > { %v1153_v8 = vpack.c.bf16 %v5444_v7, %v5441_v2 }
 0x27e   : > { %v5445_v9 = vpop.f32.mrb[24].mxu1  ;;  %6276 = vmatmul.mubr.msk.bf16.gmra.mrb[40].mxu0 %vm1204_vm1, %v1153_v8 }
 0x27f   : > { %v5446_v54 = vpop.f32.mrb[25].mxu1 }
 0x280   : > { %v5447_v21 = vadd.f32 %v5446_v54, %v5445_v9  ;;  %v5448_v10 = vpop.f32.mrb[26].mxu1 }
 0x281   : > { %v5449_v11 = vpop.f32.mrb[27].mxu1 }
 0x282   : > { %v5450_v53 = vadd.f32 %v5449_v11, %v5448_v10 }
 0x284   : > { %v1154_v12 = vpack.c.bf16 %v5450_v53, %v5447_v21 }
 0x286   : > { %v5451_v13 = vpop.f32.mrb[28].mxu1  ;;  %6279 = vmatprep.mubr.msk.bf16.mxu0 %vm1204_vm1, %v1154_v12 }
 0x287   : > { %v5452_v14 = vpop.f32.mrb[29].mxu1 }
 0x288   : > { %v5453_v15 = vadd.f32 %v5452_v14, %v5451_v13  ;;  %v5454_v16 = vpop.f32.mrb[30].mxu1 }
 0x289   : > { %v5455_v19 = vpop.f32.mrb[31].mxu1 }
 0x28a   : > { %v5456_v44 = vadd.f32 %v5455_v19, %v5454_v16 }
 0x28c   : > { %v1155_v47 = vpack.c.bf16 %v5456_v44, %v5453_v15 }
 0x28e   : > { %v5457_v48 = vpop.f32.mrb[32].mxu1  ;;  %6280 = vmatmul.mubr.msk.bf16.gmra.mrb[44].mxu0 %vm1204_vm1, %v1155_v47 }
 0x28f   : > { %v5458_v51 = vpop.f32.mrb[33].mxu1 }
 0x290   : > { %v5459_v59 = vadd.f32 %v5458_v51, %v5457_v48  ;;  %v5460_v40 = vpop.f32.mrb[34].mxu1 }
 0x291   : > { %v5461_v60 = vpop.f32.mrb[35].mxu1 }
 0x292   : > { %v5462_v61 = vadd.f32 %v5461_v60, %v5460_v40  ;;  %v6941_v60 = vld [vmem:[#allocation5 + $0x30] sm:$0xff]  }
 0x293   : > { %6303 = vmatprep.subr.bf16.mxu0 %v6941_v60 }
 0x294   : > { %v1156_v39 = vpack.c.bf16 %v5462_v61, %v5459_v59  ;;  %6304 = vmatpush3.bf16.msra.mxu0 %v6941_v60 }
 0x296   : > { %v5463_v62 = vpop.f32.mrb[36].mxu1  ;;  %6283 = vmatprep.mubr.msk.bf16.mxu0 %vm1204_vm1, %v1156_v39 }
 0x297   : > { %v5464_v63 = vpop.f32.mrb[37].mxu1 }
 0x298   : > { %v5465_v0 = vadd.f32 %v5464_v63, %v5463_v62  ;;  %v5466_v1 = vpop.f32.mrb[38].mxu1  ;;  %v6942_v62 = vld [vmem:[#allocation5 + $0x38] sm:$0xff]  }
 0x299   : > { %v5467_v2 = vpop.f32.mrb[39].mxu1  ;;  %6305 = vmatprep.subr.bf16.mxu0 %v6942_v62 }
 0x29a   : > { %v5468_v5 = vadd.f32 %v5467_v2, %v5466_v1  ;;  %6306 = vmatpush3.bf16.msra.mxu0 %v6942_v62 }
 0x29c   : > { %v1157_v6 = vpack.c.bf16 %v5468_v5, %v5465_v0 }
 0x29e   : > { %v5469_v7 = vpop.f32.mrb[40].mxu1  ;;  %6284 = vmatmul.mubr.msk.bf16.gmra.mrb[48].mxu0 %vm1204_vm1, %v1157_v6 }
 0x29f   : > { %v5470_v8 = vpop.f32.mrb[41].mxu1 }
 0x2a0   : > { %v5471_v9 = vadd.f32 %v5470_v8, %v5469_v7  ;;  %v5472_v54 = vpop.f32.mrb[42].mxu1 }
 0x2a1   : > { %v5473_v21 = vpop.f32.mrb[43].mxu1 }
 0x2a2   : > { %v5474_v10 = vadd.f32 %v5473_v21, %v5472_v54 }
 0x2a4   : > { %v1158_v11 = vpack.c.bf16 %v5474_v10, %v5471_v9 }
 0x2a6   : > { %v5475_v53 = vpop.f32.mrb[44].mxu1  ;;  %6287 = vmatprep.mubr.msk.bf16.mxu0 %vm1204_vm1, %v1158_v11 }
 0x2a7   : > { %v5476_v12 = vpop.f32.mrb[45].mxu1 }
 0x2a8   : > { %v5477_v13 = vadd.f32 %v5476_v12, %v5475_v53  ;;  %v5478_v14 = vpop.f32.mrb[46].mxu1 }
 0x2a9   : > { %v5479_v15 = vpop.f32.mrb[47].mxu1 }
 0x2aa   : > { %v5480_v16 = vadd.f32 %v5479_v15, %v5478_v14 }
 0x2ac   : > { %v1159_v19 = vpack.c.bf16 %v5480_v16, %v5477_v13 }
 0x2ae   : > { %v5481_v44 = vpop.f32.mrb[48].mxu1  ;;  %6288 = vmatmul.mubr.msk.bf16.gmra.mrb[52].mxu0 %vm1204_vm1, %v1159_v19 }
 0x2af   : > { %v5482_v47 = vpop.f32.mrb[49].mxu1 }
 0x2b0   : > { %v5483_v48 = vadd.f32 %v5482_v47, %v5481_v44  ;;  %v5484_v51 = vpop.f32.mrb[50].mxu1  ;;  %v1649_v44 = vsub.s32 1, %v7432_v23 }
 0x2b1   : > { %v5485_v59 = vpop.f32.mrb[51].mxu1 }
 0x2b2   : > { %v5486_v40 = vadd.f32 %v5485_v59, %v5484_v51  ;;  %v7682_v47 = vrot.slane %v7438_v25, %v1649_v44 }
 0x2b4   : > { %v1160_v61 = vpack.c.bf16 %v5486_v40, %v5483_v48 }
 0x2b6   : > { %v5487_v39 = vpop.f32.mrb[52].mxu1  ;;  %6291 = vmatprep.mubr.msk.bf16.mxu0 %vm1204_vm1, %v1160_v61 }
 0x2b7   : > { %v5488_v63 = vpop.f32.mrb[53].mxu1 }
 0x2b8   : > { %v5489_v0 = vadd.f32 %v5488_v63, %v5487_v39  ;;  %v5490_v1 = vpop.f32.mrb[54].mxu1 }
 0x2b9   : > { %v5491_v2 = vpop.f32.mrb[55].mxu1 }
 0x2ba   : > { %v5492_v5 = vadd.f32 %v5491_v2, %v5490_v1 }
 0x2bc   : > { %v1161_v6 = vpack.c.bf16 %v5492_v5, %v5489_v0 }
 0x2be   : > { %v5493_v7 = vpop.f32.mrb[56].mxu1  ;;  %6292 = vmatmul.mubr.msk.bf16.gmra.mrb[56].mxu0 %vm1204_vm1, %v1161_v6 }
 0x2bf   : > { %v5494_v8 = vpop.f32.mrb[57].mxu1 }
 0x2c0   : > { %v5495_v9 = vadd.f32 %v5494_v8, %v5493_v7  ;;  %v5496_v54 = vpop.f32.mrb[58].mxu1 }
 0x2c1   : > { %v5497_v21 = vpop.f32.mrb[59].mxu1 }
 0x2c2   : > { %v5498_v10 = vadd.f32 %v5497_v21, %v5496_v54 }
 0x2c4   : > { %v1162_v11 = vpack.c.bf16 %v5498_v10, %v5495_v9 }
 0x2c6   : > { %v5499_v53 = vpop.f32.mrb[60].mxu1  ;;  %6295 = vmatprep.mubr.msk.bf16.mxu0 %vm1204_vm1, %v1162_v11 }
 0x2c7   : > { %v5500_v12 = vpop.f32.mrb[61].mxu1 }
 0x2c8   : > { %v5501_v13 = vadd.f32 %v5500_v12, %v5499_v53  ;;  %v5502_v14 = vpop.f32.mrb[62].mxu1 }
 0x2c9   : > { %v5503_v15 = vpop.f32.mrb[63].mxu1 }
 0x2ca   : > { %v5504_v16 = vadd.f32 %v5503_v15, %v5502_v14 }
 0x2cc   : > { %v1163_v19 = vpack.c.bf16 %v5504_v16, %v5501_v13 }
 0x2ce   : > { %6296 = vmatmul.mubr.msk.bf16.gmra.mrb[60].mxu0 %vm1204_vm1, %v1163_v19 }
 0x331   : > { %v6269_v48 = vpop.f32.mrb[32].mxu0 }
 0x332   : > { %v1653_v51 = vadd.f32 %v6269_v48, %v7682_v47  ;;  %v1520_v59 = vpop.f32.mrb[33].mxu0 }
 0x333   : > { %v1651_v40 = vadd.f32 %v7682_v47, %v1520_v59  ;;  %v6270_v60 = vpop.f32.mrb[34].mxu0 }
 0x334   : > { %v1654_v61 = vadd.f32 %v6270_v60, %v7682_v47  ;;  %v1523_v39 = vpop.f32.mrb[35].mxu0  ;;  %v1685_v63 = vmax.f32 %v1653_v51, 0.0 }
 0x335   : > { %v1652_v62 = vadd.f32 %v7682_v47, %v1523_v39  ;;  %v1683_v1 = vmax.f32 %v1651_v40, 0.0 }
 0x336   : > { %v1686_v0 = vmax.f32 %v1654_v61, 0.0 }
 0x337   : > { %v1684_v2 = vmax.f32 %v1652_v62, 0.0 }
 0x338   : > { %v7688_v5 = vpack.c.bf16 %v1686_v0, %v1685_v63 }
 0x339   : > { %v7690_v25 = vpack.c.bf16 %v1684_v2, %v1683_v1 }
 0x33b   : > { %6307 = vmatprep.mubr.msk.bf16.mxu0 %vm1204_vm1, %v7690_v25 }
 0x33c   : > { %6308 = vmatmul.mubr.msk.bf16.vlgmr.msra.gmra.mrb[64].mxu0 %vm1204_vm1, %v7688_v5 }
 0x341   : > { %v6273_v6 = vpop.f32.mrb[36].mxu0 }
 0x342   : > { %v1657_v7 = vadd.f32 %v6273_v6, %v7682_v47  ;;  %v1536_v8 = vpop.f32.mrb[37].mxu0 }
 0x343   : > { %v1655_v9 = vadd.f32 %v7682_v47, %v1536_v8  ;;  %v6274_v54 = vpop.f32.mrb[38].mxu0 }
 0x344   : > { %v1658_v21 = vadd.f32 %v6274_v54, %v7682_v47  ;;  %v1539_v10 = vpop.f32.mrb[39].mxu0  ;;  %v1689_v53 = vmax.f32 %v1657_v7, 0.0 }
 0x345   : > { %v1656_v11 = vadd.f32 %v7682_v47, %v1539_v10  ;;  %v1687_v13 = vmax.f32 %v1655_v9, 0.0 }
 0x346   : > { %v1690_v12 = vmax.f32 %v1658_v21, 0.0 }
 0x347   : > { %v1688_v14 = vmax.f32 %v1656_v11, 0.0 }
 0x348   : > { %v7700_v15 = vpack.c.bf16 %v1690_v12, %v1689_v53 }
 0x349   : > { %v7702_v16 = vpack.c.bf16 %v1688_v14, %v1687_v13 }
 0x34b   : > { %6311 = vmatprep.mubr.msk.bf16.mxu0 %vm1204_vm1, %v7702_v16 }
 0x34c   : > { %6312 = vmatmul.mubr.msk.bf16.gmra.mrb[68].mxu0 %vm1204_vm1, %v7700_v15 }
 0x351   : > { %v6277_v19 = vpop.f32.mrb[40].mxu0 }
 0x352   : > { %v1661_v48 = vadd.f32 %v6277_v19, %v7682_v47  ;;  %v1552_v51 = vpop.f32.mrb[41].mxu0 }
 0x353   : > { %v1659_v59 = vadd.f32 %v7682_v47, %v1552_v51  ;;  %v6278_v40 = vpop.f32.mrb[42].mxu0 }
 0x354   : > { %v1662_v60 = vadd.f32 %v6278_v40, %v7682_v47  ;;  %v1555_v61 = vpop.f32.mrb[43].mxu0  ;;  %v1693_v62 = vmax.f32 %v1661_v48, 0.0 }
 0x355   : > { %v1660_v39 = vadd.f32 %v7682_v47, %v1555_v61  ;;  %v1691_v0 = vmax.f32 %v1659_v59, 0.0 }
 0x356   : > { %v1694_v63 = vmax.f32 %v1662_v60, 0.0 }
 0x357   : > { %v1692_v1 = vmax.f32 %v1660_v39, 0.0 }
 0x358   : > { %v7712_v2 = vpack.c.bf16 %v1694_v63, %v1693_v62 }
 0x359   : > { %v7714_v6 = vpack.c.bf16 %v1692_v1, %v1691_v0 }
 0x35b   : > { %6315 = vmatprep.mubr.msk.bf16.mxu0 %vm1204_vm1, %v7714_v6 }
 0x35c   : > { %6316 = vmatmul.mubr.msk.bf16.gmra.mrb[72].mxu0 %vm1204_vm1, %v7712_v2 }
 0x361   : > { %v6281_v7 = vpop.f32.mrb[44].mxu0 }
 0x362   : > { %v1665_v8 = vadd.f32 %v6281_v7, %v7682_v47  ;;  %v1568_v9 = vpop.f32.mrb[45].mxu0 }
 0x363   : > { %v1663_v54 = vadd.f32 %v7682_v47, %v1568_v9  ;;  %v6282_v21 = vpop.f32.mrb[46].mxu0 }
 0x364   : > { %v1666_v10 = vadd.f32 %v6282_v21, %v7682_v47  ;;  %v1571_v11 = vpop.f32.mrb[47].mxu0  ;;  %v1697_v12 = vmax.f32 %v1665_v8, 0.0 }
 0x365   : > { %v1664_v53 = vadd.f32 %v7682_v47, %v1571_v11  ;;  %v1695_v14 = vmax.f32 %v1663_v54, 0.0 }
 0x366   : > { %v1698_v13 = vmax.f32 %v1666_v10, 0.0 }
 0x367   : > { %v1696_v19 = vmax.f32 %v1664_v53, 0.0 }
 0x368   : > { %v7724_v48 = vpack.c.bf16 %v1698_v13, %v1697_v12 }
 0x369   : > { %v7726_v51 = vpack.c.bf16 %v1696_v19, %v1695_v14 }
 0x36b   : > { %6319 = vmatprep.mubr.msk.bf16.mxu0 %vm1204_vm1, %v7726_v51 }
 0x36c   : > { %6320 = vmatmul.mubr.msk.bf16.gmra.mrb[76].mxu0 %vm1204_vm1, %v7724_v48 }
 0x371   : > { %v6285_v59 = vpop.f32.mrb[48].mxu0 }
 0x372   : > { %v1669_v40 = vadd.f32 %v6285_v59, %v7682_v47  ;;  %v1584_v60 = vpop.f32.mrb[49].mxu0 }
 0x373   : > { %v1667_v61 = vadd.f32 %v7682_v47, %v1584_v60  ;;  %v6286_v39 = vpop.f32.mrb[50].mxu0 }
 0x374   : > { %v1670_v62 = vadd.f32 %v6286_v39, %v7682_v47  ;;  %v1587_v63 = vpop.f32.mrb[51].mxu0  ;;  %v1701_v1 = vmax.f32 %v1669_v40, 0.0 }
 0x375   : > { %v1668_v0 = vadd.f32 %v7682_v47, %v1587_v63  ;;  %v1699_v8 = vmax.f32 %v1667_v61, 0.0 }
 0x376   : > { %v1702_v7 = vmax.f32 %v1670_v62, 0.0 }
 0x377   : > { %v1700_v9 = vmax.f32 %v1668_v0, 0.0 }
 0x378   : > { %v1724_v54 = vpack.c.bf16 %v1702_v7, %v1701_v1 }
 0x379   : > { %v1723_v21 = vpack.c.bf16 %v1700_v9, %v1699_v8 }
 0x37b   : > { %5545 = vmatprep.subr.bf16.mxu1 %v1723_v21  ;;  %6323 = vmatprep.mubr.msk.bf16.mxu0 %vm1204_vm1, %v1723_v21 }
 0x37c   : > { %5546 = vmatpush3.bf16.msra.mxu1 %v7690_v25  ;;  %6324 = vmatmul.mubr.msk.bf16.gmra.mrb[80].mxu0 %vm1204_vm1, %v1724_v54 }
 0x37d   : > { %5547 = vmatprep.subr.bf16.mxu1 %v1724_v54 }
 0x380   : > { %5548 = vmatpush3.bf16.msra.mxu1 %v7688_v5 }
 0x381   : > { %v6289_v10 = vpop.f32.mrb[52].mxu0 }
 0x382   : > { %v1673_v11 = vadd.f32 %v6289_v10, %v7682_v47  ;;  %v1600_v53 = vpop.f32.mrb[53].mxu0 }
 0x383   : > { %v1671_v12 = vadd.f32 %v7682_v47, %v1600_v53  ;;  %v6290_v13 = vpop.f32.mrb[54].mxu0 }
 0x384   : > { %v1674_v14 = vadd.f32 %v6290_v13, %v7682_v47  ;;  %v1603_v19 = vpop.f32.mrb[55].mxu0  ;;  %v1705_v40 = vmax.f32 %v1673_v11, 0.0 }
 0x385   : > { %v1672_v59 = vadd.f32 %v7682_v47, %v1603_v19  ;;  %v1703_v25 = vmax.f32 %v1671_v12, 0.0 }
 0x386   : > { %v1706_v60 = vmax.f32 %v1674_v14, 0.0 }
 0x387   : > { %v1704_v61 = vmax.f32 %v1672_v59, 0.0 }
 0x388   : > { %v1726_v39 = vpack.c.bf16 %v1706_v60, %v1705_v40 }
 0x389   : > { %v1725_v62 = vpack.c.bf16 %v1704_v61, %v1703_v25 }
 0x38b   : > { %5549 = vmatprep.subr.bf16.mxu1 %v1725_v62  ;;  %6327 = vmatprep.mubr.msk.bf16.mxu0 %vm1204_vm1, %v1725_v62 }
 0x38c   : > { %5550 = vmatpush3.bf16.msra.mxu1 %v7702_v16  ;;  %6328 = vmatmul.mubr.msk.bf16.gmra.mrb[84].mxu0 %vm1204_vm1, %v1726_v39 }
 0x38d   : > { %5551 = vmatprep.subr.bf16.mxu1 %v1726_v39 }
 0x390   : > { %5552 = vmatpush3.bf16.msra.mxu1 %v7700_v15 }
 0x391   : > { %v6293_v5 = vpop.f32.mrb[56].mxu0 }
 0x392   : > { %v1677_v63 = vadd.f32 %v6293_v5, %v7682_v47  ;;  %v1616_v0 = vpop.f32.mrb[57].mxu0 }
 0x393   : > { %v1675_v1 = vadd.f32 %v7682_v47, %v1616_v0  ;;  %v6294_v7 = vpop.f32.mrb[58].mxu0 }
 0x394   : > { %v1678_v8 = vadd.f32 %v6294_v7, %v7682_v47  ;;  %v1619_v9 = vpop.f32.mrb[59].mxu0  ;;  %v1709_v21 = vmax.f32 %v1677_v63, 0.0 }
 0x395   : > { %v1676_v54 = vadd.f32 %v7682_v47, %v1619_v9  ;;  %v1707_v16 = vmax.f32 %v1675_v1, 0.0 }
 0x396   : > { %v1710_v10 = vmax.f32 %v1678_v8, 0.0 }
 0x397   : > { %v1708_v11 = vmax.f32 %v1676_v54, 0.0 }
 0x398   : > { %v1728_v53 = vpack.c.bf16 %v1710_v10, %v1709_v21 }
 0x399   : > { %v1727_v12 = vpack.c.bf16 %v1708_v11, %v1707_v16 }
 0x39b   : > { %5553 = vmatprep.subr.bf16.mxu1 %v1727_v12  ;;  %6331 = vmatprep.mubr.msk.bf16.mxu0 %vm1204_vm1, %v1727_v12 }
 0x39c   : > { %5554 = vmatpush3.bf16.msra.mxu1 %v7714_v6  ;;  %6332 = vmatmul.mubr.msk.bf16.gmra.mrb[88].mxu0 %vm1204_vm1, %v1728_v53 }
 0x39d   : > { %5555 = vmatprep.subr.bf16.mxu1 %v1728_v53 }
 0x3a0   : > { %5556 = vmatpush3.bf16.msra.mxu1 %v7712_v2 }
 0x3a1   : > { %v6297_v15 = vpop.f32.mrb[60].mxu0 }
 0x3a2   : > { %v1681_v13 = vadd.f32 %v6297_v15, %v7682_v47  ;;  %v1632_v14 = vpop.f32.mrb[61].mxu0 }
 0x3a3   : > { %v1679_v19 = vadd.f32 %v7682_v47, %v1632_v14  ;;  %v6298_v59 = vpop.f32.mrb[62].mxu0 }
 0x3a4   : > { %v1682_v40 = vadd.f32 %v6298_v59, %v7682_v47  ;;  %v1635_v60 = vpop.f32.mrb[63].mxu0  ;;  %v1713_v61 = vmax.f32 %v1681_v13, 0.0 }
 0x3a5   : > { %v1680_v25 = vadd.f32 %v7682_v47, %v1635_v60  ;;  %v1711_v6 = vmax.f32 %v1679_v19, 0.0 }
 0x3a6   : > { %v1714_v39 = vmax.f32 %v1682_v40, 0.0 }
 0x3a7   : > { %v1712_v62 = vmax.f32 %v1680_v25, 0.0 }
 0x3a8   : > { %v1730_v5 = vpack.c.bf16 %v1714_v39, %v1713_v61 }
 0x3a9   : > { %v1729_v63 = vpack.c.bf16 %v1712_v62, %v1711_v6 }
 0x3ab   : > { %5557 = vmatprep.subr.bf16.mxu1 %v1729_v63  ;;  %6335 = vmatprep.mubr.msk.bf16.mxu0 %vm1204_vm1, %v1729_v63 }
 0x3ac   : > { %5558 = vmatpush3.bf16.msra.mxu1 %v7726_v51  ;;  %6336 = vmatmul.mubr.msk.bf16.gmra.mrb[92].mxu0 %vm1204_vm1, %v1730_v5 }
 0x3ad   : > { %5559 = vmatprep.subr.bf16.mxu1 %v1730_v5 }
 0x3b0   : > { %5560 = vmatpush3.bf16.msra.mxu1 %v7724_v48 }
 0x3b3   : > { %1764 = vmatmul.mubr.bf16.vlgmr.msra.gmra.mrb[64].mxu1 %v7525_v26  ;;  %v6943_v26 = vld [vmem:[%s8511_s4 + $0x20] sm:$0xff]  }
 0x3b4   : > { %1771 = vmatprep.mubr.bf16.mxu1 %v7529_v4  ;;  %6339 = vmatprep.subr.bf16.mxu0 %v6943_v26  ;;  %v6944_v4 = vld [vmem:[%s8511_s4 + $0x28] sm:$0xff]  }
 0x3b5   : > { %6340 = vmatpush3.bf16.msra.mxu0 %v6943_v26 }
 0x3b6   : > { %6341 = vmatprep.subr.bf16.mxu0 %v6944_v4 }
 0x3b9   : > { %6342 = vmatpush3.bf16.msra.mxu0 %v6944_v4 }
 0x3bb   : > { %1772 = vmatmul.mubr.bf16.gmra.mrb[68].mxu1 %v7534_v3  ;;  %v6945_v3 = vld [vmem:[%s8511_s4 + $0x30] sm:$0xff]  }
 0x3bc   : > { %1779 = vmatprep.mubr.bf16.mxu1 %v7537_v18  ;;  %6343 = vmatprep.subr.bf16.mxu0 %v6945_v3  ;;  %v6946_v18 = vld [vmem:[%s8511_s4 + $0x38] sm:$0xff]  }
 0x3bd   : > { %6344 = vmatpush3.bf16.msra.mxu0 %v6945_v3 }
 0x3be   : > { %6345 = vmatprep.subr.bf16.mxu0 %v6946_v18 }
 0x3c1   : > { %6346 = vmatpush3.bf16.msra.mxu0 %v6946_v18 }
 0x3c3   : > { %1780 = vmatmul.mubr.bf16.gmra.mrb[72].mxu1 %v7542_v20  ;;  %v7808_v20 = vld [vmem:[%s7377_s19 + $0x4] ss:$8 sps:$4 sm:$0xff]  }
 0x3c4   : > { %1787 = vmatprep.mubr.bf16.mxu1 %v7545_v17 }
 0x3cb   : > { %1788 = vmatmul.mubr.bf16.gmra.mrb[76].mxu1 %v7550_v22  ;;  %v6947_v22 = vld [vmem:[#allocation5 + $0x40] sm:$0xff]  }
 0x3cc   : > { %1795 = vmatprep.mubr.bf16.mxu1 %v7553_v27  ;;  %6379 = vmatprep.subr.bf16.mxu0 %v6947_v22 }
 0x3d3   : > { %1796 = vmatmul.mubr.bf16.gmra.mrb[80].mxu1 %v7558_v28 }
 0x3d4   : > { %1803 = vmatprep.mubr.bf16.mxu1 %v7561_v29 }
 0x3db   : > { %1804 = vmatmul.mubr.bf16.gmra.mrb[84].mxu1 %v7566_v30 }
 0x3dc   : > { %1811 = vmatprep.mubr.bf16.mxu1 %v7569_v31 }
 0x3e3   : > { %1812 = vmatmul.mubr.bf16.gmra.mrb[88].mxu1 %v7574_v32 }
 0x3e4   : > { %1819 = vmatprep.mubr.bf16.mxu1 %v7577_v33 }
 0x3eb   : > { %1820 = vmatmul.mubr.bf16.gmra.mrb[92].mxu1 %v7582_v34 }
 0x3ec   : > { %1827 = vmatprep.mubr.bf16.mxu1 %v7585_v35 }
 0x3f3   : > { %1828 = vmatmul.mubr.bf16.gmra.mrb[96].mxu1 %v7590_v36 }
 0x3f4   : > { %1835 = vmatprep.mubr.bf16.mxu1 %v7593_v37 }
 0x3fb   : > { %1836 = vmatmul.mubr.bf16.gmra.mrb[100].mxu1 %v7598_v38 }
 0x3fc   : > { %1843 = vmatprep.mubr.bf16.mxu1 %v7601_v41 }
 0x403   : > { %1844 = vmatmul.mubr.bf16.gmra.mrb[104].mxu1 %v7606_v42  ;;  %v6948_v42 = vld [vmem:[#allocation5 + $0x48] sm:$0xff]  }
 0x404   : > { %1851 = vmatprep.mubr.bf16.mxu1 %v7609_v43 }
 0x40b   : > { %1852 = vmatmul.mubr.bf16.gmra.mrb[108].mxu1 %v7617_v45 }
 0x40c   : > { %1859 = vmatprep.mubr.bf16.mxu1 %v7620_v46 }
 0x413   : > { %1860 = vmatmul.mubr.bf16.gmra.mrb[112].mxu1 %v7631_v49 }
 0x414   : > { %1867 = vmatprep.mubr.bf16.mxu1 %v7634_v50 }
 0x41b   : > { %1868 = vmatmul.mubr.bf16.gmra.mrb[116].mxu1 %v7642_v52 }
 0x41c   : > { %1875 = vmatprep.mubr.bf16.mxu1 %v7645_v55 }
 0x423   : > { %1876 = vmatmul.mubr.bf16.gmra.mrb[120].mxu1 %v7650_v56 }
 0x424   : > { %1883 = vmatprep.mubr.bf16.mxu1 %v7653_v57 }
 0x42b   : > { %1884 = vmatmul.mubr.bf16.gmra.mrb[124].mxu1 %v7658_v58 }
 0x42c   : > { %2508 = vmatprep.mubr.bf16.mxu1 %v7808_v20 }
 0x486   : > { %v5561_v17 = vpop.f32.mrb[64].mxu1 }
 0x487   : > { %v5562_v27 = vpop.f32.mrb[65].mxu1 }
 0x488   : > { %v5563_v28 = vadd.f32 %v5562_v27, %v5561_v17  ;;  %v5564_v29 = vpop.f32.mrb[66].mxu1 }
 0x489   : > { %v5565_v30 = vpop.f32.mrb[67].mxu1 }
 0x48a   : > { %v5566_v31 = vadd.f32 %v5565_v30, %v5564_v29 }
 0x48c   : > { %v1892_v32 = vpack.c.bf16 %v5566_v31, %v5563_v28 }
 0x48e   : > { %v5567_v33 = vpop.f32.mrb[68].mxu1  ;;  %6347 = vmatprep.mubr.msk.bf16.mxu0 %vm1204_vm1, %v1892_v32 }
 0x48f   : > { %v5568_v34 = vpop.f32.mrb[69].mxu1 }
 0x490   : > { %v5569_v35 = vadd.f32 %v5568_v34, %v5567_v33  ;;  %v5570_v36 = vpop.f32.mrb[70].mxu1 }
 0x491   : > { %v5571_v37 = vpop.f32.mrb[71].mxu1 }
 0x492   : > { %v5572_v38 = vadd.f32 %v5571_v37, %v5570_v36 }
 0x494   : > { %v1893_v41 = vpack.c.bf16 %v5572_v38, %v5569_v35 }
 0x496   : > { %v5573_v43 = vpop.f32.mrb[72].mxu1  ;;  %6348 = vmatmul.mubr.msk.bf16.vlgmr.msra.gmra.mrb[64].mxu0 %vm1204_vm1, %v1893_v41 }
 0x497   : > { %v5574_v45 = vpop.f32.mrb[73].mxu1  ;;  %6380 = vmatpush3.bf16.msra.mxu0 %v6947_v22 }
 0x498   : > { %v5575_v46 = vadd.f32 %v5574_v45, %v5573_v43  ;;  %v5576_v49 = vpop.f32.mrb[74].mxu1  ;;  %6381 = vmatprep.subr.bf16.mxu0 %v6948_v42 }
 0x499   : > { %v5577_v50 = vpop.f32.mrb[75].mxu1 }
 0x49a   : > { %v5578_v52 = vadd.f32 %v5577_v50, %v5576_v49 }
 0x49b   : > { %6382 = vmatpush3.bf16.msra.mxu0 %v6948_v42 }
 0x49c   : > { %v1894_v55 = vpack.c.bf16 %v5578_v52, %v5575_v46 }
 0x49e   : > { %v5579_v56 = vpop.f32.mrb[76].mxu1  ;;  %6351 = vmatprep.mubr.msk.bf16.mxu0 %vm1204_vm1, %v1894_v55 }
 0x49f   : > { %v5580_v57 = vpop.f32.mrb[77].mxu1 }
 0x4a0   : > { %v5581_v58 = vadd.f32 %v5580_v57, %v5579_v56  ;;  %v5582_v47 = vpop.f32.mrb[78].mxu1 }
 0x4a1   : > { %v5583_v2 = vpop.f32.mrb[79].mxu1 }
 0x4a2   : > { %v5584_v48 = vadd.f32 %v5583_v2, %v5582_v47 }
 0x4a4   : > { %v1895_v51 = vpack.c.bf16 %v5584_v48, %v5581_v58 }
 0x4a6   : > { %v5585_v0 = vpop.f32.mrb[80].mxu1  ;;  %6352 = vmatmul.mubr.msk.bf16.gmra.mrb[68].mxu0 %vm1204_vm1, %v1895_v51 }
 0x4a7   : > { %v5586_v1 = vpop.f32.mrb[81].mxu1 }
 0x4a8   : > { %v5587_v7 = vadd.f32 %v5586_v1, %v5585_v0  ;;  %v5588_v8 = vpop.f32.mrb[82].mxu1 }
 0x4a9   : > { %v5589_v9 = vpop.f32.mrb[83].mxu1 }
 0x4aa   : > { %v5590_v54 = vadd.f32 %v5589_v9, %v5588_v8 }
 0x4ac   : > { %v1896_v21 = vpack.c.bf16 %v5590_v54, %v5587_v7  ;;  %v6949_v7 = vld [vmem:[#allocation5 + $0x50] sm:$0xff]   ;;  %v6950_v54 = vld [vmem:[#allocation5 + $0x58] sm:$0xff]  }
 0x4ad   : > { %6383 = vmatprep.subr.bf16.mxu0 %v6949_v7 }
 0x4ae   : > { %v5591_v10 = vpop.f32.mrb[84].mxu1  ;;  %6355 = vmatprep.mubr.msk.bf16.mxu0 %vm1204_vm1, %v1896_v21  ;;  %6384 = vmatpush3.bf16.msra.mxu0 %v6949_v7 }
 0x4af   : > { %v5592_v16 = vpop.f32.mrb[85].mxu1  ;;  %6385 = vmatprep.subr.bf16.mxu0 %v6950_v54 }
 0x4b0   : > { %v5593_v11 = vadd.f32 %v5592_v16, %v5591_v10  ;;  %v5594_v53 = vpop.f32.mrb[86].mxu1 }
 0x4b1   : > { %v5595_v12 = vpop.f32.mrb[87].mxu1 }
 0x4b2   : > { %v5596_v15 = vadd.f32 %v5595_v12, %v5594_v53  ;;  %6386 = vmatpush3.bf16.msra.mxu0 %v6950_v54 }
 0x4b4   : > { %v1897_v13 = vpack.c.bf16 %v5596_v15, %v5593_v11 }
 0x4b6   : > { %v5597_v14 = vpop.f32.mrb[88].mxu1  ;;  %6356 = vmatmul.mubr.msk.bf16.gmra.mrb[72].mxu0 %vm1204_vm1, %v1897_v13 }
 0x4b7   : > { %v5598_v19 = vpop.f32.mrb[89].mxu1 }
 0x4b8   : > { %v5599_v59 = vadd.f32 %v5598_v19, %v5597_v14  ;;  %v5600_v40 = vpop.f32.mrb[90].mxu1 }
 0x4b9   : > { %v5601_v60 = vpop.f32.mrb[91].mxu1 }
 0x4ba   : > { %v5602_v25 = vadd.f32 %v5601_v60, %v5600_v40 }
 0x4bc   : > { %v1898_v61 = vpack.c.bf16 %v5602_v25, %v5599_v59 }
 0x4be   : > { %v5603_v39 = vpop.f32.mrb[92].mxu1  ;;  %6359 = vmatprep.mubr.msk.bf16.mxu0 %vm1204_vm1, %v1898_v61 }
 0x4bf   : > { %v5604_v6 = vpop.f32.mrb[93].mxu1 }
 0x4c0   : > { %v5605_v62 = vadd.f32 %v5604_v6, %v5603_v39  ;;  %v5606_v5 = vpop.f32.mrb[94].mxu1 }
 0x4c1   : > { %v5607_v63 = vpop.f32.mrb[95].mxu1 }
 0x4c2   : > { %v5608_v26 = vadd.f32 %v5607_v63, %v5606_v5 }
 0x4c4   : > { %v1899_v4 = vpack.c.bf16 %v5608_v26, %v5605_v62  ;;  %v2394_v26 = vsub.s32 2, %v7432_v23 }
 0x4c6   : > { %v5609_v3 = vpop.f32.mrb[96].mxu1  ;;  %6360 = vmatmul.mubr.msk.bf16.gmra.mrb[76].mxu0 %vm1204_vm1, %v1899_v4  ;;  %v7831_v4 = vld [vmem:[%s8515_s8] sm:$0xff] }
 0x4c7   : > { %v5610_v18 = vpop.f32.mrb[97].mxu1 }
 0x4c8   : > { %v5611_v17 = vadd.f32 %v5610_v18, %v5609_v3  ;;  %v5612_v22 = vpop.f32.mrb[98].mxu1  ;;  %v7834_v3 = vrot.slane %v7831_v4, %v2394_v26 }
 0x4c9   : > { %v5613_v27 = vpop.f32.mrb[99].mxu1 }
 0x4ca   : > { %v5614_v28 = vadd.f32 %v5613_v27, %v5612_v22 }
 0x4cc   : > { %v1900_v29 = vpack.c.bf16 %v5614_v28, %v5611_v17 }
 0x4ce   : > { %v5615_v30 = vpop.f32.mrb[100].mxu1  ;;  %6363 = vmatprep.mubr.msk.bf16.mxu0 %vm1204_vm1, %v1900_v29 }
 0x4cf   : > { %v5616_v31 = vpop.f32.mrb[101].mxu1 }
 0x4d0   : > { %v5617_v32 = vadd.f32 %v5616_v31, %v5615_v30  ;;  %v5618_v33 = vpop.f32.mrb[102].mxu1 }
 0x4d1   : > { %v5619_v34 = vpop.f32.mrb[103].mxu1 }
 0x4d2   : > { %v5620_v35 = vadd.f32 %v5619_v34, %v5618_v33 }
 0x4d4   : > { %v1901_v36 = vpack.c.bf16 %v5620_v35, %v5617_v32 }
 0x4d6   : > { %v5621_v37 = vpop.f32.mrb[104].mxu1  ;;  %6364 = vmatmul.mubr.msk.bf16.gmra.mrb[80].mxu0 %vm1204_vm1, %v1901_v36 }
 0x4d7   : > { %v5622_v38 = vpop.f32.mrb[105].mxu1 }
 0x4d8   : > { %v5623_v41 = vadd.f32 %v5622_v38, %v5621_v37  ;;  %v5624_v42 = vpop.f32.mrb[106].mxu1 }
 0x4d9   : > { %v5625_v43 = vpop.f32.mrb[107].mxu1 }
 0x4da   : > { %v5626_v45 = vadd.f32 %v5625_v43, %v5624_v42 }
 0x4dc   : > { %v1902_v46 = vpack.c.bf16 %v5626_v45, %v5623_v41 }
 0x4de   : > { %v5627_v49 = vpop.f32.mrb[108].mxu1  ;;  %6367 = vmatprep.mubr.msk.bf16.mxu0 %vm1204_vm1, %v1902_v46 }
 0x4df   : > { %v5628_v50 = vpop.f32.mrb[109].mxu1 }
 0x4e0   : > { %v5629_v52 = vadd.f32 %v5628_v50, %v5627_v49  ;;  %v5630_v55 = vpop.f32.mrb[110].mxu1 }
 0x4e1   : > { %v5631_v56 = vpop.f32.mrb[111].mxu1 }
 0x4e2   : > { %v5632_v57 = vadd.f32 %v5631_v56, %v5630_v55 }
 0x4e4   : > { %v1903_v58 = vpack.c.bf16 %v5632_v57, %v5629_v52 }
 0x4e6   : > { %v5633_v47 = vpop.f32.mrb[112].mxu1  ;;  %6368 = vmatmul.mubr.msk.bf16.gmra.mrb[84].mxu0 %vm1204_vm1, %v1903_v58 }
 0x4e7   : > { %v5634_v2 = vpop.f32.mrb[113].mxu1 }
 0x4e8   : > { %v5635_v48 = vadd.f32 %v5634_v2, %v5633_v47  ;;  %v5636_v51 = vpop.f32.mrb[114].mxu1 }
 0x4e9   : > { %v5637_v0 = vpop.f32.mrb[115].mxu1 }
 0x4ea   : > { %v5638_v1 = vadd.f32 %v5637_v0, %v5636_v51 }
 0x4ec   : > { %v1904_v8 = vpack.c.bf16 %v5638_v1, %v5635_v48 }
 0x4ee   : > { %v5639_v9 = vpop.f32.mrb[116].mxu1  ;;  %6371 = vmatprep.mubr.msk.bf16.mxu0 %vm1204_vm1, %v1904_v8 }
 0x4ef   : > { %v5640_v21 = vpop.f32.mrb[117].mxu1 }
 0x4f0   : > { %v5641_v10 = vadd.f32 %v5640_v21, %v5639_v9  ;;  %v5642_v16 = vpop.f32.mrb[118].mxu1 }
 0x4f1   : > { %v5643_v11 = vpop.f32.mrb[119].mxu1 }
 0x4f2   : > { %v5644_v53 = vadd.f32 %v5643_v11, %v5642_v16 }
 0x4f4   : > { %v1905_v12 = vpack.c.bf16 %v5644_v53, %v5641_v10 }
 0x4f6   : > { %v5645_v15 = vpop.f32.mrb[120].mxu1  ;;  %6372 = vmatmul.mubr.msk.bf16.gmra.mrb[88].mxu0 %vm1204_vm1, %v1905_v12 }
 0x4f7   : > { %v5646_v13 = vpop.f32.mrb[121].mxu1 }
 0x4f8   : > { %v5647_v14 = vadd.f32 %v5646_v13, %v5645_v15  ;;  %v5648_v19 = vpop.f32.mrb[122].mxu1 }
 0x4f9   : > { %v5649_v59 = vpop.f32.mrb[123].mxu1 }
 0x4fa   : > { %v5650_v40 = vadd.f32 %v5649_v59, %v5648_v19 }
 0x4fc   : > { %v1906_v60 = vpack.c.bf16 %v5650_v40, %v5647_v14 }
 0x4fe   : > { %v5651_v25 = vpop.f32.mrb[124].mxu1  ;;  %6375 = vmatprep.mubr.msk.bf16.mxu0 %vm1204_vm1, %v1906_v60 }
 0x4ff   : > { %v5652_v61 = vpop.f32.mrb[125].mxu1 }
 0x500   : > { %v5653_v39 = vadd.f32 %v5652_v61, %v5651_v25  ;;  %v5654_v6 = vpop.f32.mrb[126].mxu1 }
 0x501   : > { %v5655_v62 = vpop.f32.mrb[127].mxu1 }
 0x502   : > { %v5656_v5 = vadd.f32 %v5655_v62, %v5654_v6 }
 0x504   : > { %v1907_v63 = vpack.c.bf16 %v5656_v5, %v5653_v39 }
 0x506   : > { %6376 = vmatmul.mubr.msk.bf16.gmra.mrb[92].mxu0 %vm1204_vm1, %v1907_v63 }
 0x569   : > { %v6349_v18 = vpop.f32.mrb[64].mxu0 }
 0x56a   : > { %v2398_v17 = vadd.f32 %v6349_v18, %v7834_v3  ;;  %v2265_v22 = vpop.f32.mrb[65].mxu0 }
 0x56b   : > { %v2396_v27 = vadd.f32 %v7834_v3, %v2265_v22  ;;  %v6350_v28 = vpop.f32.mrb[66].mxu0 }
 0x56c   : > { %v2399_v29 = vadd.f32 %v6350_v28, %v7834_v3  ;;  %v2268_v30 = vpop.f32.mrb[67].mxu0  ;;  %v2430_v32 = vmax.f32 %v2398_v17, 0.0 }
 0x56d   : > { %v2397_v31 = vadd.f32 %v7834_v3, %v2268_v30  ;;  %v2428_v34 = vmax.f32 %v2396_v27, 0.0 }
 0x56e   : > { %v2431_v33 = vmax.f32 %v2399_v29, 0.0 }
 0x56f   : > { %v2429_v35 = vmax.f32 %v2397_v31, 0.0 }
 0x570   : > { %v7840_v36 = vpack.c.bf16 %v2431_v33, %v2430_v32 }
 0x571   : > { %v7842_v37 = vpack.c.bf16 %v2429_v35, %v2428_v34 }
 0x573   : > { %6387 = vmatprep.mubr.msk.bf16.mxu0 %vm1204_vm1, %v7842_v37 }
 0x574   : > { %6388 = vmatmul.mubr.msk.bf16.vlgmr.msra.gmra.mrb[96].mxu0 %vm1204_vm1, %v7840_v36 }
 0x579   : > { %v6353_v38 = vpop.f32.mrb[68].mxu0 }
 0x57a   : > { %v2402_v41 = vadd.f32 %v6353_v38, %v7834_v3  ;;  %v2281_v42 = vpop.f32.mrb[69].mxu0 }
 0x57b   : > { %v2400_v43 = vadd.f32 %v7834_v3, %v2281_v42  ;;  %v6354_v45 = vpop.f32.mrb[70].mxu0 }
 0x57c   : > { %v2403_v46 = vadd.f32 %v6354_v45, %v7834_v3  ;;  %v2284_v49 = vpop.f32.mrb[71].mxu0  ;;  %v2434_v52 = vmax.f32 %v2402_v41, 0.0 }
 0x57d   : > { %v2401_v50 = vadd.f32 %v7834_v3, %v2284_v49  ;;  %v2432_v56 = vmax.f32 %v2400_v43, 0.0 }
 0x57e   : > { %v2435_v55 = vmax.f32 %v2403_v46, 0.0 }
 0x57f   : > { %v2433_v57 = vmax.f32 %v2401_v50, 0.0 }
 0x580   : > { %v7852_v58 = vpack.c.bf16 %v2435_v55, %v2434_v52 }
 0x581   : > { %v7854_v47 = vpack.c.bf16 %v2433_v57, %v2432_v56 }
 0x583   : > { %6391 = vmatprep.mubr.msk.bf16.mxu0 %vm1204_vm1, %v7854_v47 }
 0x584   : > { %6392 = vmatmul.mubr.msk.bf16.gmra.mrb[100].mxu0 %vm1204_vm1, %v7852_v58 }
 0x589   : > { %v6357_v2 = vpop.f32.mrb[72].mxu0 }
 0x58a   : > { %v2406_v48 = vadd.f32 %v6357_v2, %v7834_v3  ;;  %v2297_v51 = vpop.f32.mrb[73].mxu0 }
 0x58b   : > { %v2404_v0 = vadd.f32 %v7834_v3, %v2297_v51  ;;  %v6358_v1 = vpop.f32.mrb[74].mxu0 }
 0x58c   : > { %v2407_v7 = vadd.f32 %v6358_v1, %v7834_v3  ;;  %v2300_v8 = vpop.f32.mrb[75].mxu0  ;;  %v2438_v54 = vmax.f32 %v2406_v48, 0.0 }
 0x58d   : > { %v2405_v9 = vadd.f32 %v7834_v3, %v2300_v8  ;;  %v2436_v10 = vmax.f32 %v2404_v0, 0.0 }
 0x58e   : > { %v2439_v21 = vmax.f32 %v2407_v7, 0.0 }
 0x58f   : > { %v2437_v16 = vmax.f32 %v2405_v9, 0.0 }
 0x590   : > { %v7864_v11 = vpack.c.bf16 %v2439_v21, %v2438_v54 }
 0x591   : > { %v7866_v53 = vpack.c.bf16 %v2437_v16, %v2436_v10 }
 0x593   : > { %6395 = vmatprep.mubr.msk.bf16.mxu0 %vm1204_vm1, %v7866_v53 }
 0x594   : > { %6396 = vmatmul.mubr.msk.bf16.gmra.mrb[104].mxu0 %vm1204_vm1, %v7864_v11 }
 0x599   : > { %v6361_v12 = vpop.f32.mrb[76].mxu0 }
 0x59a   : > { %v2410_v15 = vadd.f32 %v6361_v12, %v7834_v3  ;;  %v2313_v13 = vpop.f32.mrb[77].mxu0 }
 0x59b   : > { %v2408_v14 = vadd.f32 %v7834_v3, %v2313_v13  ;;  %v6362_v19 = vpop.f32.mrb[78].mxu0 }
 0x59c   : > { %v2411_v59 = vadd.f32 %v6362_v19, %v7834_v3  ;;  %v2316_v40 = vpop.f32.mrb[79].mxu0  ;;  %v2442_v25 = vmax.f32 %v2410_v15, 0.0 }
 0x59d   : > { %v2409_v60 = vadd.f32 %v7834_v3, %v2316_v40  ;;  %v2440_v39 = vmax.f32 %v2408_v14, 0.0 }
 0x59e   : > { %v2443_v61 = vmax.f32 %v2411_v59, 0.0 }
 0x59f   : > { %v2441_v6 = vmax.f32 %v2409_v60, 0.0 }
 0x5a0   : > { %v7876_v62 = vpack.c.bf16 %v2443_v61, %v2442_v25 }
 0x5a1   : > { %v7878_v5 = vpack.c.bf16 %v2441_v6, %v2440_v39 }
 0x5a3   : > { %6399 = vmatprep.mubr.msk.bf16.mxu0 %vm1204_vm1, %v7878_v5 }
 0x5a4   : > { %6400 = vmatmul.mubr.msk.bf16.gmra.mrb[108].mxu0 %vm1204_vm1, %v7876_v62 }
 0x5a9   : > { %v6365_v63 = vpop.f32.mrb[80].mxu0 }
 0x5aa   : > { %v2414_v26 = vadd.f32 %v6365_v63, %v7834_v3  ;;  %v2329_v18 = vpop.f32.mrb[81].mxu0  ;;  %v7921_v63 = vld [vmem:[%s7377_s19 + $0x14] ss:$8 sps:$4 sm:$0xff]  }
 0x5ab   : > { %v2412_v17 = vadd.f32 %v7834_v3, %v2329_v18  ;;  %v6366_v22 = vpop.f32.mrb[82].mxu0  ;;  %v7937_v18 = vld [vmem:[%s7377_s19 + $0x34] ss:$8 sps:$4 sm:$0xff]  }
 0x5ac   : > { %v2415_v27 = vadd.f32 %v6366_v22, %v7834_v3  ;;  %v2332_v28 = vpop.f32.mrb[83].mxu0  ;;  %v2446_v30 = vmax.f32 %v2414_v26, 0.0  ;;  %v7925_v26 = vld [vmem:[%s7377_s19 + $0x10] ss:$8 sps:$4 sm:$0xff]   ;;  %v7945_v22 = vld [vmem:[%s7377_s19 + $0x44] ss:$8 sps:$4 sm:$0xff]  }
 0x5ad   : > { %v2413_v29 = vadd.f32 %v7834_v3, %v2332_v28  ;;  %v2444_v32 = vmax.f32 %v2412_v17, 0.0  ;;  %v7941_v17 = vld [vmem:[%s7377_s19 + $0x30] ss:$8 sps:$4 sm:$0xff]   ;;  %v7953_v28 = vld [vmem:[%s7377_s19 + $0x54] ss:$8 sps:$4 sm:$0xff]  }
 0x5ae   : > { %v2447_v31 = vmax.f32 %v2415_v27, 0.0  ;;  %v7949_v27 = vld [vmem:[%s7377_s19 + $0x40] ss:$8 sps:$4 sm:$0xff]  }
 0x5af   : > { %v2445_v33 = vmax.f32 %v2413_v29, 0.0  ;;  %v7957_v29 = vld [vmem:[%s7377_s19 + $0x50] ss:$8 sps:$4 sm:$0xff]  }
 0x5b0   : > { %v2469_v34 = vpack.c.bf16 %v2447_v31, %v2446_v30  ;;  %v7961_v30 = vld [vmem:[%s7377_s19 + $0x64] ss:$8 sps:$4 sm:$0xff]   ;;  %v7965_v31 = vld [vmem:[%s7377_s19 + $0x60] ss:$8 sps:$4 sm:$0xff]  }
 0x5b1   : > { %v2468_v35 = vpack.c.bf16 %v2445_v33, %v2444_v32  ;;  %v7969_v32 = vld [vmem:[%s7377_s19 + $0x74] ss:$8 sps:$4 sm:$0xff]   ;;  %v7973_v33 = vld [vmem:[%s7377_s19 + $0x70] ss:$8 sps:$4 sm:$0xff]  }
 0x5b3   : > { %5697 = vmatprep.subr.bf16.mxu1 %v2468_v35  ;;  %6403 = vmatprep.mubr.msk.bf16.mxu0 %vm1204_vm1, %v2468_v35  ;;  %v7981_v35 = vld [vmem:[%s7377_s19 + $0x80] ss:$8 sps:$4 sm:$0xff]  }
 0x5b4   : > { %5698 = vmatpush3.bf16.msra.mxu1 %v7842_v37  ;;  %6404 = vmatmul.mubr.msk.bf16.gmra.mrb[112].mxu0 %vm1204_vm1, %v2469_v34 }
 0x5b5   : > { %5699 = vmatprep.subr.bf16.mxu1 %v2469_v34  ;;  %v7977_v34 = vld [vmem:[%s7377_s19 + $0x84] ss:$8 sps:$4 sm:$0xff]  }
 0x5b8   : > { %5700 = vmatpush3.bf16.msra.mxu1 %v7840_v36 }
 0x5b9   : > { %v6369_v38 = vpop.f32.mrb[84].mxu0 }
 0x5ba   : > { %v2418_v41 = vadd.f32 %v6369_v38, %v7834_v3  ;;  %v2345_v42 = vpop.f32.mrb[85].mxu0  ;;  %v7985_v38 = vld [vmem:[%s7377_s19 + $0x94] ss:$8 sps:$4 sm:$0xff]  }
 0x5bb   : > { %v2416_v43 = vadd.f32 %v7834_v3, %v2345_v42  ;;  %v6370_v45 = vpop.f32.mrb[86].mxu0  ;;  %v7993_v42 = vld [vmem:[%s7377_s19 + $0xa4] ss:$8 sps:$4 sm:$0xff]  }
 0x5bc   : > { %v2419_v46 = vadd.f32 %v6370_v45, %v7834_v3  ;;  %v2348_v49 = vpop.f32.mrb[87].mxu0  ;;  %v2450_v52 = vmax.f32 %v2418_v41, 0.0  ;;  %v7989_v41 = vld [vmem:[%s7377_s19 + $0x90] ss:$8 sps:$4 sm:$0xff]   ;;  %v8001_v45 = vld [vmem:[%s7377_s19 + $0xb4] ss:$8 sps:$4 sm:$0xff]  }
 0x5bd   : > { %v2417_v50 = vadd.f32 %v7834_v3, %v2348_v49  ;;  %v2448_v37 = vmax.f32 %v2416_v43, 0.0  ;;  %v7997_v43 = vld [vmem:[%s7377_s19 + $0xa0] ss:$8 sps:$4 sm:$0xff]  }
 0x5be   : > { %v2451_v55 = vmax.f32 %v2419_v46, 0.0  ;;  %v6951_v46 = vld [vmem:[%s8511_s4 + $0x40] sm:$0xff]   ;;  %v6952_v49 = vld [vmem:[%s8511_s4 + $0x48] sm:$0xff]  }
 0x5bf   : > { %v2449_v56 = vmax.f32 %v2417_v50, 0.0  ;;  %6419 = vmatprep.subr.bf16.mxu0 %v6951_v46  ;;  %v8011_v50 = vld [vmem:[%s7377_s19 + $0xb0] ss:$8 sps:$4 sm:$0xff]  }
 0x5c0   : > { %v2471_v57 = vpack.c.bf16 %v2451_v55, %v2450_v52  ;;  %6420 = vmatpush3.bf16.msra.mxu0 %v6951_v46  ;;  %v8015_v52 = vld [vmem:[%s7377_s19 + $0xc4] ss:$8 sps:$4 sm:$0xff]   ;;  %v6953_v55 = vld [vmem:[%s8511_s4 + $0x50] sm:$0xff]  }
 0x5c1   : > { %v2470_v2 = vpack.c.bf16 %v2449_v56, %v2448_v37  ;;  %6421 = vmatprep.subr.bf16.mxu0 %v6952_v49  ;;  %v6954_v37 = vld [vmem:[%s8511_s4 + $0x58] sm:$0xff]   ;;  %v8025_v56 = vld [vmem:[%s7377_s19 + $0xc0] ss:$8 sps:$4 sm:$0xff]  }
 0x5c3   : > { %5701 = vmatprep.subr.bf16.mxu1 %v2470_v2  ;;  %6407 = vmatprep.mubr.msk.bf16.mxu0 %vm1204_vm1, %v2470_v2  ;;  %v8033_v2 = vld [vmem:[%s7377_s19 + $0xd0] ss:$8 sps:$4 sm:$0xff]  }
 0x5c4   : > { %5702 = vmatpush3.bf16.msra.mxu1 %v7854_v47  ;;  %6408 = vmatmul.mubr.msk.bf16.gmra.mrb[116].mxu0 %vm1204_vm1, %v2471_v57 }
 0x5c5   : > { %5703 = vmatprep.subr.bf16.mxu1 %v2471_v57  ;;  %6422 = vmatpush3.bf16.msra.mxu0 %v6952_v49  ;;  %v8029_v57 = vld [vmem:[%s7377_s19 + $0xd4] ss:$8 sps:$4 sm:$0xff]  }
 0x5c6   : > { %6423 = vmatprep.subr.bf16.mxu0 %v6953_v55 }
 0x5c8   : > { %5704 = vmatpush3.bf16.msra.mxu1 %v7852_v58 }
 0x5c9   : > { %v6373_v36 = vpop.f32.mrb[88].mxu0  ;;  %6424 = vmatpush3.bf16.msra.mxu0 %v6953_v55 }
 0x5ca   : > { %v2422_v48 = vadd.f32 %v6373_v36, %v7834_v3  ;;  %v2361_v51 = vpop.f32.mrb[89].mxu0  ;;  %6425 = vmatprep.subr.bf16.mxu0 %v6954_v37  ;;  %v8037_v36 = vld [vmem:[%s7377_s19 + $0xe4] ss:$8 sps:$4 sm:$0xff]  }
 0x5cb   : > { %v2420_v0 = vadd.f32 %v7834_v3, %v2361_v51  ;;  %v6374_v1 = vpop.f32.mrb[90].mxu0  ;;  %v8045_v51 = vld [vmem:[%s7377_s19 + $0xf4] ss:$8 sps:$4 sm:$0xff]  }
 0x5cc   : > { %v2423_v7 = vadd.f32 %v6374_v1, %v7834_v3  ;;  %v2364_v8 = vpop.f32.mrb[91].mxu0  ;;  %v2454_v54 = vmax.f32 %v2422_v48, 0.0  ;;  %v8041_v48 = vld [vmem:[%s7377_s19 + $0xe0] ss:$8 sps:$4 sm:$0xff]  }
 0x5cd   : > { %v2421_v9 = vadd.f32 %v7834_v3, %v2364_v8  ;;  %v2452_v47 = vmax.f32 %v2420_v0, 0.0  ;;  %6426 = vmatpush3.bf16.msra.mxu0 %v6954_v37  ;;  %v8049_v0 = vld [vmem:[%s7377_s19 + $0xf0] ss:$8 sps:$4 sm:$0xff]  }
 0x5ce   : > { %v2455_v21 = vmax.f32 %v2423_v7, 0.0  ;;  %v6955_v7 = vld [vmem:[#allocation5 + $0x60] sm:$0xff]  }
 0x5cf   : > { %v2453_v10 = vmax.f32 %v2421_v9, 0.0  ;;  %6459 = vmatprep.subr.bf16.mxu0 %v6955_v7 }
 0x5d0   : > { %v2473_v16 = vpack.c.bf16 %v2455_v21, %v2454_v54 }
 0x5d1   : > { %v2472_v12 = vpack.c.bf16 %v2453_v10, %v2452_v47 }
 0x5d3   : > { %5705 = vmatprep.subr.bf16.mxu1 %v2472_v12  ;;  %6411 = vmatprep.mubr.msk.bf16.mxu0 %vm1204_vm1, %v2472_v12 }
 0x5d4   : > { %5706 = vmatpush3.bf16.msra.mxu1 %v7866_v53  ;;  %6412 = vmatmul.mubr.msk.bf16.gmra.mrb[120].mxu0 %vm1204_vm1, %v2473_v16 }
 0x5d5   : > { %5707 = vmatprep.subr.bf16.mxu1 %v2473_v16 }
 0x5d8   : > { %5708 = vmatpush3.bf16.msra.mxu1 %v7864_v11 }
 0x5d9   : > { %v6377_v58 = vpop.f32.mrb[92].mxu0 }
 0x5da   : > { %v2426_v15 = vadd.f32 %v6377_v58, %v7834_v3  ;;  %v2377_v13 = vpop.f32.mrb[93].mxu0 }
 0x5db   : > { %v2424_v14 = vadd.f32 %v7834_v3, %v2377_v13  ;;  %v6378_v19 = vpop.f32.mrb[94].mxu0 }
 0x5dc   : > { %v2427_v59 = vadd.f32 %v6378_v19, %v7834_v3  ;;  %v2380_v40 = vpop.f32.mrb[95].mxu0  ;;  %v2458_v53 = vmax.f32 %v2426_v15, 0.0 }
 0x5dd   : > { %v2425_v60 = vadd.f32 %v7834_v3, %v2380_v40  ;;  %v2456_v61 = vmax.f32 %v2424_v14, 0.0  ;;  %v7917_v3 = vld [vmem:[%s7377_s19] ss:$8 sps:$4 sm:$0xff]  }
 0x5de   : > { %v2459_v25 = vmax.f32 %v2427_v59, 0.0  ;;  %v6956_v59 = vld [vmem:[#allocation5 + $0x68] sm:$0xff]  }
 0x5df   : > { %v2457_v11 = vmax.f32 %v2425_v60, 0.0 }
 0x5e0   : > { %v2475_v39 = vpack.c.bf16 %v2459_v25, %v2458_v53 }
 0x5e1   : > { %v2474_v6 = vpack.c.bf16 %v2457_v11, %v2456_v61 }
 0x5e3   : > { %5709 = vmatprep.subr.bf16.mxu1 %v2474_v6  ;;  %6415 = vmatprep.mubr.msk.bf16.mxu0 %vm1204_vm1, %v2474_v6 }
 0x5e4   : > { %5710 = vmatpush3.bf16.msra.mxu1 %v7878_v5  ;;  %6416 = vmatmul.mubr.msk.bf16.gmra.mrb[124].mxu0 %vm1204_vm1, %v2475_v39  ;;  %v7929_v5 = vld [vmem:[%s7377_s19 + $0x24] ss:$8 sps:$4 sm:$0xff]  }
 0x5e5   : > { %5711 = vmatprep.subr.bf16.mxu1 %v2475_v39 }
 0x5e8   : > { %5712 = vmatpush3.bf16.msra.mxu1 %v7876_v62  ;;  %v7933_v62 = vld [vmem:[%s7377_s19 + $0x20] ss:$8 sps:$4 sm:$0xff]  }
 0x5eb   : > { %2509 = vmatmul.mubr.bf16.vlgmr.msra.gmra.mrb[128].mxu1 %v7917_v3 }
 0x5ec   : > { %2516 = vmatprep.mubr.bf16.mxu1 %v7921_v63 }
 0x5f3   : > { %2517 = vmatmul.mubr.bf16.gmra.mrb[132].mxu1 %v7925_v26 }
 0x5f4   : > { %2524 = vmatprep.mubr.bf16.mxu1 %v7929_v5 }
 0x5fb   : > { %2525 = vmatmul.mubr.bf16.gmra.mrb[136].mxu1 %v7933_v62 }
 0x5fc   : > { %2532 = vmatprep.mubr.bf16.mxu1 %v7937_v18 }
 0x603   : > { %2533 = vmatmul.mubr.bf16.gmra.mrb[140].mxu1 %v7941_v17 }
 0x604   : > { %2540 = vmatprep.mubr.bf16.mxu1 %v7945_v22 }
 0x60b   : > { %2541 = vmatmul.mubr.bf16.gmra.mrb[144].mxu1 %v7949_v27 }
 0x60c   : > { %2548 = vmatprep.mubr.bf16.mxu1 %v7953_v28 }
 0x613   : > { %2549 = vmatmul.mubr.bf16.gmra.mrb[148].mxu1 %v7957_v29 }
 0x614   : > { %2556 = vmatprep.mubr.bf16.mxu1 %v7961_v30 }
 0x61b   : > { %2557 = vmatmul.mubr.bf16.gmra.mrb[152].mxu1 %v7965_v31 }
 0x61c   : > { %2564 = vmatprep.mubr.bf16.mxu1 %v7969_v32 }
 0x623   : > { %2565 = vmatmul.mubr.bf16.gmra.mrb[156].mxu1 %v7973_v33 }
 0x624   : > { %2572 = vmatprep.mubr.bf16.mxu1 %v7977_v34 }
 0x62b   : > { %2573 = vmatmul.mubr.bf16.gmra.mrb[160].mxu1 %v7981_v35 }
 0x62c   : > { %2580 = vmatprep.mubr.bf16.mxu1 %v7985_v38 }
 0x633   : > { %2581 = vmatmul.mubr.bf16.gmra.mrb[164].mxu1 %v7989_v41 }
 0x634   : > { %2588 = vmatprep.mubr.bf16.mxu1 %v7993_v42 }
 0x63b   : > { %2589 = vmatmul.mubr.bf16.gmra.mrb[168].mxu1 %v7997_v43 }
 0x63c   : > { %2596 = vmatprep.mubr.bf16.mxu1 %v8001_v45 }
 0x643   : > { %2597 = vmatmul.mubr.bf16.gmra.mrb[172].mxu1 %v8011_v50 }
 0x644   : > { %2604 = vmatprep.mubr.bf16.mxu1 %v8015_v52 }
 0x64b   : > { %2605 = vmatmul.mubr.bf16.gmra.mrb[176].mxu1 %v8025_v56 }
 0x64c   : > { %2612 = vmatprep.mubr.bf16.mxu1 %v8029_v57 }
 0x653   : > { %2613 = vmatmul.mubr.bf16.gmra.mrb[180].mxu1 %v8033_v2 }
 0x654   : > { %2620 = vmatprep.mubr.bf16.mxu1 %v8037_v36 }
 0x65b   : > { %2621 = vmatmul.mubr.bf16.gmra.mrb[184].mxu1 %v8041_v48 }
 0x65c   : > { %2628 = vmatprep.mubr.bf16.mxu1 %v8045_v51 }
 0x663   : > { %2629 = vmatmul.mubr.bf16.gmra.mrb[188].mxu1 %v8049_v0 }
 0x664   : > { %3253 = vmatprep.mubr.bf16.mxu1 %v7808_v20 }
 0x6be   : > { %v5713_v1 = vpop.f32.mrb[128].mxu1 }
 0x6bf   : > { %v5714_v8 = vpop.f32.mrb[129].mxu1 }
 0x6c0   : > { %v5715_v9 = vadd.f32 %v5714_v8, %v5713_v1  ;;  %v5716_v54 = vpop.f32.mrb[130].mxu1 }
 0x6c1   : > { %v5717_v21 = vpop.f32.mrb[131].mxu1 }
 0x6c2   : > { %v5718_v47 = vadd.f32 %v5717_v21, %v5716_v54 }
 0x6c4   : > { %v2637_v10 = vpack.c.bf16 %v5718_v47, %v5715_v9 }
 0x6c6   : > { %v5719_v16 = vpop.f32.mrb[132].mxu1  ;;  %6427 = vmatprep.mubr.msk.bf16.mxu0 %vm1204_vm1, %v2637_v10 }
 0x6c7   : > { %v5720_v12 = vpop.f32.mrb[133].mxu1 }
 0x6c8   : > { %v5721_v58 = vadd.f32 %v5720_v12, %v5719_v16  ;;  %v5722_v15 = vpop.f32.mrb[134].mxu1 }
 0x6c9   : > { %v5723_v13 = vpop.f32.mrb[135].mxu1 }
 0x6ca   : > { %v5724_v14 = vadd.f32 %v5723_v13, %v5722_v15 }
 0x6cc   : > { %v2638_v19 = vpack.c.bf16 %v5724_v14, %v5721_v58 }
 0x6ce   : > { %v5725_v20 = vpop.f32.mrb[136].mxu1  ;;  %6428 = vmatmul.mubr.msk.bf16.vlgmr.msra.gmra.mrb[96].mxu0 %vm1204_vm1, %v2638_v19 }
 0x6cf   : > { %v5726_v40 = vpop.f32.mrb[137].mxu1  ;;  %6460 = vmatpush3.bf16.msra.mxu0 %v6955_v7 }
 0x6d0   : > { %v5727_v60 = vadd.f32 %v5726_v40, %v5725_v20  ;;  %v5728_v53 = vpop.f32.mrb[138].mxu1  ;;  %6461 = vmatprep.subr.bf16.mxu0 %v6956_v59 }
 0x6d1   : > { %v5729_v25 = vpop.f32.mrb[139].mxu1 }
 0x6d2   : > { %v5730_v61 = vadd.f32 %v5729_v25, %v5728_v53 }
 0x6d3   : > { %6462 = vmatpush3.bf16.msra.mxu0 %v6956_v59 }
 0x6d4   : > { %v2639_v11 = vpack.c.bf16 %v5730_v61, %v5727_v60 }
 0x6d6   : > { %v5731_v39 = vpop.f32.mrb[140].mxu1  ;;  %6431 = vmatprep.mubr.msk.bf16.mxu0 %vm1204_vm1, %v2639_v11 }
 0x6d7   : > { %v5732_v6 = vpop.f32.mrb[141].mxu1 }
 0x6d8   : > { %v5733_v46 = vadd.f32 %v5732_v6, %v5731_v39  ;;  %v5734_v49 = vpop.f32.mrb[142].mxu1 }
 0x6d9   : > { %v5735_v55 = vpop.f32.mrb[143].mxu1 }
 0x6da   : > { %v5736_v37 = vadd.f32 %v5735_v55, %v5734_v49 }
 0x6dc   : > { %v2640_v1 = vpack.c.bf16 %v5736_v37, %v5733_v46 }
 0x6de   : > { %v5737_v8 = vpop.f32.mrb[144].mxu1  ;;  %6432 = vmatmul.mubr.msk.bf16.gmra.mrb[100].mxu0 %vm1204_vm1, %v2640_v1 }
 0x6df   : > { %v5738_v7 = vpop.f32.mrb[145].mxu1 }
 0x6e0   : > { %v5739_v9 = vadd.f32 %v5738_v7, %v5737_v8  ;;  %v5740_v54 = vpop.f32.mrb[146].mxu1 }
 0x6e1   : > { %v5741_v21 = vpop.f32.mrb[147].mxu1 }
 0x6e2   : > { %v5742_v47 = vadd.f32 %v5741_v21, %v5740_v54 }
 0x6e4   : > { %v2641_v10 = vpack.c.bf16 %v5742_v47, %v5739_v9 }
 0x6e6   : > { %v5743_v16 = vpop.f32.mrb[148].mxu1  ;;  %6435 = vmatprep.mubr.msk.bf16.mxu0 %vm1204_vm1, %v2641_v10 }
 0x6e7   : > { %v5744_v12 = vpop.f32.mrb[149].mxu1 }
 0x6e8   : > { %v5745_v58 = vadd.f32 %v5744_v12, %v5743_v16  ;;  %v5746_v15 = vpop.f32.mrb[150].mxu1 }
 0x6e9   : > { %v5747_v13 = vpop.f32.mrb[151].mxu1 }
 0x6ea   : > { %v5748_v14 = vadd.f32 %v5747_v13, %v5746_v15 }
 0x6ec   : > { %v2642_v19 = vpack.c.bf16 %v5748_v14, %v5745_v58 }
 0x6ee   : > { %v5749_v59 = vpop.f32.mrb[152].mxu1  ;;  %6436 = vmatmul.mubr.msk.bf16.gmra.mrb[104].mxu0 %vm1204_vm1, %v2642_v19 }
 0x6ef   : > { %v5750_v20 = vpop.f32.mrb[153].mxu1 }
 0x6f0   : > { %v5751_v40 = vadd.f32 %v5750_v20, %v5749_v59  ;;  %v5752_v60 = vpop.f32.mrb[154].mxu1 }
 0x6f1   : > { %v5753_v53 = vpop.f32.mrb[155].mxu1 }
 0x6f2   : > { %v5754_v25 = vadd.f32 %v5753_v53, %v5752_v60 }
 0x6f4   : > { %v2643_v61 = vpack.c.bf16 %v5754_v25, %v5751_v40 }
 0x6f6   : > { %v5755_v11 = vpop.f32.mrb[156].mxu1  ;;  %6439 = vmatprep.mubr.msk.bf16.mxu0 %vm1204_vm1, %v2643_v61 }
 0x6f7   : > { %v5756_v39 = vpop.f32.mrb[157].mxu1 }
 0x6f8   : > { %v5757_v6 = vadd.f32 %v5756_v39, %v5755_v11  ;;  %v5758_v46 = vpop.f32.mrb[158].mxu1 }
 0x6f9   : > { %v5759_v49 = vpop.f32.mrb[159].mxu1 }
 0x6fa   : > { %v5760_v55 = vadd.f32 %v5759_v49, %v5758_v46 }
 0x6fc   : > { %v2644_v37 = vpack.c.bf16 %v5760_v55, %v5757_v6 }
 0x6fe   : > { %v5761_v1 = vpop.f32.mrb[160].mxu1  ;;  %6440 = vmatmul.mubr.msk.bf16.gmra.mrb[108].mxu0 %vm1204_vm1, %v2644_v37 }
 0x6ff   : > { %v5762_v8 = vpop.f32.mrb[161].mxu1 }
 0x700   : > { %v5763_v7 = vadd.f32 %v5762_v8, %v5761_v1  ;;  %v5764_v9 = vpop.f32.mrb[162].mxu1 }
 0x701   : > { %v5765_v54 = vpop.f32.mrb[163].mxu1 }
 0x702   : > { %v5766_v21 = vadd.f32 %v5765_v54, %v5764_v9 }
 0x704   : > { %v2645_v47 = vpack.c.bf16 %v5766_v21, %v5763_v7  ;;  %v6957_v21 = vld [vmem:[#allocation5 + $0x70] sm:$0xff]  }
 0x705   : > { %6463 = vmatprep.subr.bf16.mxu0 %v6957_v21 }
 0x706   : > { %v5767_v10 = vpop.f32.mrb[164].mxu1  ;;  %6443 = vmatprep.mubr.msk.bf16.mxu0 %vm1204_vm1, %v2645_v47  ;;  %6464 = vmatpush3.bf16.msra.mxu0 %v6957_v21 }
 0x707   : > { %v5768_v16 = vpop.f32.mrb[165].mxu1 }
 0x708   : > { %v5769_v12 = vadd.f32 %v5768_v16, %v5767_v10  ;;  %v5770_v58 = vpop.f32.mrb[166].mxu1  ;;  %v6958_v16 = vld [vmem:[#allocation5 + $0x78] sm:$0xff]  }
 0x709   : > { %v5771_v15 = vpop.f32.mrb[167].mxu1  ;;  %6465 = vmatprep.subr.bf16.mxu0 %v6958_v16 }
 0x70a   : > { %v5772_v13 = vadd.f32 %v5771_v15, %v5770_v58  ;;  %6466 = vmatpush3.bf16.msra.mxu0 %v6958_v16 }
 0x70c   : > { %v2646_v14 = vpack.c.bf16 %v5772_v13, %v5769_v12 }
 0x70e   : > { %v5773_v19 = vpop.f32.mrb[168].mxu1  ;;  %6444 = vmatmul.mubr.msk.bf16.gmra.mrb[112].mxu0 %vm1204_vm1, %v2646_v14 }
 0x70f   : > { %v5774_v59 = vpop.f32.mrb[169].mxu1 }
 0x710   : > { %v5775_v20 = vadd.f32 %v5774_v59, %v5773_v19  ;;  %v5776_v40 = vpop.f32.mrb[170].mxu1 }
 0x711   : > { %v5777_v60 = vpop.f32.mrb[171].mxu1 }
 0x712   : > { %v5778_v53 = vadd.f32 %v5777_v60, %v5776_v40 }
 0x714   : > { %v2647_v25 = vpack.c.bf16 %v5778_v53, %v5775_v20 }
 0x716   : > { %v5779_v61 = vpop.f32.mrb[172].mxu1  ;;  %6447 = vmatprep.mubr.msk.bf16.mxu0 %vm1204_vm1, %v2647_v25 }
 0x717   : > { %v5780_v11 = vpop.f32.mrb[173].mxu1 }
 0x718   : > { %v5781_v39 = vadd.f32 %v5780_v11, %v5779_v61  ;;  %v5782_v6 = vpop.f32.mrb[174].mxu1 }
 0x719   : > { %v5783_v46 = vpop.f32.mrb[175].mxu1 }
 0x71a   : > { %v5784_v49 = vadd.f32 %v5783_v46, %v5782_v6 }
 0x71c   : > { %v2648_v55 = vpack.c.bf16 %v5784_v49, %v5781_v39 }
 0x71e   : > { %v5785_v37 = vpop.f32.mrb[176].mxu1  ;;  %6448 = vmatmul.mubr.msk.bf16.gmra.mrb[116].mxu0 %vm1204_vm1, %v2648_v55 }
 0x71f   : > { %v5786_v1 = vpop.f32.mrb[177].mxu1 }
 0x720   : > { %v5787_v8 = vadd.f32 %v5786_v1, %v5785_v37  ;;  %v5788_v7 = vpop.f32.mrb[178].mxu1  ;;  %v3139_v1 = vsub.s32 3, %v7432_v23 }
 0x721   : > { %v5789_v9 = vpop.f32.mrb[179].mxu1 }
 0x722   : > { %v5790_v54 = vadd.f32 %v5789_v9, %v5788_v7 }
 0x724   : > { %v2649_v47 = vpack.c.bf16 %v5790_v54, %v5787_v8  ;;  %v8071_v8 = vrot.slane %v7831_v4, %v3139_v1 }
 0x726   : > { %v5791_v10 = vpop.f32.mrb[180].mxu1  ;;  %6451 = vmatprep.mubr.msk.bf16.mxu0 %vm1204_vm1, %v2649_v47 }
 0x727   : > { %v5792_v12 = vpop.f32.mrb[181].mxu1 }
 0x728   : > { %v5793_v58 = vadd.f32 %v5792_v12, %v5791_v10  ;;  %v5794_v15 = vpop.f32.mrb[182].mxu1 }
 0x729   : > { %v5795_v13 = vpop.f32.mrb[183].mxu1 }
 0x72a   : > { %v5796_v14 = vadd.f32 %v5795_v13, %v5794_v15 }
 0x72c   : > { %v2650_v19 = vpack.c.bf16 %v5796_v14, %v5793_v58 }
 0x72e   : > { %v5797_v59 = vpop.f32.mrb[184].mxu1  ;;  %6452 = vmatmul.mubr.msk.bf16.gmra.mrb[120].mxu0 %vm1204_vm1, %v2650_v19 }
 0x72f   : > { %v5798_v20 = vpop.f32.mrb[185].mxu1 }
 0x730   : > { %v5799_v40 = vadd.f32 %v5798_v20, %v5797_v59  ;;  %v5800_v60 = vpop.f32.mrb[186].mxu1 }
 0x731   : > { %v5801_v53 = vpop.f32.mrb[187].mxu1 }
 0x732   : > { %v5802_v25 = vadd.f32 %v5801_v53, %v5800_v60 }
 0x734   : > { %v2651_v61 = vpack.c.bf16 %v5802_v25, %v5799_v40 }
 0x736   : > { %v5803_v11 = vpop.f32.mrb[188].mxu1  ;;  %6455 = vmatprep.mubr.msk.bf16.mxu0 %vm1204_vm1, %v2651_v61 }
 0x737   : > { %v5804_v39 = vpop.f32.mrb[189].mxu1 }
 0x738   : > { %v5805_v6 = vadd.f32 %v5804_v39, %v5803_v11  ;;  %v5806_v46 = vpop.f32.mrb[190].mxu1 }
 0x739   : > { %v5807_v49 = vpop.f32.mrb[191].mxu1 }
 0x73a   : > { %v5808_v55 = vadd.f32 %v5807_v49, %v5806_v46 }
 0x73c   : > { %v2652_v37 = vpack.c.bf16 %v5808_v55, %v5805_v6 }
 0x73e   : > { %6456 = vmatmul.mubr.msk.bf16.gmra.mrb[124].mxu0 %vm1204_vm1, %v2652_v37 }
 0x7a1   : > { %v6429_v7 = vpop.f32.mrb[96].mxu0 }
 0x7a2   : > { %v3143_v9 = vadd.f32 %v6429_v7, %v8071_v8  ;;  %v3010_v54 = vpop.f32.mrb[97].mxu0 }
 0x7a3   : > { %v3141_v21 = vadd.f32 %v8071_v8, %v3010_v54  ;;  %v6430_v47 = vpop.f32.mrb[98].mxu0 }
 0x7a4   : > { %v3144_v10 = vadd.f32 %v6430_v47, %v8071_v8  ;;  %v3013_v16 = vpop.f32.mrb[99].mxu0  ;;  %v3175_v58 = vmax.f32 %v3143_v9, 0.0 }
 0x7a5   : > { %v3142_v12 = vadd.f32 %v8071_v8, %v3013_v16  ;;  %v3173_v13 = vmax.f32 %v3141_v21, 0.0 }
 0x7a6   : > { %v3176_v15 = vmax.f32 %v3144_v10, 0.0 }
 0x7a7   : > { %v3174_v14 = vmax.f32 %v3142_v12, 0.0 }
 0x7a8   : > { %v8077_v19 = vpack.c.bf16 %v3176_v15, %v3175_v58 }
 0x7a9   : > { %v8079_v4 = vpack.c.bf16 %v3174_v14, %v3173_v13 }
 0x7ab   : > { %6467 = vmatprep.mubr.msk.bf16.mxu0 %vm1204_vm1, %v8079_v4 }
 0x7ac   : > { %6468 = vmatmul.mubr.msk.bf16.vlgmr.msra.gmra.mrb[128].mxu0 %vm1204_vm1, %v8077_v19 }
 0x7b1   : > { %v6433_v59 = vpop.f32.mrb[100].mxu0 }
 0x7b2   : > { %v3147_v20 = vadd.f32 %v6433_v59, %v8071_v8  ;;  %v3026_v40 = vpop.f32.mrb[101].mxu0 }
 0x7b3   : > { %v3145_v60 = vadd.f32 %v8071_v8, %v3026_v40  ;;  %v6434_v53 = vpop.f32.mrb[102].mxu0 }
 0x7b4   : > { %v3148_v25 = vadd.f32 %v6434_v53, %v8071_v8  ;;  %v3029_v61 = vpop.f32.mrb[103].mxu0  ;;  %v3179_v39 = vmax.f32 %v3147_v20, 0.0 }
 0x7b5   : > { %v3146_v11 = vadd.f32 %v8071_v8, %v3029_v61  ;;  %v3177_v46 = vmax.f32 %v3145_v60, 0.0 }
 0x7b6   : > { %v3180_v6 = vmax.f32 %v3148_v25, 0.0 }
 0x7b7   : > { %v3178_v49 = vmax.f32 %v3146_v11, 0.0 }
 0x7b8   : > { %v8089_v55 = vpack.c.bf16 %v3180_v6, %v3179_v39 }
 0x7b9   : > { %v8091_v37 = vpack.c.bf16 %v3178_v49, %v3177_v46 }
 0x7bb   : > { %6471 = vmatprep.mubr.msk.bf16.mxu0 %vm1204_vm1, %v8091_v37 }
 0x7bc   : > { %6472 = vmatmul.mubr.msk.bf16.gmra.mrb[132].mxu0 %vm1204_vm1, %v8089_v55 }
 0x7c1   : > { %v6437_v1 = vpop.f32.mrb[104].mxu0 }
 0x7c2   : > { %v3151_v7 = vadd.f32 %v6437_v1, %v8071_v8  ;;  %v3042_v9 = vpop.f32.mrb[105].mxu0 }
 0x7c3   : > { %v3149_v54 = vadd.f32 %v8071_v8, %v3042_v9  ;;  %v6438_v21 = vpop.f32.mrb[106].mxu0 }
 0x7c4   : > { %v3152_v47 = vadd.f32 %v6438_v21, %v8071_v8  ;;  %v3045_v10 = vpop.f32.mrb[107].mxu0  ;;  %v3183_v12 = vmax.f32 %v3151_v7, 0.0 }
 0x7c5   : > { %v3150_v16 = vadd.f32 %v8071_v8, %v3045_v10  ;;  %v3181_v15 = vmax.f32 %v3149_v54, 0.0 }
 0x7c6   : > { %v3184_v58 = vmax.f32 %v3152_v47, 0.0 }
 0x7c7   : > { %v3182_v13 = vmax.f32 %v3150_v16, 0.0 }
 0x7c8   : > { %v8101_v14 = vpack.c.bf16 %v3184_v58, %v3183_v12 }
 0x7c9   : > { %v8103_v59 = vpack.c.bf16 %v3182_v13, %v3181_v15 }
 0x7cb   : > { %6475 = vmatprep.mubr.msk.bf16.mxu0 %vm1204_vm1, %v8103_v59 }
 0x7cc   : > { %6476 = vmatmul.mubr.msk.bf16.gmra.mrb[136].mxu0 %vm1204_vm1, %v8101_v14 }
 0x7d1   : > { %v6441_v20 = vpop.f32.mrb[108].mxu0 }
 0x7d2   : > { %v3155_v40 = vadd.f32 %v6441_v20, %v8071_v8  ;;  %v3058_v60 = vpop.f32.mrb[109].mxu0 }
 0x7d3   : > { %v3153_v53 = vadd.f32 %v8071_v8, %v3058_v60  ;;  %v6442_v25 = vpop.f32.mrb[110].mxu0 }
 0x7d4   : > { %v3156_v61 = vadd.f32 %v6442_v25, %v8071_v8  ;;  %v3061_v11 = vpop.f32.mrb[111].mxu0  ;;  %v3187_v6 = vmax.f32 %v3155_v40, 0.0 }
 0x7d5   : > { %v3154_v39 = vadd.f32 %v8071_v8, %v3061_v11  ;;  %v3185_v49 = vmax.f32 %v3153_v53, 0.0 }
 0x7d6   : > { %v3188_v46 = vmax.f32 %v3156_v61, 0.0 }
 0x7d7   : > { %v3186_v1 = vmax.f32 %v3154_v39, 0.0 }
 0x7d8   : > { %v8113_v7 = vpack.c.bf16 %v3188_v46, %v3187_v6 }
 0x7d9   : > { %v8115_v9 = vpack.c.bf16 %v3186_v1, %v3185_v49 }
 0x7db   : > { %6479 = vmatprep.mubr.msk.bf16.mxu0 %vm1204_vm1, %v8115_v9 }
 0x7dc   : > { %6480 = vmatmul.mubr.msk.bf16.gmra.mrb[140].mxu0 %vm1204_vm1, %v8113_v7 }
 0x7e1   : > { %v6445_v54 = vpop.f32.mrb[112].mxu0 }
 0x7e2   : > { %v3159_v21 = vadd.f32 %v6445_v54, %v8071_v8  ;;  %v3074_v47 = vpop.f32.mrb[113].mxu0 }
 0x7e3   : > { %v3157_v10 = vadd.f32 %v8071_v8, %v3074_v47  ;;  %v6446_v16 = vpop.f32.mrb[114].mxu0 }
 0x7e4   : > { %v3160_v12 = vadd.f32 %v6446_v16, %v8071_v8  ;;  %v3077_v58 = vpop.f32.mrb[115].mxu0  ;;  %v3191_v13 = vmax.f32 %v3159_v21, 0.0 }
 0x7e5   : > { %v3158_v15 = vadd.f32 %v8071_v8, %v3077_v58  ;;  %v3189_v40 = vmax.f32 %v3157_v10, 0.0 }
 0x7e6   : > { %v3192_v20 = vmax.f32 %v3160_v12, 0.0 }
 0x7e7   : > { %v3190_v60 = vmax.f32 %v3158_v15, 0.0 }
 0x7e8   : > { %v3214_v53 = vpack.c.bf16 %v3192_v20, %v3191_v13 }
 0x7e9   : > { %v3213_v25 = vpack.c.bf16 %v3190_v60, %v3189_v40 }
 0x7eb   : > { %5849 = vmatprep.subr.bf16.mxu1 %v3213_v25  ;;  %6483 = vmatprep.mubr.msk.bf16.mxu0 %vm1204_vm1, %v3213_v25 }
 0x7ec   : > { %5850 = vmatpush3.bf16.msra.mxu1 %v8079_v4  ;;  %6484 = vmatmul.mubr.msk.bf16.gmra.mrb[144].mxu0 %vm1204_vm1, %v3214_v53 }
 0x7ed   : > { %5851 = vmatprep.subr.bf16.mxu1 %v3214_v53 }
 0x7f0   : > { %5852 = vmatpush3.bf16.msra.mxu1 %v8077_v19 }
 0x7f1   : > { %v6449_v61 = vpop.f32.mrb[116].mxu0 }
 0x7f2   : > { %v3163_v11 = vadd.f32 %v6449_v61, %v8071_v8  ;;  %v3090_v39 = vpop.f32.mrb[117].mxu0 }
 0x7f3   : > { %v3161_v6 = vadd.f32 %v8071_v8, %v3090_v39  ;;  %v6450_v46 = vpop.f32.mrb[118].mxu0 }
 0x7f4   : > { %v3164_v49 = vadd.f32 %v6450_v46, %v8071_v8  ;;  %v3093_v1 = vpop.f32.mrb[119].mxu0  ;;  %v3195_v21 = vmax.f32 %v3163_v11, 0.0 }
 0x7f5   : > { %v3162_v54 = vadd.f32 %v8071_v8, %v3093_v1  ;;  %v3193_v4 = vmax.f32 %v3161_v6, 0.0 }
 0x7f6   : > { %v3196_v47 = vmax.f32 %v3164_v49, 0.0 }
 0x7f7   : > { %v3194_v10 = vmax.f32 %v3162_v54, 0.0 }
 0x7f8   : > { %v3216_v16 = vpack.c.bf16 %v3196_v47, %v3195_v21 }
 0x7f9   : > { %v3215_v12 = vpack.c.bf16 %v3194_v10, %v3193_v4 }
 0x7fb   : > { %5853 = vmatprep.subr.bf16.mxu1 %v3215_v12  ;;  %6487 = vmatprep.mubr.msk.bf16.mxu0 %vm1204_vm1, %v3215_v12 }
 0x7fc   : > { %5854 = vmatpush3.bf16.msra.mxu1 %v8091_v37  ;;  %6488 = vmatmul.mubr.msk.bf16.gmra.mrb[148].mxu0 %vm1204_vm1, %v3216_v16 }
 0x7fd   : > { %5855 = vmatprep.subr.bf16.mxu1 %v3216_v16 }
 0x800   : > { %5856 = vmatpush3.bf16.msra.mxu1 %v8089_v55 }
 0x801   : > { %v6453_v19 = vpop.f32.mrb[120].mxu0 }
 0x802   : > { %v3167_v58 = vadd.f32 %v6453_v19, %v8071_v8  ;;  %v3106_v15 = vpop.f32.mrb[121].mxu0 }
 0x803   : > { %v3165_v13 = vadd.f32 %v8071_v8, %v3106_v15  ;;  %v6454_v20 = vpop.f32.mrb[122].mxu0 }
 0x804   : > { %v3168_v40 = vadd.f32 %v6454_v20, %v8071_v8  ;;  %v3109_v60 = vpop.f32.mrb[123].mxu0  ;;  %v3199_v25 = vmax.f32 %v3167_v58, 0.0 }
 0x805   : > { %v3166_v53 = vadd.f32 %v8071_v8, %v3109_v60  ;;  %v3197_v37 = vmax.f32 %v3165_v13, 0.0 }
 0x806   : > { %v3200_v61 = vmax.f32 %v3168_v40, 0.0 }
 0x807   : > { %v3198_v11 = vmax.f32 %v3166_v53, 0.0 }
 0x808   : > { %v3218_v39 = vpack.c.bf16 %v3200_v61, %v3199_v25 }
 0x809   : > { %v3217_v6 = vpack.c.bf16 %v3198_v11, %v3197_v37 }
 0x80b   : > { %5857 = vmatprep.subr.bf16.mxu1 %v3217_v6  ;;  %6491 = vmatprep.mubr.msk.bf16.mxu0 %vm1204_vm1, %v3217_v6 }
 0x80c   : > { %5858 = vmatpush3.bf16.msra.mxu1 %v8103_v59  ;;  %6492 = vmatmul.mubr.msk.bf16.gmra.mrb[152].mxu0 %vm1204_vm1, %v3218_v39 }
 0x80d   : > { %5859 = vmatprep.subr.bf16.mxu1 %v3218_v39 }
 0x810   : > { %5860 = vmatpush3.bf16.msra.mxu1 %v8101_v14 }
 0x811   : > { %v6457_v55 = vpop.f32.mrb[124].mxu0 }
 0x812   : > { %v3171_v46 = vadd.f32 %v6457_v55, %v8071_v8  ;;  %v3122_v49 = vpop.f32.mrb[125].mxu0 }
 0x813   : > { %v3169_v1 = vadd.f32 %v8071_v8, %v3122_v49  ;;  %v6458_v54 = vpop.f32.mrb[126].mxu0 }
 0x814   : > { %v3172_v21 = vadd.f32 %v6458_v54, %v8071_v8  ;;  %v3125_v47 = vpop.f32.mrb[127].mxu0  ;;  %v3203_v10 = vmax.f32 %v3171_v46, 0.0 }
 0x815   : > { %v3170_v4 = vadd.f32 %v8071_v8, %v3125_v47  ;;  %v3201_v59 = vmax.f32 %v3169_v1, 0.0 }
 0x816   : > { %v3204_v16 = vmax.f32 %v3172_v21, 0.0 }
 0x817   : > { %v3202_v12 = vmax.f32 %v3170_v4, 0.0 }
 0x818   : > { %v3220_v19 = vpack.c.bf16 %v3204_v16, %v3203_v10 }
 0x819   : > { %v3219_v58 = vpack.c.bf16 %v3202_v12, %v3201_v59 }
 0x81b   : > { %5861 = vmatprep.subr.bf16.mxu1 %v3219_v58  ;;  %6495 = vmatprep.mubr.msk.bf16.mxu0 %vm1204_vm1, %v3219_v58 }
 0x81c   : > { %5862 = vmatpush3.bf16.msra.mxu1 %v8115_v9  ;;  %6496 = vmatmul.mubr.msk.bf16.gmra.mrb[156].mxu0 %vm1204_vm1, %v3220_v19 }
 0x81d   : > { %5863 = vmatprep.subr.bf16.mxu1 %v3220_v19 }
 0x820   : > { %5864 = vmatpush3.bf16.msra.mxu1 %v8113_v7 }
 0x823   : > { %3254 = vmatmul.mubr.bf16.vlgmr.msra.gmra.mrb[192].mxu1 %v7917_v3  ;;  %v6959_v3 = vld [vmem:[%s8511_s4 + $0x60] sm:$0xff]  }
 0x824   : > { %3261 = vmatprep.mubr.bf16.mxu1 %v7921_v63  ;;  %6499 = vmatprep.subr.bf16.mxu0 %v6959_v3  ;;  %v6960_v63 = vld [vmem:[%s8511_s4 + $0x68] sm:$0xff]  }
 0x825   : > { %6500 = vmatpush3.bf16.msra.mxu0 %v6959_v3 }
 0x826   : > { %6501 = vmatprep.subr.bf16.mxu0 %v6960_v63 }
 0x829   : > { %6502 = vmatpush3.bf16.msra.mxu0 %v6960_v63 }
 0x82b   : > { %3262 = vmatmul.mubr.bf16.gmra.mrb[196].mxu1 %v7925_v26  ;;  %v6961_v26 = vld [vmem:[%s8511_s4 + $0x70] sm:$0xff]  }
 0x82c   : > { %3269 = vmatprep.mubr.bf16.mxu1 %v7929_v5  ;;  %6503 = vmatprep.subr.bf16.mxu0 %v6961_v26  ;;  %v6962_v5 = vld [vmem:[%s8511_s4 + $0x78] sm:$0xff]  }
 0x82d   : > { %6504 = vmatpush3.bf16.msra.mxu0 %v6961_v26 }
 0x82e   : > { %6505 = vmatprep.subr.bf16.mxu0 %v6962_v5 }
 0x831   : > { %6506 = vmatpush3.bf16.msra.mxu0 %v6962_v5 }
 0x833   : > { %3270 = vmatmul.mubr.bf16.gmra.mrb[200].mxu1 %v7933_v62  ;;  %v7012_v62 = vld [vmem:[%s7377_s19 + $0x4] ss:$8 sps:$4 sm:$0xff]  }
 0x834   : > { %3277 = vmatprep.mubr.bf16.mxu1 %v7937_v18 }
 0x83b   : > { %3278 = vmatmul.mubr.bf16.gmra.mrb[204].mxu1 %v7941_v17  ;;  %v6963_v17 = vld [vmem:[#allocation5 + $0x80] sm:$0xff]  }
 0x83c   : > { %3285 = vmatprep.mubr.bf16.mxu1 %v7945_v22  ;;  %6539 = vmatprep.subr.bf16.mxu0 %v6963_v17 }
 0x843   : > { %3286 = vmatmul.mubr.bf16.gmra.mrb[208].mxu1 %v7949_v27 }
 0x844   : > { %3293 = vmatprep.mubr.bf16.mxu1 %v7953_v28 }
 0x84b   : > { %3294 = vmatmul.mubr.bf16.gmra.mrb[212].mxu1 %v7957_v29 }
 0x84c   : > { %3301 = vmatprep.mubr.bf16.mxu1 %v7961_v30 }
 0x853   : > { %3302 = vmatmul.mubr.bf16.gmra.mrb[216].mxu1 %v7965_v31 }
 0x854   : > { %3309 = vmatprep.mubr.bf16.mxu1 %v7969_v32 }
 0x85b   : > { %3310 = vmatmul.mubr.bf16.gmra.mrb[220].mxu1 %v7973_v33 }
 0x85c   : > { %3317 = vmatprep.mubr.bf16.mxu1 %v7977_v34 }
 0x863   : > { %3318 = vmatmul.mubr.bf16.gmra.mrb[224].mxu1 %v7981_v35 }
 0x864   : > { %3325 = vmatprep.mubr.bf16.mxu1 %v7985_v38 }
 0x86b   : > { %3326 = vmatmul.mubr.bf16.gmra.mrb[228].mxu1 %v7989_v41 }
 0x86c   : > { %3333 = vmatprep.mubr.bf16.mxu1 %v7993_v42 }
 0x873   : > { %3334 = vmatmul.mubr.bf16.gmra.mrb[232].mxu1 %v7997_v43  ;;  %v6964_v43 = vld [vmem:[#allocation5 + $0x88] sm:$0xff]  }
 0x874   : > { %3341 = vmatprep.mubr.bf16.mxu1 %v8001_v45 }
 0x87b   : > { %3342 = vmatmul.mubr.bf16.gmra.mrb[236].mxu1 %v8011_v50 }
 0x87c   : > { %3349 = vmatprep.mubr.bf16.mxu1 %v8015_v52 }
 0x883   : > { %3350 = vmatmul.mubr.bf16.gmra.mrb[240].mxu1 %v8025_v56 }
 0x884   : > { %3357 = vmatprep.mubr.bf16.mxu1 %v8029_v57 }
 0x88b   : > { %3358 = vmatmul.mubr.bf16.gmra.mrb[244].mxu1 %v8033_v2 }
 0x88c   : > { %3365 = vmatprep.mubr.bf16.mxu1 %v8037_v36 }
 0x893   : > { %3366 = vmatmul.mubr.bf16.gmra.mrb[248].mxu1 %v8041_v48 }
 0x894   : > { %3373 = vmatprep.mubr.bf16.mxu1 %v8045_v51 }
 0x89b   : > { %3374 = vmatmul.mubr.bf16.gmra.mrb[252].mxu1 %v8049_v0 }
 0x89c   : > { %3998 = vmatprep.mubr.bf16.mxu1 %v7012_v62 }
 0x8f6   : > { %v5865_v18 = vpop.f32.mrb[192].mxu1 }
 0x8f7   : > { %v5866_v22 = vpop.f32.mrb[193].mxu1 }
 0x8f8   : > { %v5867_v27 = vadd.f32 %v5866_v22, %v5865_v18  ;;  %v5868_v28 = vpop.f32.mrb[194].mxu1 }
 0x8f9   : > { %v5869_v29 = vpop.f32.mrb[195].mxu1 }
 0x8fa   : > { %v5870_v30 = vadd.f32 %v5869_v29, %v5868_v28 }
 0x8fc   : > { %v3382_v31 = vpack.c.bf16 %v5870_v30, %v5867_v27 }
 0x8fe   : > { %v5871_v32 = vpop.f32.mrb[196].mxu1  ;;  %6507 = vmatprep.mubr.msk.bf16.mxu0 %vm1204_vm1, %v3382_v31 }
 0x8ff   : > { %v5872_v33 = vpop.f32.mrb[197].mxu1 }
 0x900   : > { %v5873_v34 = vadd.f32 %v5872_v33, %v5871_v32  ;;  %v5874_v35 = vpop.f32.mrb[198].mxu1 }
 0x901   : > { %v5875_v38 = vpop.f32.mrb[199].mxu1 }
 0x902   : > { %v5876_v41 = vadd.f32 %v5875_v38, %v5874_v35 }
 0x904   : > { %v3383_v42 = vpack.c.bf16 %v5876_v41, %v5873_v34 }
 0x906   : > { %v5877_v45 = vpop.f32.mrb[200].mxu1  ;;  %6508 = vmatmul.mubr.msk.bf16.vlgmr.msra.gmra.mrb[128].mxu0 %vm1204_vm1, %v3383_v42 }
 0x907   : > { %v5878_v50 = vpop.f32.mrb[201].mxu1  ;;  %6540 = vmatpush3.bf16.msra.mxu0 %v6963_v17 }
 0x908   : > { %v5879_v52 = vadd.f32 %v5878_v50, %v5877_v45  ;;  %v5880_v56 = vpop.f32.mrb[202].mxu1  ;;  %6541 = vmatprep.subr.bf16.mxu0 %v6964_v43 }
 0x909   : > { %v5881_v57 = vpop.f32.mrb[203].mxu1 }
 0x90a   : > { %v5882_v2 = vadd.f32 %v5881_v57, %v5880_v56 }
 0x90b   : > { %6542 = vmatpush3.bf16.msra.mxu0 %v6964_v43 }
 0x90c   : > { %v3384_v36 = vpack.c.bf16 %v5882_v2, %v5879_v52 }
 0x90e   : > { %v5883_v48 = vpop.f32.mrb[204].mxu1  ;;  %6511 = vmatprep.mubr.msk.bf16.mxu0 %vm1204_vm1, %v3384_v36 }
 0x90f   : > { %v5884_v51 = vpop.f32.mrb[205].mxu1 }
 0x910   : > { %v5885_v0 = vadd.f32 %v5884_v51, %v5883_v48  ;;  %v5886_v8 = vpop.f32.mrb[206].mxu1 }
 0x911   : > { %v5887_v14 = vpop.f32.mrb[207].mxu1 }
 0x912   : > { %v5888_v7 = vadd.f32 %v5887_v14, %v5886_v8 }
 0x914   : > { %v3385_v9 = vpack.c.bf16 %v5888_v7, %v5885_v0 }
 0x916   : > { %v5889_v15 = vpop.f32.mrb[208].mxu1  ;;  %6512 = vmatmul.mubr.msk.bf16.gmra.mrb[132].mxu0 %vm1204_vm1, %v3385_v9 }
 0x917   : > { %v5890_v13 = vpop.f32.mrb[209].mxu1 }
 0x918   : > { %v5891_v20 = vadd.f32 %v5890_v13, %v5889_v15  ;;  %v5892_v40 = vpop.f32.mrb[210].mxu1  ;;  %v6965_v13 = vld [vmem:[#allocation5 + $0x90] sm:$0xff]  }
 0x919   : > { %v5893_v60 = vpop.f32.mrb[211].mxu1  ;;  %6543 = vmatprep.subr.bf16.mxu0 %v6965_v13 }
 0x91a   : > { %v5894_v53 = vadd.f32 %v5893_v60, %v5892_v40  ;;  %6544 = vmatpush3.bf16.msra.mxu0 %v6965_v13  ;;  %v6966_v60 = vld [vmem:[#allocation5 + $0x98] sm:$0xff]  }
 0x91b   : > { %6545 = vmatprep.subr.bf16.mxu0 %v6966_v60 }
 0x91c   : > { %v3386_v25 = vpack.c.bf16 %v5894_v53, %v5891_v20 }
 0x91e   : > { %v5895_v61 = vpop.f32.mrb[212].mxu1  ;;  %6515 = vmatprep.mubr.msk.bf16.mxu0 %vm1204_vm1, %v3386_v25  ;;  %6546 = vmatpush3.bf16.msra.mxu0 %v6966_v60 }
 0x91f   : > { %v5896_v37 = vpop.f32.mrb[213].mxu1 }
 0x920   : > { %v5897_v11 = vadd.f32 %v5896_v37, %v5895_v61  ;;  %v5898_v39 = vpop.f32.mrb[214].mxu1 }
 0x921   : > { %v5899_v6 = vpop.f32.mrb[215].mxu1 }
 0x922   : > { %v5900_v55 = vadd.f32 %v5899_v6, %v5898_v39 }
 0x924   : > { %v3387_v46 = vpack.c.bf16 %v5900_v55, %v5897_v11 }
 0x926   : > { %v5901_v49 = vpop.f32.mrb[216].mxu1  ;;  %6516 = vmatmul.mubr.msk.bf16.gmra.mrb[136].mxu0 %vm1204_vm1, %v3387_v46 }
 0x927   : > { %v5902_v1 = vpop.f32.mrb[217].mxu1 }
 0x928   : > { %v5903_v54 = vadd.f32 %v5902_v1, %v5901_v49  ;;  %v5904_v21 = vpop.f32.mrb[218].mxu1 }
 0x929   : > { %v5905_v47 = vpop.f32.mrb[219].mxu1 }
 0x92a   : > { %v5906_v4 = vadd.f32 %v5905_v47, %v5904_v21 }
 0x92c   : > { %v3388_v10 = vpack.c.bf16 %v5906_v4, %v5903_v54 }
 0x92e   : > { %v5907_v16 = vpop.f32.mrb[220].mxu1  ;;  %6519 = vmatprep.mubr.msk.bf16.mxu0 %vm1204_vm1, %v3388_v10 }
 0x92f   : > { %v5908_v59 = vpop.f32.mrb[221].mxu1 }
 0x930   : > { %v5909_v12 = vadd.f32 %v5908_v59, %v5907_v16  ;;  %v5910_v19 = vpop.f32.mrb[222].mxu1 }
 0x931   : > { %v5911_v58 = vpop.f32.mrb[223].mxu1 }
 0x932   : > { %v5912_v3 = vadd.f32 %v5911_v58, %v5910_v19  ;;  %v3884_v58 = vsub.s32 4, %v7432_v23 }
 0x934   : > { %v3389_v63 = vpack.c.bf16 %v5912_v3, %v5909_v12  ;;  %v8217_v3 = vld [vmem:[%s8515_s8] sm:$0xff] }
 0x936   : > { %v5913_v26 = vpop.f32.mrb[224].mxu1  ;;  %6520 = vmatmul.mubr.msk.bf16.gmra.mrb[140].mxu0 %vm1204_vm1, %v3389_v63  ;;  %v8220_v63 = vrot.slane %v8217_v3, %v3884_v58 }
 0x937   : > { %v5914_v5 = vpop.f32.mrb[225].mxu1 }
 0x938   : > { %v5915_v62 = vadd.f32 %v5914_v5, %v5913_v26  ;;  %v5916_v18 = vpop.f32.mrb[226].mxu1 }
 0x939   : > { %v5917_v17 = vpop.f32.mrb[227].mxu1 }
 0x93a   : > { %v5918_v22 = vadd.f32 %v5917_v17, %v5916_v18 }
 0x93c   : > { %v3390_v27 = vpack.c.bf16 %v5918_v22, %v5915_v62 }
 0x93e   : > { %v5919_v28 = vpop.f32.mrb[228].mxu1  ;;  %6523 = vmatprep.mubr.msk.bf16.mxu0 %vm1204_vm1, %v3390_v27 }
 0x93f   : > { %v5920_v29 = vpop.f32.mrb[229].mxu1 }
 0x940   : > { %v5921_v30 = vadd.f32 %v5920_v29, %v5919_v28  ;;  %v5922_v31 = vpop.f32.mrb[230].mxu1 }
 0x941   : > { %v5923_v32 = vpop.f32.mrb[231].mxu1 }
 0x942   : > { %v5924_v33 = vadd.f32 %v5923_v32, %v5922_v31 }
 0x944   : > { %v3391_v34 = vpack.c.bf16 %v5924_v33, %v5921_v30 }
 0x946   : > { %v5925_v35 = vpop.f32.mrb[232].mxu1  ;;  %6524 = vmatmul.mubr.msk.bf16.gmra.mrb[144].mxu0 %vm1204_vm1, %v3391_v34 }
 0x947   : > { %v5926_v38 = vpop.f32.mrb[233].mxu1 }
 0x948   : > { %v5927_v41 = vadd.f32 %v5926_v38, %v5925_v35  ;;  %v5928_v42 = vpop.f32.mrb[234].mxu1 }
 0x949   : > { %v5929_v43 = vpop.f32.mrb[235].mxu1 }
 0x94a   : > { %v5930_v45 = vadd.f32 %v5929_v43, %v5928_v42 }
 0x94c   : > { %v3392_v50 = vpack.c.bf16 %v5930_v45, %v5927_v41 }
 0x94e   : > { %v5931_v52 = vpop.f32.mrb[236].mxu1  ;;  %6527 = vmatprep.mubr.msk.bf16.mxu0 %vm1204_vm1, %v3392_v50 }
 0x94f   : > { %v5932_v56 = vpop.f32.mrb[237].mxu1 }
 0x950   : > { %v5933_v57 = vadd.f32 %v5932_v56, %v5931_v52  ;;  %v5934_v2 = vpop.f32.mrb[238].mxu1 }
 0x951   : > { %v5935_v36 = vpop.f32.mrb[239].mxu1 }
 0x952   : > { %v5936_v48 = vadd.f32 %v5935_v36, %v5934_v2 }
 0x954   : > { %v3393_v51 = vpack.c.bf16 %v5936_v48, %v5933_v57 }
 0x956   : > { %v5937_v0 = vpop.f32.mrb[240].mxu1  ;;  %6528 = vmatmul.mubr.msk.bf16.gmra.mrb[148].mxu0 %vm1204_vm1, %v3393_v51 }
 0x957   : > { %v5938_v8 = vpop.f32.mrb[241].mxu1 }
 0x958   : > { %v5939_v14 = vadd.f32 %v5938_v8, %v5937_v0  ;;  %v5940_v7 = vpop.f32.mrb[242].mxu1 }
 0x959   : > { %v5941_v9 = vpop.f32.mrb[243].mxu1 }
 0x95a   : > { %v5942_v15 = vadd.f32 %v5941_v9, %v5940_v7 }
 0x95c   : > { %v3394_v20 = vpack.c.bf16 %v5942_v15, %v5939_v14 }
 0x95e   : > { %v5943_v40 = vpop.f32.mrb[244].mxu1  ;;  %6531 = vmatprep.mubr.msk.bf16.mxu0 %vm1204_vm1, %v3394_v20 }
 0x95f   : > { %v5944_v53 = vpop.f32.mrb[245].mxu1 }
 0x960   : > { %v5945_v25 = vadd.f32 %v5944_v53, %v5943_v40  ;;  %v5946_v61 = vpop.f32.mrb[246].mxu1 }
 0x961   : > { %v5947_v37 = vpop.f32.mrb[247].mxu1 }
 0x962   : > { %v5948_v11 = vadd.f32 %v5947_v37, %v5946_v61 }
 0x964   : > { %v3395_v39 = vpack.c.bf16 %v5948_v11, %v5945_v25 }
 0x966   : > { %v5949_v6 = vpop.f32.mrb[248].mxu1  ;;  %6532 = vmatmul.mubr.msk.bf16.gmra.mrb[152].mxu0 %vm1204_vm1, %v3395_v39 }
 0x967   : > { %v5950_v55 = vpop.f32.mrb[249].mxu1 }
 0x968   : > { %v5951_v46 = vadd.f32 %v5950_v55, %v5949_v6  ;;  %v5952_v49 = vpop.f32.mrb[250].mxu1 }
 0x969   : > { %v5953_v1 = vpop.f32.mrb[251].mxu1 }
 0x96a   : > { %v5954_v54 = vadd.f32 %v5953_v1, %v5952_v49 }
 0x96c   : > { %v3396_v21 = vpack.c.bf16 %v5954_v54, %v5951_v46 }
 0x96e   : > { %v5955_v47 = vpop.f32.mrb[252].mxu1  ;;  %6535 = vmatprep.mubr.msk.bf16.mxu0 %vm1204_vm1, %v3396_v21 }
 0x96f   : > { %v5956_v4 = vpop.f32.mrb[253].mxu1 }
 0x970   : > { %v5957_v10 = vadd.f32 %v5956_v4, %v5955_v47  ;;  %v5958_v16 = vpop.f32.mrb[254].mxu1 }
 0x971   : > { %v5959_v59 = vpop.f32.mrb[255].mxu1 }
 0x972   : > { %v5960_v12 = vadd.f32 %v5959_v59, %v5958_v16 }
 0x974   : > { %v3397_v19 = vpack.c.bf16 %v5960_v12, %v5957_v10 }
 0x976   : > { %6536 = vmatmul.mubr.msk.bf16.gmra.mrb[156].mxu0 %vm1204_vm1, %v3397_v19 }
 0x9d9   : > { %v6509_v26 = vpop.f32.mrb[128].mxu0 }
 0x9da   : > { %v3888_v5 = vadd.f32 %v6509_v26, %v8220_v63  ;;  %v3755_v62 = vpop.f32.mrb[129].mxu0 }
 0x9db   : > { %v3886_v18 = vadd.f32 %v8220_v63, %v3755_v62  ;;  %v6510_v17 = vpop.f32.mrb[130].mxu0 }
 0x9dc   : > { %v3889_v22 = vadd.f32 %v6510_v17, %v8220_v63  ;;  %v3758_v27 = vpop.f32.mrb[131].mxu0  ;;  %v3920_v29 = vmax.f32 %v3888_v5, 0.0 }
 0x9dd   : > { %v3887_v28 = vadd.f32 %v8220_v63, %v3758_v27  ;;  %v3918_v31 = vmax.f32 %v3886_v18, 0.0 }
 0x9de   : > { %v3921_v30 = vmax.f32 %v3889_v22, 0.0 }
 0x9df   : > { %v3919_v32 = vmax.f32 %v3887_v28, 0.0 }
 0x9e0   : > { %v8226_v33 = vpack.c.bf16 %v3921_v30, %v3920_v29 }
 0x9e1   : > { %v8228_v34 = vpack.c.bf16 %v3919_v32, %v3918_v31 }
 0x9e3   : > { %6547 = vmatprep.mubr.msk.bf16.mxu0 %vm1204_vm1, %v8228_v34 }
 0x9e4   : > { %6548 = vmatmul.mubr.msk.bf16.vlgmr.msra.gmra.mrb[160].mxu0 %vm1204_vm1, %v8226_v33 }
 0x9e9   : > { %v6513_v35 = vpop.f32.mrb[132].mxu0 }
 0x9ea   : > { %v3892_v38 = vadd.f32 %v6513_v35, %v8220_v63  ;;  %v3771_v41 = vpop.f32.mrb[133].mxu0 }
 0x9eb   : > { %v3890_v42 = vadd.f32 %v8220_v63, %v3771_v41  ;;  %v6514_v43 = vpop.f32.mrb[134].mxu0 }
 0x9ec   : > { %v3893_v45 = vadd.f32 %v6514_v43, %v8220_v63  ;;  %v3774_v50 = vpop.f32.mrb[135].mxu0  ;;  %v3924_v56 = vmax.f32 %v3892_v38, 0.0 }
 0x9ed   : > { %v3891_v52 = vadd.f32 %v8220_v63, %v3774_v50  ;;  %v3922_v2 = vmax.f32 %v3890_v42, 0.0 }
 0x9ee   : > { %v3925_v57 = vmax.f32 %v3893_v45, 0.0 }
 0x9ef   : > { %v3923_v36 = vmax.f32 %v3891_v52, 0.0 }
 0x9f0   : > { %v8238_v48 = vpack.c.bf16 %v3925_v57, %v3924_v56 }
 0x9f1   : > { %v8240_v51 = vpack.c.bf16 %v3923_v36, %v3922_v2 }
 0x9f3   : > { %6551 = vmatprep.mubr.msk.bf16.mxu0 %vm1204_vm1, %v8240_v51 }
 0x9f4   : > { %6552 = vmatmul.mubr.msk.bf16.gmra.mrb[164].mxu0 %vm1204_vm1, %v8238_v48 }
 0x9f9   : > { %v6517_v0 = vpop.f32.mrb[136].mxu0 }
 0x9fa   : > { %v3896_v8 = vadd.f32 %v6517_v0, %v8220_v63  ;;  %v3787_v14 = vpop.f32.mrb[137].mxu0 }
 0x9fb   : > { %v3894_v7 = vadd.f32 %v8220_v63, %v3787_v14  ;;  %v6518_v9 = vpop.f32.mrb[138].mxu0 }
 0x9fc   : > { %v3897_v15 = vadd.f32 %v6518_v9, %v8220_v63  ;;  %v3790_v13 = vpop.f32.mrb[139].mxu0  ;;  %v3928_v40 = vmax.f32 %v3896_v8, 0.0 }
 0x9fd   : > { %v3895_v20 = vadd.f32 %v8220_v63, %v3790_v13  ;;  %v3926_v53 = vmax.f32 %v3894_v7, 0.0 }
 0x9fe   : > { %v3929_v60 = vmax.f32 %v3897_v15, 0.0 }
 0x9ff   : > { %v3927_v25 = vmax.f32 %v3895_v20, 0.0 }
 0xa00   : > { %v8250_v61 = vpack.c.bf16 %v3929_v60, %v3928_v40 }
 0xa01   : > { %v8252_v37 = vpack.c.bf16 %v3927_v25, %v3926_v53 }
 0xa03   : > { %6555 = vmatprep.mubr.msk.bf16.mxu0 %vm1204_vm1, %v8252_v37 }
 0xa04   : > { %6556 = vmatmul.mubr.msk.bf16.gmra.mrb[168].mxu0 %vm1204_vm1, %v8250_v61 }
 0xa09   : > { %v6521_v11 = vpop.f32.mrb[140].mxu0 }
 0xa0a   : > { %v3900_v39 = vadd.f32 %v6521_v11, %v8220_v63  ;;  %v3803_v6 = vpop.f32.mrb[141].mxu0 }
 0xa0b   : > { %v3898_v55 = vadd.f32 %v8220_v63, %v3803_v6  ;;  %v6522_v46 = vpop.f32.mrb[142].mxu0 }
 0xa0c   : > { %v3901_v49 = vadd.f32 %v6522_v46, %v8220_v63  ;;  %v3806_v1 = vpop.f32.mrb[143].mxu0  ;;  %v3932_v21 = vmax.f32 %v3900_v39, 0.0 }
 0xa0d   : > { %v3899_v54 = vadd.f32 %v8220_v63, %v3806_v1  ;;  %v3930_v4 = vmax.f32 %v3898_v55, 0.0 }
 0xa0e   : > { %v3933_v47 = vmax.f32 %v3901_v49, 0.0 }
 0xa0f   : > { %v3931_v10 = vmax.f32 %v3899_v54, 0.0 }
 0xa10   : > { %v8262_v16 = vpack.c.bf16 %v3933_v47, %v3932_v21 }
 0xa11   : > { %v8264_v59 = vpack.c.bf16 %v3931_v10, %v3930_v4  ;;  %v7015_v10 = vld [vmem:[%s7377_s19 + $0x14] ss:$8 sps:$4 sm:$0xff]  }
 0xa13   : > { %6559 = vmatprep.mubr.msk.bf16.mxu0 %vm1204_vm1, %v8264_v59 }
 0xa14   : > { %6560 = vmatmul.mubr.msk.bf16.gmra.mrb[172].mxu0 %vm1204_vm1, %v8262_v16 }
 0xa19   : > { %v6525_v12 = vpop.f32.mrb[144].mxu0 }
 0xa1a   : > { %v3904_v19 = vadd.f32 %v6525_v12, %v8220_v63  ;;  %v3819_v58 = vpop.f32.mrb[145].mxu0  ;;  %v7016_v12 = vld [vmem:[%s7377_s19 + $0x10] ss:$8 sps:$4 sm:$0xff]  }
 0xa1b   : > { %v3902_v26 = vadd.f32 %v8220_v63, %v3819_v58  ;;  %v6526_v5 = vpop.f32.mrb[146].mxu0  ;;  %v7019_v58 = vld [vmem:[%s7377_s19 + $0x34] ss:$8 sps:$4 sm:$0xff]  }
 0xa1c   : > { %v3905_v62 = vadd.f32 %v6526_v5, %v8220_v63  ;;  %v3822_v18 = vpop.f32.mrb[147].mxu0  ;;  %v3936_v22 = vmax.f32 %v3904_v19, 0.0  ;;  %v7017_v19 = vld [vmem:[%s7377_s19 + $0x24] ss:$8 sps:$4 sm:$0xff]   ;;  %v7022_v5 = vld [vmem:[%s7377_s19 + $0x40] ss:$8 sps:$4 sm:$0xff]  }
 0xa1d   : > { %v3903_v17 = vadd.f32 %v8220_v63, %v3822_v18  ;;  %v3934_v28 = vmax.f32 %v3902_v26, 0.0  ;;  %v7020_v26 = vld [vmem:[%s7377_s19 + $0x30] ss:$8 sps:$4 sm:$0xff]  }
 0xa1e   : > { %v3937_v27 = vmax.f32 %v3905_v62, 0.0  ;;  %v7023_v62 = vld [vmem:[%s7377_s19 + $0x54] ss:$8 sps:$4 sm:$0xff]   ;;  %v7024_v18 = vld [vmem:[%s7377_s19 + $0x50] ss:$8 sps:$4 sm:$0xff]  }
 0xa1f   : > { %v3935_v29 = vmax.f32 %v3903_v17, 0.0  ;;  %v7025_v17 = vld [vmem:[%s7377_s19 + $0x64] ss:$8 sps:$4 sm:$0xff]  }
 0xa20   : > { %v3959_v30 = vpack.c.bf16 %v3937_v27, %v3936_v22  ;;  %v7026_v22 = vld [vmem:[%s7377_s19 + $0x60] ss:$8 sps:$4 sm:$0xff]   ;;  %v7027_v27 = vld [vmem:[%s7377_s19 + $0x74] ss:$8 sps:$4 sm:$0xff]  }
 0xa21   : > { %v3958_v31 = vpack.c.bf16 %v3935_v29, %v3934_v28  ;;  %v7028_v28 = vld [vmem:[%s7377_s19 + $0x70] ss:$8 sps:$4 sm:$0xff]   ;;  %v7029_v29 = vld [vmem:[%s7377_s19 + $0x84] ss:$8 sps:$4 sm:$0xff]  }
 0xa23   : > { %6001 = vmatprep.subr.bf16.mxu1 %v3958_v31  ;;  %6563 = vmatprep.mubr.msk.bf16.mxu0 %vm1204_vm1, %v3958_v31  ;;  %v7031_v31 = vld [vmem:[%s7377_s19 + $0x94] ss:$8 sps:$4 sm:$0xff]  }
 0xa24   : > { %6002 = vmatpush3.bf16.msra.mxu1 %v8228_v34  ;;  %6564 = vmatmul.mubr.msk.bf16.gmra.mrb[176].mxu0 %vm1204_vm1, %v3959_v30 }
 0xa25   : > { %6003 = vmatprep.subr.bf16.mxu1 %v3959_v30  ;;  %v7030_v30 = vld [vmem:[%s7377_s19 + $0x80] ss:$8 sps:$4 sm:$0xff]  }
 0xa28   : > { %6004 = vmatpush3.bf16.msra.mxu1 %v8226_v33 }
 0xa29   : > { %v6529_v32 = vpop.f32.mrb[148].mxu0 }
 0xa2a   : > { %v3908_v35 = vadd.f32 %v6529_v32, %v8220_v63  ;;  %v3835_v38 = vpop.f32.mrb[149].mxu0  ;;  %v7032_v32 = vld [vmem:[%s7377_s19 + $0x90] ss:$8 sps:$4 sm:$0xff]  }
 0xa2b   : > { %v3906_v41 = vadd.f32 %v8220_v63, %v3835_v38  ;;  %v6530_v42 = vpop.f32.mrb[150].mxu0  ;;  %v7034_v38 = vld [vmem:[%s7377_s19 + $0xa0] ss:$8 sps:$4 sm:$0xff]  }
 0xa2c   : > { %v3909_v43 = vadd.f32 %v6530_v42, %v8220_v63  ;;  %v3838_v45 = vpop.f32.mrb[151].mxu0  ;;  %v3940_v52 = vmax.f32 %v3908_v35, 0.0  ;;  %v7033_v35 = vld [vmem:[%s7377_s19 + $0xa4] ss:$8 sps:$4 sm:$0xff]  }
 0xa2d   : > { %v3907_v50 = vadd.f32 %v8220_v63, %v3838_v45  ;;  %v3938_v34 = vmax.f32 %v3906_v41, 0.0  ;;  %v7035_v41 = vld [vmem:[%s7377_s19 + $0xb4] ss:$8 sps:$4 sm:$0xff]   ;;  %v6967_v42 = vld [vmem:[%s8511_s4 + $0x80] sm:$0xff]   ;;  %v7036_v45 = vld [vmem:[%s7377_s19 + $0xb0] ss:$8 sps:$4 sm:$0xff]  }
 0xa2e   : > { %v3941_v56 = vmax.f32 %v3909_v43, 0.0  ;;  %6579 = vmatprep.subr.bf16.mxu0 %v6967_v42  ;;  %v6968_v43 = vld [vmem:[%s8511_s4 + $0x88] sm:$0xff]  }
 0xa2f   : > { %v3939_v57 = vmax.f32 %v3907_v50, 0.0  ;;  %6580 = vmatpush3.bf16.msra.mxu0 %v6967_v42  ;;  %v7037_v50 = vld [vmem:[%s7377_s19 + $0xc4] ss:$8 sps:$4 sm:$0xff]  }
 0xa30   : > { %v3961_v2 = vpack.c.bf16 %v3941_v56, %v3940_v52  ;;  %6581 = vmatprep.subr.bf16.mxu0 %v6968_v43  ;;  %v6969_v52 = vld [vmem:[%s8511_s4 + $0x90] sm:$0xff]   ;;  %v6970_v56 = vld [vmem:[%s8511_s4 + $0x98] sm:$0xff]  }
 0xa31   : > { %v3960_v36 = vpack.c.bf16 %v3939_v57, %v3938_v34  ;;  %v7038_v34 = vld [vmem:[%s7377_s19 + $0xc0] ss:$8 sps:$4 sm:$0xff]   ;;  %v7039_v57 = vld [vmem:[%s7377_s19 + $0xd4] ss:$8 sps:$4 sm:$0xff]  }
 0xa33   : > { %6005 = vmatprep.subr.bf16.mxu1 %v3960_v36  ;;  %6567 = vmatprep.mubr.msk.bf16.mxu0 %vm1204_vm1, %v3960_v36  ;;  %v7041_v36 = vld [vmem:[%s7377_s19 + $0xe4] ss:$8 sps:$4 sm:$0xff]  }
 0xa34   : > { %6006 = vmatpush3.bf16.msra.mxu1 %v8240_v51  ;;  %6568 = vmatmul.mubr.msk.bf16.gmra.mrb[180].mxu0 %vm1204_vm1, %v3961_v2 }
 0xa35   : > { %6007 = vmatprep.subr.bf16.mxu1 %v3961_v2  ;;  %6582 = vmatpush3.bf16.msra.mxu0 %v6968_v43  ;;  %v7040_v2 = vld [vmem:[%s7377_s19 + $0xd0] ss:$8 sps:$4 sm:$0xff]  }
 0xa36   : > { %6583 = vmatprep.subr.bf16.mxu0 %v6969_v52 }
 0xa38   : > { %6008 = vmatpush3.bf16.msra.mxu1 %v8238_v48 }
 0xa39   : > { %v6533_v33 = vpop.f32.mrb[152].mxu0  ;;  %6584 = vmatpush3.bf16.msra.mxu0 %v6969_v52 }
 0xa3a   : > { %v3912_v0 = vadd.f32 %v6533_v33, %v8220_v63  ;;  %v3851_v8 = vpop.f32.mrb[153].mxu0  ;;  %6585 = vmatprep.subr.bf16.mxu0 %v6970_v56  ;;  %v7042_v33 = vld [vmem:[%s7377_s19 + $0xe0] ss:$8 sps:$4 sm:$0xff]  }
 0xa3b   : > { %v3910_v14 = vadd.f32 %v8220_v63, %v3851_v8  ;;  %v6534_v7 = vpop.f32.mrb[154].mxu0  ;;  %v7044_v8 = vld [vmem:[%s7377_s19 + $0xf0] ss:$8 sps:$4 sm:$0xff]  }
 0xa3c   : > { %v3913_v9 = vadd.f32 %v6534_v7, %v8220_v63  ;;  %v3854_v15 = vpop.f32.mrb[155].mxu0  ;;  %v3944_v20 = vmax.f32 %v3912_v0, 0.0  ;;  %v7043_v0 = vld [vmem:[%s7377_s19 + $0xf4] ss:$8 sps:$4 sm:$0xff]  }
 0xa3d   : > { %v3911_v13 = vadd.f32 %v8220_v63, %v3854_v15  ;;  %v3942_v51 = vmax.f32 %v3910_v14, 0.0  ;;  %6586 = vmatpush3.bf16.msra.mxu0 %v6970_v56 }
 0xa3e   : > { %v3945_v40 = vmax.f32 %v3913_v9, 0.0 }
 0xa3f   : > { %v3943_v60 = vmax.f32 %v3911_v13, 0.0 }
 0xa40   : > { %v3963_v53 = vpack.c.bf16 %v3945_v40, %v3944_v20 }
 0xa41   : > { %v3962_v25 = vpack.c.bf16 %v3943_v60, %v3942_v51 }
 0xa43   : > { %6009 = vmatprep.subr.bf16.mxu1 %v3962_v25  ;;  %6571 = vmatprep.mubr.msk.bf16.mxu0 %vm1204_vm1, %v3962_v25 }
 0xa44   : > { %6010 = vmatpush3.bf16.msra.mxu1 %v8252_v37  ;;  %6572 = vmatmul.mubr.msk.bf16.gmra.mrb[184].mxu0 %vm1204_vm1, %v3963_v53 }
 0xa45   : > { %6011 = vmatprep.subr.bf16.mxu1 %v3963_v53 }
 0xa48   : > { %6012 = vmatpush3.bf16.msra.mxu1 %v8250_v61 }
 0xa49   : > { %v6537_v48 = vpop.f32.mrb[156].mxu0 }
 0xa4a   : > { %v3916_v11 = vadd.f32 %v6537_v48, %v8220_v63  ;;  %v3867_v39 = vpop.f32.mrb[157].mxu0 }
 0xa4b   : > { %v3914_v6 = vadd.f32 %v8220_v63, %v3867_v39  ;;  %v6538_v55 = vpop.f32.mrb[158].mxu0 }
 0xa4c   : > { %v3917_v46 = vadd.f32 %v6538_v55, %v8220_v63  ;;  %v3870_v49 = vpop.f32.mrb[159].mxu0  ;;  %v3948_v37 = vmax.f32 %v3916_v11, 0.0 }
 0xa4d   : > { %v3915_v1 = vadd.f32 %v8220_v63, %v3870_v49  ;;  %v3946_v21 = vmax.f32 %v3914_v6, 0.0  ;;  %v7014_v63 = vld [vmem:[%s7377_s19] ss:$8 sps:$4 sm:$0xff]  }
 0xa4e   : > { %v3949_v54 = vmax.f32 %v3917_v46, 0.0 }
 0xa4f   : > { %v3947_v61 = vmax.f32 %v3915_v1, 0.0 }
 0xa50   : > { %v3965_v47 = vpack.c.bf16 %v3949_v54, %v3948_v37 }
 0xa51   : > { %v3964_v4 = vpack.c.bf16 %v3947_v61, %v3946_v21 }
 0xa53   : > { %6013 = vmatprep.subr.bf16.mxu1 %v3964_v4  ;;  %6575 = vmatprep.mubr.msk.bf16.mxu0 %vm1204_vm1, %v3964_v4 }
 0xa54   : > { %6014 = vmatpush3.bf16.msra.mxu1 %v8264_v59  ;;  %6576 = vmatmul.mubr.msk.bf16.gmra.mrb[188].mxu0 %vm1204_vm1, %v3965_v47  ;;  %v7018_v59 = vld [vmem:[%s7377_s19 + $0x20] ss:$8 sps:$4 sm:$0xff]  }
 0xa55   : > { %6015 = vmatprep.subr.bf16.mxu1 %v3965_v47 }
 0xa58   : > { %6016 = vmatpush3.bf16.msra.mxu1 %v8262_v16  ;;  %v7021_v16 = vld [vmem:[%s7377_s19 + $0x44] ss:$8 sps:$4 sm:$0xff]   ;;  %s406_s19 = scalar_select %p405_p6, %s7255_s13, 1 }
 0xa5a   : > { %s5375_s16 = sshll.u32 %s406_s19, 4  ;;  %s4942_s19 = sshll.u32 %s397_s24, 4  ;;  %s8465_s19 = int_to_ptr.vmem [resolvable:$true] %s4942_s19 }
 0xa5b   : > { %3999 = vmatmul.mubr.bf16.vlgmr.msra.gmra.mrb[0].mxu1 %v7014_v63  ;;  %s8370_s25 = scalar_lea.vmem %s8509_s2, %s5375_s16  ;;  %s7103_s13 = scalar_lea.vmem %s8465_s19, 128 }
 0xa5c   : > { %4006 = vmatprep.mubr.bf16.mxu1 %v7015_v10  ;;  %p7104_p8 = scmp.ne.s32.totalorder %s8465_s19, %s7103_s13  ;;  %p7110_p3 = scmp.lt.s32.totalorder %s8465_s19, %s7108_s20 }
 0xa5d   : > { %p7111_p7 = scmp.lt.s32.totalorder %s7109_s14, %s7103_s13 }
 0xa5e   : > { %p7105_p10 = pnand %p7104_p8, %p7325_p12 }
 0xa5f   : > { %p7112_p9 = por %p7111_p7, %p7110_p3 }
 0xa60   : > { %p7106_p13 = pneg %p7105_p10 }
 0xa62   : > { %p7113_p2 = pnand %p7112_p9, %p7106_p13 }
 0xa63   : > { %4007 = vmatmul.mubr.bf16.gmra.mrb[4].mxu1 %v7016_v12 }
 0xa64   : > { %4014 = vmatprep.mubr.bf16.mxu1 %v7017_v19 }
 0xa6b   : > { %4015 = vmatmul.mubr.bf16.gmra.mrb[8].mxu1 %v7018_v59 }
 0xa6c   : > { %4022 = vmatprep.mubr.bf16.mxu1 %v7019_v58 }
 0xa73   : > { %4023 = vmatmul.mubr.bf16.gmra.mrb[12].mxu1 %v7020_v26 }
 0xa74   : > { %4030 = vmatprep.mubr.bf16.mxu1 %v7021_v16 }
 0xa7b   : > { %4031 = vmatmul.mubr.bf16.gmra.mrb[16].mxu1 %v7022_v5 }
 0xa7c   : > { %4038 = vmatprep.mubr.bf16.mxu1 %v7023_v62 }
 0xa83   : > { %4039 = vmatmul.mubr.bf16.gmra.mrb[20].mxu1 %v7024_v18 }
 0xa84   : > { %4046 = vmatprep.mubr.bf16.mxu1 %v7025_v17 }
 0xa8b   : > { %4047 = vmatmul.mubr.bf16.gmra.mrb[24].mxu1 %v7026_v22 }
 0xa8c   : > { %4054 = vmatprep.mubr.bf16.mxu1 %v7027_v27 }
 0xa93   : > { %4055 = vmatmul.mubr.bf16.gmra.mrb[28].mxu1 %v7028_v28 }
 0xa94   : > { %4062 = vmatprep.mubr.bf16.mxu1 %v7029_v29 }
 0xa9b   : > { %4063 = vmatmul.mubr.bf16.gmra.mrb[32].mxu1 %v7030_v30 }
 0xa9c   : > { %4070 = vmatprep.mubr.bf16.mxu1 %v7031_v31 }
 0xaa3   : > { %4071 = vmatmul.mubr.bf16.gmra.mrb[36].mxu1 %v7032_v32 }
 0xaa4   : > { %4078 = vmatprep.mubr.bf16.mxu1 %v7033_v35 }
 0xaab   : > { %4079 = vmatmul.mubr.bf16.gmra.mrb[40].mxu1 %v7034_v38 }
 0xaac   : > { %4086 = vmatprep.mubr.bf16.mxu1 %v7035_v41 }
 0xab3   : > { %4087 = vmatmul.mubr.bf16.gmra.mrb[44].mxu1 %v7036_v45 }
 0xab4   : > { %4094 = vmatprep.mubr.bf16.mxu1 %v7037_v50 }
 0xabb   : > { %4095 = vmatmul.mubr.bf16.gmra.mrb[48].mxu1 %v7038_v34 }
 0xabc   : > { %4102 = vmatprep.mubr.bf16.mxu1 %v7039_v57 }
 0xac3   : > { %4103 = vmatmul.mubr.bf16.gmra.mrb[52].mxu1 %v7040_v2 }
 0xac4   : > { %4110 = vmatprep.mubr.bf16.mxu1 %v7041_v36 }
 0xacb   : > { %4111 = vmatmul.mubr.bf16.gmra.mrb[56].mxu1 %v7042_v33 }
 0xacc   : > { %4118 = vmatprep.mubr.bf16.mxu1 %v7043_v0 }
 0xad3   : > { %4119 = vmatmul.mubr.bf16.gmra.mrb[60].mxu1 %v7044_v8 }
 0xb2e   : > { %v6017_v14 = vpop.f32.mrb[0].mxu1 }
 0xb2f   : > { %v6018_v7 = vpop.f32.mrb[1].mxu1 }
 0xb30   : > { %v6019_v9 = vadd.f32 %v6018_v7, %v6017_v14  ;;  %v6020_v15 = vpop.f32.mrb[2].mxu1 }
 0xb31   : > { %v6021_v13 = vpop.f32.mrb[3].mxu1 }
 0xb32   : > { %v6022_v20 = vadd.f32 %v6021_v13, %v6020_v15 }
 0xb34   : > { %v4127_v40 = vpack.c.bf16 %v6022_v20, %v6019_v9 }
 0xb36   : > { %v6023_v51 = vpop.f32.mrb[4].mxu1  ;;  %6587 = vmatprep.mubr.msk.bf16.mxu0 %vm1204_vm1, %v4127_v40 }
 0xb37   : > { %v6024_v60 = vpop.f32.mrb[5].mxu1 }
 0xb38   : > { %v6025_v53 = vadd.f32 %v6024_v60, %v6023_v51  ;;  %v6026_v25 = vpop.f32.mrb[6].mxu1 }
 0xb39   : > { %v6027_v48 = vpop.f32.mrb[7].mxu1 }
 0xb3a   : > { %v6028_v11 = vadd.f32 %v6027_v48, %v6026_v25 }
 0xb3c   : > { %v4128_v39 = vpack.c.bf16 %v6028_v11, %v6025_v53 }
 0xb3e   : > { %v6029_v6 = vpop.f32.mrb[8].mxu1  ;;  %6588 = vmatmul.mubr.msk.bf16.vlgmr.msra.gmra.mrb[160].mxu0 %vm1204_vm1, %v4128_v39 }
 0xb3f   : > { %v6030_v55 = vpop.f32.mrb[9].mxu1 }
 0xb40   : > { %v6031_v46 = vadd.f32 %v6030_v55, %v6029_v6  ;;  %v6032_v49 = vpop.f32.mrb[10].mxu1 }
 0xb41   : > { %v6033_v1 = vpop.f32.mrb[11].mxu1 }
 0xb42   : > { %v6034_v37 = vadd.f32 %v6033_v1, %v6032_v49 }
 0xb44   : > { %v4129_v54 = vpack.c.bf16 %v6034_v37, %v6031_v46 }
 0xb46   : > { %v6035_v21 = vpop.f32.mrb[12].mxu1  ;;  %6591 = vmatprep.mubr.msk.bf16.mxu0 %vm1204_vm1, %v4129_v54 }
 0xb47   : > { %v6036_v61 = vpop.f32.mrb[13].mxu1 }
 0xb48   : > { %v6037_v47 = vadd.f32 %v6036_v61, %v6035_v21  ;;  %v6038_v4 = vpop.f32.mrb[14].mxu1 }
 0xb49   : > { %v6039_v63 = vpop.f32.mrb[15].mxu1 }
 0xb4a   : > { %v6040_v10 = vadd.f32 %v6039_v63, %v6038_v4 }
 0xb4c   : > { %v4130_v12 = vpack.c.bf16 %v6040_v10, %v6037_v47 }
 0xb4e   : > { %v6041_v19 = vpop.f32.mrb[16].mxu1  ;;  %6592 = vmatmul.mubr.msk.bf16.gmra.mrb[164].mxu0 %vm1204_vm1, %v4130_v12 }
 0xb4f   : > { %v6042_v59 = vpop.f32.mrb[17].mxu1 }
 0xb50   : > { %v6043_v58 = vadd.f32 %v6042_v59, %v6041_v19  ;;  %v6044_v26 = vpop.f32.mrb[18].mxu1 }
 0xb51   : > { %v6045_v16 = vpop.f32.mrb[19].mxu1 }
 0xb52   : > { %v6046_v5 = vadd.f32 %v6045_v16, %v6044_v26 }
 0xb54   : > { %v4131_v62 = vpack.c.bf16 %v6046_v5, %v6043_v58 }
 0xb56   : > { %v6047_v18 = vpop.f32.mrb[20].mxu1  ;;  %6595 = vmatprep.mubr.msk.bf16.mxu0 %vm1204_vm1, %v4131_v62 }
 0xb57   : > { %v6048_v17 = vpop.f32.mrb[21].mxu1 }
 0xb58   : > { %v6049_v22 = vadd.f32 %v6048_v17, %v6047_v18  ;;  %v6050_v27 = vpop.f32.mrb[22].mxu1 }
 0xb59   : > { %v6051_v28 = vpop.f32.mrb[23].mxu1 }
 0xb5a   : > { %v6052_v29 = vadd.f32 %v6051_v28, %v6050_v27 }
 0xb5c   : > { %v4132_v30 = vpack.c.bf16 %v6052_v29, %v6049_v22 }
 0xb5e   : > { %v6053_v31 = vpop.f32.mrb[24].mxu1  ;;  %6596 = vmatmul.mubr.msk.bf16.gmra.mrb[168].mxu0 %vm1204_vm1, %v4132_v30 }
 0xb5f   : > { %v6054_v32 = vpop.f32.mrb[25].mxu1 }
 0xb60   : > { %v6055_v35 = vadd.f32 %v6054_v32, %v6053_v31  ;;  %v6056_v38 = vpop.f32.mrb[26].mxu1 }
 0xb61   : > { %v6057_v41 = vpop.f32.mrb[27].mxu1 }
 0xb62   : > { %v6058_v42 = vadd.f32 %v6057_v41, %v6056_v38 }
 0xb64   : > { %v4133_v43 = vpack.c.bf16 %v6058_v42, %v6055_v35 }
 0xb66   : > { %v6059_v45 = vpop.f32.mrb[28].mxu1  ;;  %6599 = vmatprep.mubr.msk.bf16.mxu0 %vm1204_vm1, %v4133_v43 }
 0xb67   : > { %v6060_v50 = vpop.f32.mrb[29].mxu1 }
 0xb68   : > { %v6061_v52 = vadd.f32 %v6060_v50, %v6059_v45  ;;  %v6062_v56 = vpop.f32.mrb[30].mxu1 }
 0xb69   : > { %v6063_v34 = vpop.f32.mrb[31].mxu1 }
 0xb6a   : > { %v6064_v57 = vadd.f32 %v6063_v34, %v6062_v56  ;;  %v4629_v56 = vsub.s32 5, %v7432_v23 }
 0xb6c   : > { %v4134_v2 = vpack.c.bf16 %v6064_v57, %v6061_v52  ;;  %v8365_v34 = vrot.slane %v8217_v3, %v4629_v56  ;;  %v4696_v57 = vld [vmem:[%s8370_s25 + $0x8] sm:$0xff] }
 0xb6e   : > { %v6065_v36 = vpop.f32.mrb[32].mxu1  ;;  %6600 = vmatmul.mubr.msk.bf16.gmra.mrb[172].mxu0 %vm1204_vm1, %v4134_v2  ;;  %v4698_v2 = vpack.c.bf16 %v4696_v57, %v4696_v57 }
 0xb6f   : > { %v6066_v33 = vpop.f32.mrb[33].mxu1 }
 0xb70   : > { %v6067_v0 = vadd.f32 %v6066_v33, %v6065_v36  ;;  %v6068_v8 = vpop.f32.mrb[34].mxu1  ;;  %4747 = vmatprep.mubr.bf16.mxu1 %v4698_v2 }
 0xb71   : > { %v6069_v14 = vpop.f32.mrb[35].mxu1 }
 0xb72   : > { %v6070_v7 = vadd.f32 %v6069_v14, %v6068_v8 }
 0xb74   : > { %v4135_v9 = vpack.c.bf16 %v6070_v7, %v6067_v0 }
 0xb76   : > { %v6071_v15 = vpop.f32.mrb[36].mxu1  ;;  %6603 = vmatprep.mubr.msk.bf16.mxu0 %vm1204_vm1, %v4135_v9 }
 0xb77   : > { %v6072_v13 = vpop.f32.mrb[37].mxu1 }
 0xb78   : > { %v6073_v20 = vadd.f32 %v6072_v13, %v6071_v15  ;;  %v6074_v40 = vpop.f32.mrb[38].mxu1 }
 0xb79   : > { %v6075_v51 = vpop.f32.mrb[39].mxu1 }
 0xb7a   : > { %v6076_v60 = vadd.f32 %v6075_v51, %v6074_v40 }
 0xb7c   : > { %v4136_v53 = vpack.c.bf16 %v6076_v60, %v6073_v20 }
 0xb7e   : > { %6604 = vmatmul.mubr.msk.bf16.gmra.mrb[176].mxu0 %vm1204_vm1, %v4136_v53  ;;  %v6077_v25 = vpop.f32.mrb[40].mxu1 }
 0xb7f   : > { %v6078_v48 = vpop.f32.mrb[41].mxu1 }
 0xb80   : > { %v6079_v11 = vadd.f32 %v6078_v48, %v6077_v25  ;;  %v6080_v39 = vpop.f32.mrb[42].mxu1 }
 0xb81   : > { %v6081_v6 = vpop.f32.mrb[43].mxu1 }
 0xb82   : > { %v6082_v55 = vadd.f32 %v6081_v6, %v6080_v39 }
 0xb84   : > { %v4137_v46 = vpack.c.bf16 %v6082_v55, %v6079_v11 }
 0xb86   : > { %v6083_v49 = vpop.f32.mrb[44].mxu1  ;;  %6607 = vmatprep.mubr.msk.bf16.mxu0 %vm1204_vm1, %v4137_v46 }
 0xb87   : > { %v6084_v1 = vpop.f32.mrb[45].mxu1 }
 0xb88   : > { %v6085_v37 = vadd.f32 %v6084_v1, %v6083_v49  ;;  %v6086_v54 = vpop.f32.mrb[46].mxu1 }
 0xb89   : > { %v6087_v21 = vpop.f32.mrb[47].mxu1 }
 0xb8a   : > { %v6088_v61 = vadd.f32 %v6087_v21, %v6086_v54 }
 0xb8c   : > { %v4138_v47 = vpack.c.bf16 %v6088_v61, %v6085_v37 }
 0xb8e   : > { %6608 = vmatmul.mubr.msk.bf16.gmra.mrb[180].mxu0 %vm1204_vm1, %v4138_v47  ;;  %v6089_v4 = vpop.f32.mrb[48].mxu1 }
 0xb8f   : > { %v6090_v63 = vpop.f32.mrb[49].mxu1 }
 0xb90   : > { %v6091_v10 = vadd.f32 %v6090_v63, %v6089_v4  ;;  %v6092_v12 = vpop.f32.mrb[50].mxu1 }
 0xb91   : > { %v6093_v19 = vpop.f32.mrb[51].mxu1 }
 0xb92   : > { %v6094_v59 = vadd.f32 %v6093_v19, %v6092_v12 }
 0xb94   : > { %v4139_v58 = vpack.c.bf16 %v6094_v59, %v6091_v10 }
 0xb96   : > { %v6095_v26 = vpop.f32.mrb[52].mxu1  ;;  %6611 = vmatprep.mubr.msk.bf16.mxu0 %vm1204_vm1, %v4139_v58 }
 0xb97   : > { %v6096_v16 = vpop.f32.mrb[53].mxu1 }
 0xb98   : > { %v6097_v5 = vadd.f32 %v6096_v16, %v6095_v26  ;;  %v6098_v62 = vpop.f32.mrb[54].mxu1 }
 0xb99   : > { %v6099_v18 = vpop.f32.mrb[55].mxu1 }
 0xb9a   : > { %v6100_v17 = vadd.f32 %v6099_v18, %v6098_v62 }
 0xb9c   : > { %v4140_v22 = vpack.c.bf16 %v6100_v17, %v6097_v5 }
 0xb9e   : > { %6612 = vmatmul.mubr.msk.bf16.gmra.mrb[184].mxu0 %vm1204_vm1, %v4140_v22  ;;  %v6101_v27 = vpop.f32.mrb[56].mxu1 }
 0xb9f   : > { %v6102_v28 = vpop.f32.mrb[57].mxu1 }
 0xba0   : > { %v6103_v29 = vadd.f32 %v6102_v28, %v6101_v27  ;;  %v6104_v30 = vpop.f32.mrb[58].mxu1 }
 0xba1   : > { %v6105_v31 = vpop.f32.mrb[59].mxu1 }
 0xba2   : > { %v6106_v32 = vadd.f32 %v6105_v31, %v6104_v30 }
 0xba4   : > { %v4141_v35 = vpack.c.bf16 %v6106_v32, %v6103_v29 }
 0xba6   : > { %v6107_v38 = vpop.f32.mrb[60].mxu1  ;;  %6615 = vmatprep.mubr.msk.bf16.mxu0 %vm1204_vm1, %v4141_v35 }
 0xba7   : > { %v6108_v41 = vpop.f32.mrb[61].mxu1 }
 0xba8   : > { %v6109_v42 = vadd.f32 %v6108_v41, %v6107_v38  ;;  %v6110_v43 = vpop.f32.mrb[62].mxu1 }
 0xba9   : > { %v6111_v45 = vpop.f32.mrb[63].mxu1 }
 0xbaa   : > { %v6112_v50 = vadd.f32 %v6111_v45, %v6110_v43 }
 0xbac   : > { %v4142_v52 = vpack.c.bf16 %v6112_v50, %v6109_v42 }
 0xbae   : > { %6616 = vmatmul.mubr.msk.bf16.gmra.mrb[188].mxu0 %vm1204_vm1, %v4142_v52 }
 0xc11   : > { %v6589_v36 = vpop.f32.mrb[160].mxu0 }
 0xc12   : > { %v4633_v33 = vadd.f32 %v6589_v36, %v8365_v34  ;;  %v4500_v0 = vpop.f32.mrb[161].mxu0 }
 0xc13   : > { %v4631_v8 = vadd.f32 %v8365_v34, %v4500_v0  ;;  %v6590_v14 = vpop.f32.mrb[162].mxu0 }
 0xc14   : > { %v4634_v7 = vadd.f32 %v6590_v14, %v8365_v34  ;;  %v4503_v9 = vpop.f32.mrb[163].mxu0  ;;  %v4665_v13 = vmax.f32 %v4633_v33, 0.0 }
 0xc15   : > { %v4632_v15 = vadd.f32 %v8365_v34, %v4503_v9  ;;  %v4663_v40 = vmax.f32 %v4631_v8, 0.0 }
 0xc16   : > { %v4666_v20 = vmax.f32 %v4634_v7, 0.0 }
 0xc17   : > { %v4664_v51 = vmax.f32 %v4632_v15, 0.0 }
 0xc18   : > { %v4700_v60 = vpack.c.bf16 %v4666_v20, %v4665_v13 }
 0xc19   : > { %v4699_v53 = vpack.c.bf16 %v4664_v51, %v4663_v40 }
 0xc21   : > { %v6593_v25 = vpop.f32.mrb[164].mxu0 }
 0xc22   : > { %v4637_v48 = vadd.f32 %v6593_v25, %v8365_v34  ;;  %v4516_v11 = vpop.f32.mrb[165].mxu0 }
 0xc23   : > { %v4635_v39 = vadd.f32 %v8365_v34, %v4516_v11  ;;  %v6594_v6 = vpop.f32.mrb[166].mxu0 }
 0xc24   : > { %v4638_v55 = vadd.f32 %v6594_v6, %v8365_v34  ;;  %v4519_v46 = vpop.f32.mrb[167].mxu0  ;;  %v4669_v1 = vmax.f32 %v4637_v48, 0.0 }
 0xc25   : > { %v4636_v49 = vadd.f32 %v8365_v34, %v4519_v46  ;;  %v4667_v54 = vmax.f32 %v4635_v39, 0.0 }
 0xc26   : > { %v4670_v37 = vmax.f32 %v4638_v55, 0.0 }
 0xc27   : > { %v4668_v21 = vmax.f32 %v4636_v49, 0.0 }
 0xc28   : > { %v8381_v61 = vpack.c.bf16 %v4670_v37, %v4669_v1 }
 0xc29   : > { %v4701_v47 = vpack.c.bf16 %v4668_v21, %v4667_v54 }
 0xc31   : > { %v6597_v4 = vpop.f32.mrb[168].mxu0 }
 0xc32   : > { %v4641_v63 = vadd.f32 %v6597_v4, %v8365_v34  ;;  %v4532_v10 = vpop.f32.mrb[169].mxu0 }
 0xc33   : > { %v4639_v12 = vadd.f32 %v8365_v34, %v4532_v10  ;;  %v6598_v19 = vpop.f32.mrb[170].mxu0 }
 0xc34   : > { %v4642_v59 = vadd.f32 %v6598_v19, %v8365_v34  ;;  %v4535_v58 = vpop.f32.mrb[171].mxu0  ;;  %v4673_v16 = vmax.f32 %v4641_v63, 0.0 }
 0xc35   : > { %v4640_v26 = vadd.f32 %v8365_v34, %v4535_v58  ;;  %v4671_v62 = vmax.f32 %v4639_v12, 0.0 }
 0xc36   : > { %v4674_v5 = vmax.f32 %v4642_v59, 0.0 }
 0xc37   : > { %v4672_v18 = vmax.f32 %v4640_v26, 0.0 }
 0xc38   : > { %v8387_v17 = vpack.c.bf16 %v4674_v5, %v4673_v16 }
 0xc39   : > { %v8389_v22 = vpack.c.bf16 %v4672_v18, %v4671_v62 }
 0xc41   : > { %v6601_v27 = vpop.f32.mrb[172].mxu0 }
 0xc42   : > { %v4645_v28 = vadd.f32 %v6601_v27, %v8365_v34  ;;  %v4548_v29 = vpop.f32.mrb[173].mxu0 }
 0xc43   : > { %v4643_v30 = vadd.f32 %v8365_v34, %v4548_v29  ;;  %v6602_v31 = vpop.f32.mrb[174].mxu0 }
 0xc44   : > { %v4646_v32 = vadd.f32 %v6602_v31, %v8365_v34  ;;  %v4551_v35 = vpop.f32.mrb[175].mxu0  ;;  %v4677_v41 = vmax.f32 %v4645_v28, 0.0 }
 0xc45   : > { %v4644_v38 = vadd.f32 %v8365_v34, %v4551_v35  ;;  %v4675_v43 = vmax.f32 %v4643_v30, 0.0 }
 0xc46   : > { %v4678_v42 = vmax.f32 %v4646_v32, 0.0 }
 0xc47   : > { %v4676_v45 = vmax.f32 %v4644_v38, 0.0 }
 0xc48   : > { %v8395_v50 = vpack.c.bf16 %v4678_v42, %v4677_v41 }
 0xc49   : > { %v8397_v52 = vpack.c.bf16 %v4676_v45, %v4675_v43 }
 0xc51   : > { %v6605_v56 = vpop.f32.mrb[176].mxu0 }
 0xc52   : > { %v4649_v57 = vadd.f32 %v6605_v56, %v8365_v34  ;;  %v4564_v2 = vpop.f32.mrb[177].mxu0 }
 0xc53   : > { %v4647_v36 = vadd.f32 %v8365_v34, %v4564_v2  ;;  %v6606_v33 = vpop.f32.mrb[178].mxu0  ;;  %v7181_v2 = vmov 0.0  }
 0xc54   : > { %v4650_v0 = vadd.f32 %v6606_v33, %v8365_v34  ;;  %v4567_v8 = vpop.f32.mrb[179].mxu0  ;;  %v4681_v7 = vmax.f32 %v4649_v57, 0.0  ;;  %v6971_v57 = vld [vmem:[%s8513_s6] sm:$0xff]  }
 0xc55   : > { %v4648_v14 = vadd.f32 %v8365_v34, %v4567_v8  ;;  %v4679_v15 = vmax.f32 %v4647_v36, 0.0 }
 0xc56   : > { %v4682_v9 = vmax.f32 %v4650_v0, 0.0 }
 0xc57   : > { %v4680_v13 = vmax.f32 %v4648_v14, 0.0 }
 0xc58   : > { %v4708_v20 = vpack.c.bf16 %v4682_v9, %v4681_v7  ;;  %v6975_v7 = vld [vmem:[%s8514_s7] sm:$0xff]  }
 0xc59   : > { %v4707_v40 = vpack.c.bf16 %v4680_v13, %v4679_v15  ;;  %v6976_v15 = vld [vmem:[%s8514_s7 + $0x8] sm:$0xff]   ;;  %v6977_v13 = vld [vmem:[%s8514_s7 + $0x10] sm:$0xff]  }
 0xc5b   : > { %6153 = vmatprep.subr.bf16.mxu1 %v4707_v40  ;;  %v4766_v40 = vsub.s32 6, %v7432_v23 }
 0xc5c   : > { %6154 = vmatpush3.bf16.msra.mxu1 %v4699_v53 }
 0xc5d   : > { %6155 = vmatprep.subr.bf16.mxu1 %v4708_v20  ;;  %v6978_v20 = vld [vmem:[%s8514_s7 + $0x18] sm:$0xff]  }
 0xc60   : > { %6156 = vmatpush3.bf16.msra.mxu1 %v4700_v60 }
 0xc61   : > { %v6609_v51 = vpop.f32.mrb[180].mxu0 }
 0xc62   : > { %v4653_v25 = vadd.f32 %v6609_v51, %v8365_v34  ;;  %v4580_v48 = vpop.f32.mrb[181].mxu0  ;;  %v4767_v51 = vrot.slane %v8217_v3, %v4766_v40 }
 0xc63   : > { %v4651_v11 = vadd.f32 %v8365_v34, %v4580_v48  ;;  %v6610_v39 = vpop.f32.mrb[182].mxu0  ;;  %v412_v48 = vld [vmem:[%s8515_s8 + $0x8] sm:$0xff] }
 0xc64   : > { %v4654_v6 = vadd.f32 %v6610_v39, %v8365_v34  ;;  %v4583_v55 = vpop.f32.mrb[183].mxu0  ;;  %v4685_v49 = vmax.f32 %v4653_v25, 0.0  ;;  %v4838_v25 = vsub.s32 7, %v7432_v23 }
 0xc65   : > { %v4652_v46 = vadd.f32 %v8365_v34, %v4583_v55  ;;  %v4683_v37 = vmax.f32 %v4651_v11, 0.0 }
 0xc66   : > { %v4686_v1 = vmax.f32 %v4654_v6, 0.0  ;;  %v4839_v6 = vrot.slane %v8217_v3, %v4838_v25 }
 0xc67   : > { %v4684_v54 = vmax.f32 %v4652_v46, 0.0 }
 0xc68   : > { %v4710_v21 = vpack.c.bf16 %v4686_v1, %v4685_v49  ;;  %v4844_v1 = vrot.slane %v412_v48, %v481_v24 }
 0xc69   : > { %v4709_v53 = vpack.c.bf16 %v4684_v54, %v4683_v37 }
 0xc6b   : > { %6157 = vmatprep.subr.bf16.mxu1 %v4709_v53 }
 0xc6c   : > { %6158 = vmatpush3.bf16.msra.mxu1 %v4701_v47 }
 0xc6d   : > { %6159 = vmatprep.subr.bf16.mxu1 %v4710_v21 }
 0xc70   : > { %6160 = vmatpush3.bf16.msra.mxu1 %v8381_v61 }
 0xc71   : > { %v6613_v60 = vpop.f32.mrb[184].mxu0 }
 0xc72   : > { %v4657_v4 = vadd.f32 %v6613_v60, %v8365_v34  ;;  %v4596_v63 = vpop.f32.mrb[185].mxu0 }
 0xc73   : > { %v4655_v10 = vadd.f32 %v8365_v34, %v4596_v63  ;;  %v6614_v12 = vpop.f32.mrb[186].mxu0 }
 0xc74   : > { %v4658_v19 = vadd.f32 %v6614_v12, %v8365_v34  ;;  %v4599_v59 = vpop.f32.mrb[187].mxu0  ;;  %v4689_v26 = vmax.f32 %v4657_v4, 0.0  ;;  %v4859_v4 = vrot.slane %v412_v48, %v1649_v44 }
 0xc75   : > { %v4656_v58 = vadd.f32 %v8365_v34, %v4599_v59  ;;  %v4687_v5 = vmax.f32 %v4655_v10, 0.0 }
 0xc76   : > { %v4690_v16 = vmax.f32 %v4658_v19, 0.0 }
 0xc77   : > { %v4688_v62 = vmax.f32 %v4656_v58, 0.0 }
 0xc78   : > { %v4712_v47 = vpack.c.bf16 %v4690_v16, %v4689_v26 }
 0xc79   : > { %v4711_v18 = vpack.c.bf16 %v4688_v62, %v4687_v5 }
 0xc7b   : > { %6161 = vmatprep.subr.bf16.mxu1 %v4711_v18 }
 0xc7c   : > { %6162 = vmatpush3.bf16.msra.mxu1 %v8389_v22 }
 0xc7d   : > { %6163 = vmatprep.subr.bf16.mxu1 %v4712_v47 }
 0xc80   : > { %6164 = vmatpush3.bf16.msra.mxu1 %v8387_v17  ;;  %v4695_v17 = vld [vmem:[%s8370_s25] sm:$0xff]  ;;  %s4929_s25 = scalar_lea.sflag [#allocation4], %s7373_s18 }
 0xc81   : > { %v6617_v61 = vpop.f32.mrb[188].mxu0  ;;  %v4697_v56 = vpack.c.bf16 %v4695_v17, %v4695_v17 }
 0xc82   : > { %v4661_v27 = vadd.f32 %v6617_v61, %v8365_v34  ;;  %v4612_v28 = vpop.f32.mrb[189].mxu0 }
 0xc83   : > { %v4659_v29 = vadd.f32 %v8365_v34, %v4612_v28  ;;  %v6618_v30 = vpop.f32.mrb[190].mxu0 }
 0xc84   : > { %v4662_v31 = vadd.f32 %v6618_v30, %v8365_v34  ;;  %v4615_v32 = vpop.f32.mrb[191].mxu0  ;;  %v4693_v38 = vmax.f32 %v4661_v27, 0.0 }
 0xc85   : > { %v4660_v35 = vadd.f32 %v8365_v34, %v4615_v32  ;;  %v4691_v42 = vmax.f32 %v4659_v29, 0.0  ;;  %v6972_v34 = vld [vmem:[%s8513_s6 + $0x8] sm:$0xff]  }
 0xc86   : > { %v4694_v41 = vmax.f32 %v4662_v31, 0.0 }
 0xc87   : > { %v4692_v22 = vmax.f32 %v4660_v35, 0.0 }
 0xc88   : > { %v4714_v43 = vpack.c.bf16 %v4694_v41, %v4693_v38 }
 0xc89   : > { %v4713_v45 = vpack.c.bf16 %v4692_v22, %v4691_v42 }
 0xc8b   : > { %6165 = vmatprep.subr.bf16.mxu1 %v4713_v45 }
 0xc8c   : > { %6166 = vmatpush3.bf16.msra.mxu1 %v8397_v52  ;;  %v6973_v52 = vld [vmem:[%s8513_s6 + $0x10] sm:$0xff]  }
 0xc8d   : > { %6167 = vmatprep.subr.bf16.mxu1 %v4714_v43 }
 0xc90   : > { %6168 = vmatpush3.bf16.msra.mxu1 %v8395_v50  ;;  %v6974_v50 = vld [vmem:[%s8513_s6 + $0x18] sm:$0xff]  }
 0xc91   : > { %6619 = vmatprep.subr.bf16.mxu1 %v7181_v2 }
 0xc93   : > { %4748 = vmatmul.mubr.bf16.vlgmr.msra.gmra.mrb[64].mxu1 %v4697_v56 }
 0xc94   : > { %6620 = vmatpush3.bf16.msra.mxu1 %v6971_v57  ;;  %6627 = vmatprep.mubr.msk.bf16.mxu1 %vm7182_vm2, %v7181_v2 }
 0xc95   : > { %6621 = vmatprep.subr.bf16.mxu1 %v7181_v2 }
 0xc98   : > { %6622 = vmatpush3.bf16.msra.mxu1 %v6972_v34 }
 0xc99   : > { %6623 = vmatprep.subr.bf16.mxu1 %v7181_v2 }
 0xc9c   : > { %6624 = vmatpush3.bf16.msra.mxu1 %v6973_v52 }
 0xc9d   : > { %6625 = vmatprep.subr.bf16.mxu1 %v7181_v2 }
 0xca0   : > { %6626 = vmatpush3.bf16.msra.mxu1 %v6974_v50 }
 0xca1   : > { %6631 = vmatprep.subr.bf16.mxu1 %v7181_v2 }
 0xd66   : > { %v6169_v36 = vpop.f32.mrb[64].mxu1 }
 0xd67   : > { %v6170_v33 = vpop.f32.mrb[65].mxu1 }
 0xd68   : > { %v6171_v0 = vadd.f32 %v6170_v33, %v6169_v36  ;;  %v6172_v8 = vpop.f32.mrb[66].mxu1 }
 0xd69   : > { %v6173_v14 = vpop.f32.mrb[67].mxu1 }
 0xd6a   : > { %v4755_v9 = vpack.c.bf16 %v6171_v0, %v6171_v0 }
 0xd6c   : > { %6628 = vmatmul.mubr.msk.bf16.vlgmr.msra.gmra.mrb[68].mxu1 %vm1204_vm1, %v4755_v9 }
 0xd6d   : > { %6632 = vmatpush3.bf16.msra.mxu1 %v6975_v7  ;;  %6639 = vmatprep.mubr.msk.bf16.mxu1 %vm7182_vm2, %v7181_v2 }
 0xd6e   : > { %6633 = vmatprep.subr.bf16.mxu1 %v7181_v2 }
 0xd71   : > { %6634 = vmatpush3.bf16.msra.mxu1 %v6976_v15 }
 0xd72   : > { %6635 = vmatprep.subr.bf16.mxu1 %v7181_v2 }
 0xd75   : > { %6636 = vmatpush3.bf16.msra.mxu1 %v6977_v13 }
 0xd76   : > { %6637 = vmatprep.subr.bf16.mxu1 %v7181_v2 }
 0xd79   : > { %6638 = vmatpush3.bf16.msra.mxu1 %v6978_v20 }
 0xe3f   : > { %v4829_v11 = vpop.f32.mrb[68].mxu1 }
 0xe40   : > { %v4830_v39 = vadd.f32 %v4829_v11, %v4767_v51  ;;  %v6629_v55 = vpop.f32.mrb[69].mxu1 }
 0xe41   : > { %v4832_v46 = vpop.f32.mrb[70].mxu1 }
 0xe42   : > { %v4835_v49 = vmax.f32 %v4830_v39, 0.0  ;;  %v6630_v37 = vpop.f32.mrb[71].mxu1 }
 0xe44   : > { %v4840_v54 = vmul.f32 %v4839_v6, %v4835_v49 }
 0xe46   : > { %v4845_v21 = vadd.f32 %v4844_v1, %v4840_v54 }
 0xe48   : > { %v4846_v53 = vmax.f32 %v4845_v21, 0.0 }
 0xe4a   : > { %v4847_v60 = vpack.c.bf16 %v4846_v53, %v4846_v53 }
 0xe4c   : > { %6640 = vmatmul.mubr.msk.bf16.vlgmr.msra.gmra.mrb[72].mxu1 %vm1204_vm1, %v4847_v60 }
 0xf1f   : > { %v4921_v3 = vpop.f32.mrb[72].mxu1 }
 0xf20   : > { %v4922_v63 = vadd.f32 %v4921_v3, %v4859_v4  ;;  %v6641_v10 = vpop.f32.mrb[73].mxu1 }
 0xf21   : > { %v4924_v24 = vpop.f32.mrb[74].mxu1 }
 0xf22   : > { %4927 = vst [vmem:[%s397_s24] sm:$0xff] %v4922_v63  ;;  %v6642_v23 = vpop.f32.mrb[75].mxu1 }
 0xf23   : > { %7116 = shalt.err (!%p7113_p2)
}
 0xf24   : > { %s7117_s18 = scalar_lea.hbm %s8463_s15, 128  ;;  %s7121_s22 = scalar_lea.hbm %s8516_s9, 256 }
 0xf25   : > { %p7118_p0 = scmp.ne.s32.totalorder %s8463_s15, %s7117_s18  ;;  %p7122_p1 = scmp.lt.u32.totalorder %s8463_s15, %s8516_s9 }
 0xf26   : > { %p7123_p4 = scmp.lt.u32.totalorder %s7121_s22, %s7117_s18  ;;  %p7125_p8 = scmp.lt.u32.totalorder %s7117_s18, %s8463_s15 }
 0xf27   : > { %p7119_p5 = pnand %p7118_p0, %p7325_p12 }
 0xf28   : > { %p7124_p6 = por %p7123_p4, %p7122_p1 }
 0xf29   : > { %p7120_p11 = pneg %p7119_p5 }
 0xf2a   : > { %p7126_p10 = por %p7125_p8, %p7124_p6 }
 0xf2c   : > { %p7127_p13 = pnand %p7126_p10, %p7120_p11 }
 0xf2e   : > { %7130 = shalt.err (!%p7127_p13)
}
 0xf2f   : > { %6809 = dma.vmem_to_hbm [thread:$0]  (%p7325_p12), %s8465_s19, 128, %s8463_s15, %s4929_s25  }
 0xf30 PF: > { %s8536_s16 = sld [smem:[#allocation11_spill]]  ;;  %s4954_s21 = sand.u32 1, %s7161_s30  }
 0xf31   : > { %p8538_p7 = scmp.ge.s32.totalorder %s7173_s12, 2  ;;  %s4955_s13 = scalar_lea.sflag [#allocation4], %s4954_s21 }
 0xf36   : > { %p8537_p3 = scmp.ne.s32.totalorder %s8536_s16, 0 }
 0xf38   : > { %p6820_p9 = pnand %p8538_p7, %p8537_p3 }
 0xf3a   : > { %7156 = dma.done.wait (!%p6820_p9), %s4955_s13, 128  }
 0xf3b   : > { %7158 = vsyncadd (!%p6820_p9), %s4955_s13, 4294967168  ;;  %s8539_s12 = sld [smem:[#allocation12_spill]]  ;;  %s8540_s30 = smov %s7165_s10 }
 0xf3c   : > { %s8541_s10 = smov %s7169_s11  ;;  %s8542_s11 = smov %s7321_s28 }
 0xf41   : > { %p23_p2 = scmp.ge.s32.totalorder %s8539_s12, 4  }
 0xf43   :  { %25 = sbr.rel (!%p23_p2) target bundleno = 6 (0x6), region = 119 }
 0xf4a   :  { %4960 = vsyncpa [#allocation3], 1 }
 0xf4b   :  { %4962 = vsyncpa [#allocation3 + $0x1], 1 }
 0xf4c   :  { %4963 = vsyncpa [#allocation6], 1 }
 0xf4d   :  { %4964 = vsyncpa [#allocation4], 1 }
 0xf4e   :  { %4966 = vsyncpa [#allocation4 + $0x1], 1 }

</bundles_post_ra>
